<compile_context>
chip_gen: v7x
topology: tpu7x:2x2x1
jax: 0.10.0
libtpu: 0.0.40
codegen_flags: <defaults>
</compile_context>

<pallas_src>
import math

import jax
import jax.numpy as jnp
import numpy as np
from jax.experimental import pallas as pl
from jax.experimental.pallas import tpu as pltpu


# ----------------------------------------------------------------------------
# Stage 1: per-node projections  kvq = h @ [Wk | Wv | Wq][ntype]
# ----------------------------------------------------------------------------
def node_proj_kernel(h_ref, nt_ref, w_ref, k_ref, v_ref, q_ref):
    h = h_ref[...]                                   # (bn, IN) f32
    nt = nt_ref[...]                                 # (bn, 1)  int32
    out_dim = k_ref.shape[1]
    num_types = w_ref.shape[0]

    kvq = jnp.zeros((h.shape[0], 3 * out_dim), jnp.float32)
    for ty in range(num_types):                      # T is small: static unroll
        mask = (nt == ty).astype(jnp.float32)        # (bn, 1)
        proj = jnp.dot(h, w_ref[ty], preferred_element_type=jnp.float32)  # (bn, 3*OUT)
        kvq = kvq + mask * proj

    k_ref[...] = kvq[:, :out_dim].astype(k_ref.dtype)              # bf16 storage
    v_ref[...] = kvq[:, out_dim:2 * out_dim].astype(v_ref.dtype)   # bf16 storage
    q_ref[...] = kvq[:, 2 * out_dim:].astype(q_ref.dtype)          # f32


# ----------------------------------------------------------------------------
# Stage 2: relation transforms, edge softmax, weighted reduce, skip update.
# All per-edge work happens on lane-dense (bn, D*OUT) slabs.
# ----------------------------------------------------------------------------
def hgt_attn_kernel(q_ref, k_ref, v_ref, et_ref, nt_ref,
                    ratt_ref, rmsg_ref, aw_ref, expand_ref, gsum_ref, out_ref):
    num_rels = ratt_ref.shape[0]
    num_types = aw_ref.shape[0]
    d = et_ref.shape[1]

    q = q_ref[...]                                   # (bn, OUT)   f32
    k = k_ref[...].astype(jnp.float32)               # (bn, D*OUT) bf16 -> f32
    v = v_ref[...].astype(jnp.float32)               # (bn, D*OUT) bf16 -> f32
    et = et_ref[...]                                 # (bn, D)     int32
    nt = nt_ref[...]                                 # (bn, 1)     int32
    expand = expand_ref[...]                         # (D, D*OUT)  0/1
    gsum = gsum_ref[...]                             # (D*OUT, D)  0/1
    bn = q.shape[0]
    out_dim = q.shape[1]

    # per-relation edge masks built in-kernel from int etype (no one-hot HBM traffic)
    rel_mask = [(et == r).astype(jnp.float32) for r in range(num_rels)]   # each (bn, D)

    # ---- attention logits: attn[n,d] = k[n,d,:] . (Ratt_scaled[e(n,d)] @ q[n]) ----
    # ratt_ref[r] is Ratt_scaled[r]^T lane-tiled to (OUT, D*OUT), so one wide
    # MXU matmul produces qr for all D mailbox slots at once.
    attn = jnp.zeros((bn, d), jnp.float32)
    for r in range(num_rels):
        qr = jnp.dot(q, ratt_ref[r], preferred_element_type=jnp.float32)   # (bn, D*OUT)
        s_r = jnp.dot(k * qr, gsum, preferred_element_type=jnp.float32)    # (bn, D)
        attn = attn + rel_mask[r] * s_r

    # ---- softmax over the D incoming edges --------------------------------
    m = jnp.max(attn, axis=-1, keepdims=True)
    e = jnp.exp(attn - m)
    w = e * pl.reciprocal(jnp.sum(e, axis=-1, keepdims=True), approx=False)  # (bn, D)

    # ---- weighted, relation-transformed message ----------------------------
    # t[n] = sum_r ( sum_d w*[etype==r]*v[n,d,:] ) @ Rmsg[r]
    # rmsg_ref[r] is Rmsg[r] row-tiled to (D*OUT, OUT) so the D-sum and the
    # relation matmul fuse into a single (bn, D*OUT)@(D*OUT, OUT) MXU op.
    t = jnp.zeros((bn, out_dim), jnp.float32)
    for r in range(num_rels):
        wl = jnp.dot(w * rel_mask[r], expand, preferred_element_type=jnp.float32)  # (bn, D*OUT)
        t = t + jnp.dot(wl * v, rmsg_ref[r], preferred_element_type=jnp.float32)   # (bn, OUT)

    # ---- update: out[n] = t[n] @ (a_weight[tn] * sigmoid(skip[tn])) --------
    out = jnp.zeros_like(t)
    for ty in range(num_types):
        mask_t = (nt == ty).astype(jnp.float32)      # (bn, 1)
        out = out + mask_t * jnp.dot(t, aw_ref[ty], preferred_element_type=jnp.float32)
    out_ref[...] = out


# ----------------------------------------------------------------------------
# Wrapper
# ----------------------------------------------------------------------------
def hgt_layer_forward(h, ntype, src_idx, etype, params, *, block_n=512):
    f32 = jnp.float32
    bf16 = jnp.bfloat16
    N, IN = h.shape
    D = src_idx.shape[1]
    T, _, OUT = params["k_weight"].shape
    R = params["relation_att"].shape[0]
    sqrt_dk = math.sqrt(OUT)

    bn = min(block_n, N)
    assert N % bn == 0, "N must be divisible by the node block size"
    grid = (N // bn,)

    nt2d = ntype.reshape(N, 1).astype(jnp.int32)      # (N, 1) int32
    et2d = etype.astype(jnp.int32)                    # (N, D) int32

    # --- Stage 1: fused per-node k|v|q projection ---------------------------
    w_all = jnp.concatenate(
        [params["k_weight"], params["v_weight"], params["q_weight"]],
        axis=-1)                                      # (T, IN, 3*OUT)

    k_node, v_node, q_node = pl.pallas_call(
        node_proj_kernel,
        out_shape=(jax.ShapeDtypeStruct((N, OUT), bf16),
                   jax.ShapeDtypeStruct((N, OUT), bf16),
                   jax.ShapeDtypeStruct((N, OUT), f32)),
        grid=grid,
        in_specs=[
            pl.BlockSpec((bn, IN), lambda i: (i, 0)),              # h
            pl.BlockSpec((bn, 1), lambda i: (i, 0)),               # ntype (int32)
            pl.BlockSpec((T, IN, 3 * OUT), lambda i: (0, 0, 0)),   # fused weights (resident)
        ],
        out_specs=(pl.BlockSpec((bn, OUT), lambda i: (i, 0)),
                   pl.BlockSpec((bn, OUT), lambda i: (i, 0)),
                   pl.BlockSpec((bn, OUT), lambda i: (i, 0))),
        compiler_params=pltpu.CompilerParams(
            dimension_semantics=("parallel",)),
    )(h, nt2d, w_all)

    # TODO(synk): data-dependent per-edge row gather kept in XLA (bf16 halves
    # its HBM traffic); an in-kernel DMA gather would remove this round-trip.
    k_src = k_node[src_idx].reshape(N, D * OUT)       # (N, D*OUT) bf16, lane-dense
    v_src = v_node[src_idx].reshape(N, D * OUT)       # (N, D*OUT) bf16, lane-dense

    # Fold relation_pri / sqrt_dk into relation_att and sigmoid(skip) into
    # a_weight; lane-tile the relation weights so stage 2 uses only wide,
    # lane-dense matmuls on (bn, D*OUT) slabs.
    pri = params["relation_pri"].reshape(R, 1, 1) / sqrt_dk
    ratt_t = jnp.swapaxes(params["relation_att"] * pri, 1, 2)     # (R, OUT, OUT)
    ratt_tiled = jnp.tile(ratt_t, (1, 1, D))                      # (R, OUT, D*OUT)
    rmsg_tiled = jnp.tile(params["relation_msg"], (1, D, 1))      # (R, D*OUT, OUT)
    aw = params["a_weight"] * jax.nn.sigmoid(params["skip"]).reshape(T, 1, 1)

    # Tiny constant 0/1 matrices: lane expansion (D -> D*OUT) and per-edge
    # lane-group reduction (D*OUT -> D).  Built once outside the kernel.
    d_ids = jnp.arange(D, dtype=jnp.int32)
    lane_group = jnp.repeat(d_ids, OUT)                            # (D*OUT,)
    expand = (d_ids[:, None] == lane_group[None, :]).astype(f32)   # (D, D*OUT)
    group_sum = jnp.transpose(expand)                              # (D*OUT, D)

    # --- Stage 2: attention / reduce / update -------------------------------
    out = pl.pallas_call(
        hgt_attn_kernel,
        out_shape=jax.ShapeDtypeStruct((N, OUT), f32),
        grid=grid,
        in_specs=[
            pl.BlockSpec((bn, OUT), lambda i: (i, 0)),             # q (f32)
            pl.BlockSpec((bn, D * OUT), lambda i: (i, 0)),         # k_src (bf16)
            pl.BlockSpec((bn, D * OUT), lambda i: (i, 0)),         # v_src (bf16)
            pl.BlockSpec((bn, D), lambda i: (i, 0)),               # etype (int32)
            pl.BlockSpec((bn, 1), lambda i: (i, 0)),               # ntype (int32)
            pl.BlockSpec((R, OUT, D * OUT), lambda i: (0, 0, 0)),  # Ratt^T tiled (resident)
            pl.BlockSpec((R, D * OUT, OUT), lambda i: (0, 0, 0)),  # Rmsg tiled (resident)
            pl.BlockSpec((T, OUT, OUT), lambda i: (0, 0, 0)),      # a_weight*sigmoid(skip)
            pl.BlockSpec((D, D * OUT), lambda i: (0, 0)),          # expand
            pl.BlockSpec((D * OUT, D), lambda i: (0, 0)),          # group_sum
        ],
        out_specs=pl.BlockSpec((bn, OUT), lambda i: (i, 0)),
        compiler_params=pltpu.CompilerParams(
            dimension_semantics=("parallel",)),
    )(q_node, k_src, v_src, et2d, nt2d, ratt_tiled, rmsg_tiled, aw,
      expand, group_sum)
    return out


# ----------------------------------------------------------------------------
# Pure-JAX reference (mirrors message_func / reduce_func / update_func).
# ----------------------------------------------------------------------------
def hgt_reference(h, ntype, src_idx, etype, p):
    OUT = p["k_weight"].shape[-1]
    sqrt_dk = math.sqrt(OUT)
    src_t = ntype[src_idx]
    h_src = h[src_idx]
    k = jnp.einsum("ndi,ndio->ndo", h_src, p["k_weight"][src_t])
    v = jnp.einsum("ndi,ndio->ndo", h_src, p["v_weight"][src_t])
    q = jnp.einsum("ni,nio->no", h, p["q_weight"][ntype])
    k = jnp.einsum("ndo,ndop->ndp", k, p["relation_att"][etype])
    v = jnp.einsum("ndo,ndop->ndp", v, p["relation_msg"][etype])
    attn = (jnp.sum(k * q[:, None, :], axis=-1, keepdims=True)
            * p["relation_pri"][etype] / sqrt_dk)               # (N, D, 1)
    w = jax.nn.softmax(attn, axis=1)
    t = jnp.sum(w * v, axis=1)                                  # (N, OUT)
    trans = jnp.einsum("no,nop->np", t, p["a_weight"][ntype])
    alpha = jax.nn.sigmoid(p["skip"][ntype])
    return trans * alpha[:, None]


if __name__ == "__main__":
    # Module-consistent shapes; N large enough for an 8-step grid at bn=512.
    N = 4096          # number of nodes (each is a destination)
    D = 8             # fixed in-degree (mailbox depth); D*OUT = 128 lanes
    IN_FEAT = 16
    OUT_FEAT = 16
    NUM_NTYPES = 3
    NUM_RELS = 5

    key = jax.random.PRNGKey(0)
    ks = jax.random.split(key, 10)

    # Parameter init (shapes from HGTLayer_simplified.__init__).
    params = {
        "k_weight": jax.random.uniform(ks[0], (NUM_NTYPES, IN_FEAT, OUT_FEAT), jnp.float32),
        "q_weight": jax.random.uniform(ks[1], (NUM_NTYPES, IN_FEAT, OUT_FEAT), jnp.float32),
        "v_weight": jax.random.uniform(ks[2], (NUM_NTYPES, IN_FEAT, OUT_FEAT), jnp.float32),
        "a_weight": jax.random.uniform(ks[3], (NUM_NTYPES, OUT_FEAT, OUT_FEAT), jnp.float32),
        "relation_pri": jnp.ones((NUM_RELS, 1), jnp.float32),
        "relation_att": jax.random.uniform(ks[4], (NUM_RELS, OUT_FEAT, OUT_FEAT), jnp.float32),
        "relation_msg": jax.random.uniform(ks[5], (NUM_RELS, OUT_FEAT, OUT_FEAT), jnp.float32),
        "skip": jnp.ones((NUM_NTYPES,), jnp.float32),
    }

    # Synthetic graph: node features, node types, per-dst source indices and
    # per-edge relation types.  (h scaled so the softmax is well-conditioned.)
    h = jax.random.uniform(ks[6], (N, IN_FEAT), jnp.float32) * 0.05
    ntype = jax.random.randint(ks[7], (N,), 0, NUM_NTYPES, jnp.int32)
    src_idx = jax.random.randint(ks[8], (N, D), 0, N, jnp.int32)
    etype = jax.random.randint(ks[9], (N, D), 0, NUM_RELS, jnp.int32)

    out = hgt_layer_forward(h, ntype, src_idx, etype, params, block_n=512)
    out = jax.block_until_ready(out)

    ref = hgt_reference(h, ntype, src_idx, etype, params)
    # Tolerance accommodates bf16 storage of the gathered k/v source features.
    np.testing.assert_allclose(np.asarray(out), np.asarray(ref),
                               rtol=2e-2, atol=2e-2)
    print("KERNEL_OK")
</pallas_src>

<mosaic_0001>
module attributes {stable_mosaic.version = 11 : i64} {
  func.func @node_proj_kernel(%arg0: i32, %arg1: memref<512x16xf32, #tpu.memory_space<vmem>>, %arg2: memref<512x1xi32, #tpu.memory_space<vmem>>, %arg3: memref<3x16x48xf32, #tpu.memory_space<vmem>>, %arg4: memref<512x16xbf16, #tpu.memory_space<vmem>>, %arg5: memref<512x16xbf16, #tpu.memory_space<vmem>>, %arg6: memref<512x16xf32, #tpu.memory_space<vmem>>) attributes {dimension_semantics = [#tpu.dimension_semantics<parallel>], iteration_bounds = array<i64: 8>, scalar_prefetch = 0 : i64, scratch_operands = 0 : i64, tpu.core_type = #tpu.core_type<tc>, window_params = [{transform_indices = @transform_0, window_bounds = array<i64: 512, 16>}, {transform_indices = @transform_1, window_bounds = array<i64: 512, 1>}, {pipeline_mode = #tpu.pipeline_mode<synchronous>, transform_indices = @transform_2, window_bounds = array<i64: 3, 16, 48>}, {transform_indices = @transform_3, window_bounds = array<i64: 512, 16>}, {transform_indices = @transform_4, window_bounds = array<i64: 512, 16>}, {transform_indices = @transform_5, window_bounds = array<i64: 512, 16>}]} {
    %c0 = arith.constant 0 : index
    %c0_0 = arith.constant 0 : index
    %0 = vector.load %arg1[%c0, %c0_0] : memref<512x16xf32, #tpu.memory_space<vmem>>, vector<512x16xf32>
    %c0_1 = arith.constant 0 : index
    %c0_2 = arith.constant 0 : index
    %1 = vector.load %arg2[%c0_1, %c0_2] : memref<512x1xi32, #tpu.memory_space<vmem>>, vector<512x1xi32>
    %cst = arith.constant 0.000000e+00 : f32
    %2 = vector.broadcast %cst : f32 to vector<512x48xf32>
    %c0_i32 = arith.constant 0 : i32
    %3 = vector.broadcast %c0_i32 : i32 to vector<512x1xi32>
    %4 = arith.cmpi eq, %1, %3 : vector<512x1xi32>
    %5 = arith.extui %4 : vector<512x1xi1> to vector<512x1xi32>
    %6 = arith.sitofp %5 : vector<512x1xi32> to vector<512x1xf32>
    %c0_3 = arith.constant 0 : index
    %c0_4 = arith.constant 0 : index
    %c0_5 = arith.constant 0 : index
    %7 = vector.load %arg3[%c0_3, %c0_4, %c0_5] : memref<3x16x48xf32, #tpu.memory_space<vmem>>, vector<1x16x48xf32>
    %8 = vector.shape_cast %7 : vector<1x16x48xf32> to vector<16x48xf32>
    %cst_6 = arith.constant dense<0.000000e+00> : vector<512x48xf32>
    %9 = tpu.matmul %0, %8, %cst_6 {dimension_numbers = #tpu.dot_dimension_numbers<[1], [0], [0], [1], [0, 0, 1, 1], [], []>} : vector<512x16xf32>, vector<16x48xf32>, vector<512x48xf32> -> vector<512x48xf32>
    %10 = vector.broadcast %6 : vector<512x1xf32> to vector<512x48xf32>
    %11 = arith.mulf %10, %9 : vector<512x48xf32>
    %12 = arith.addf %2, %11 : vector<512x48xf32>
    %c1_i32 = arith.constant 1 : i32
    %13 = vector.broadcast %c1_i32 : i32 to vector<512x1xi32>
    %14 = arith.cmpi eq, %1, %13 : vector<512x1xi32>
    %15 = arith.extui %14 : vector<512x1xi1> to vector<512x1xi32>
    %16 = arith.sitofp %15 : vector<512x1xi32> to vector<512x1xf32>
    %c1 = arith.constant 1 : index
    %c0_7 = arith.constant 0 : index
    %c0_8 = arith.constant 0 : index
    %17 = vector.load %arg3[%c1, %c0_7, %c0_8] : memref<3x16x48xf32, #tpu.memory_space<vmem>>, vector<1x16x48xf32>
    %18 = vector.shape_cast %17 : vector<1x16x48xf32> to vector<16x48xf32>
    %cst_9 = arith.constant dense<0.000000e+00> : vector<512x48xf32>
    %19 = tpu.matmul %0, %18, %cst_9 {dimension_numbers = #tpu.dot_dimension_numbers<[1], [0], [0], [1], [0, 0, 1, 1], [], []>} : vector<512x16xf32>, vector<16x48xf32>, vector<512x48xf32> -> vector<512x48xf32>
    %20 = vector.broadcast %16 : vector<512x1xf32> to vector<512x48xf32>
    %21 = arith.mulf %20, %19 : vector<512x48xf32>
    %22 = arith.addf %12, %21 : vector<512x48xf32>
    %c2_i32 = arith.constant 2 : i32
    %23 = vector.broadcast %c2_i32 : i32 to vector<512x1xi32>
    %24 = arith.cmpi eq, %1, %23 : vector<512x1xi32>
    %25 = arith.extui %24 : vector<512x1xi1> to vector<512x1xi32>
    %26 = arith.sitofp %25 : vector<512x1xi32> to vector<512x1xf32>
    %c2 = arith.constant 2 : index
    %c0_10 = arith.constant 0 : index
    %c0_11 = arith.constant 0 : index
    %27 = vector.load %arg3[%c2, %c0_10, %c0_11] : memref<3x16x48xf32, #tpu.memory_space<vmem>>, vector<1x16x48xf32>
    %28 = vector.shape_cast %27 : vector<1x16x48xf32> to vector<16x48xf32>
    %cst_12 = arith.constant dense<0.000000e+00> : vector<512x48xf32>
    %29 = tpu.matmul %0, %28, %cst_12 {dimension_numbers = #tpu.dot_dimension_numbers<[1], [0], [0], [1], [0, 0, 1, 1], [], []>} : vector<512x16xf32>, vector<16x48xf32>, vector<512x48xf32> -> vector<512x48xf32>
    %30 = vector.broadcast %26 : vector<512x1xf32> to vector<512x48xf32>
    %31 = arith.mulf %30, %29 : vector<512x48xf32>
    %32 = arith.addf %22, %31 : vector<512x48xf32>
    %33 = vector.extract_strided_slice %32 {offsets = [0, 0], sizes = [512, 16], strides = [1, 1]} : vector<512x48xf32> to vector<512x16xf32>
    %34 = arith.truncf %33 : vector<512x16xf32> to vector<512x16xbf16>
    %c0_13 = arith.constant 0 : index
    %c0_14 = arith.constant 0 : index
    %35 = vector.load %arg4[%c0_13, %c0_14] : memref<512x16xbf16, #tpu.memory_space<vmem>>, vector<512x16xbf16>
    tpu.vector_store %arg4[%c0_13, %c0_14], %34 {strides = array<i32>} : memref<512x16xbf16, #tpu.memory_space<vmem>>, vector<512x16xbf16>,
    %36 = vector.extract_strided_slice %32 {offsets = [0, 16], sizes = [512, 16], strides = [1, 1]} : vector<512x48xf32> to vector<512x16xf32>
    %37 = arith.truncf %36 : vector<512x16xf32> to vector<512x16xbf16>
    %c0_15 = arith.constant 0 : index
    %c0_16 = arith.constant 0 : index
    %38 = vector.load %arg5[%c0_15, %c0_16] : memref<512x16xbf16, #tpu.memory_space<vmem>>, vector<512x16xbf16>
    tpu.vector_store %arg5[%c0_15, %c0_16], %37 {strides = array<i32>} : memref<512x16xbf16, #tpu.memory_space<vmem>>, vector<512x16xbf16>,
    %39 = vector.extract_strided_slice %32 {offsets = [0, 32], sizes = [512, 16], strides = [1, 1]} : vector<512x48xf32> to vector<512x16xf32>
    %c0_17 = arith.constant 0 : index
    %c0_18 = arith.constant 0 : index
    %40 = vector.load %arg6[%c0_17, %c0_18] : memref<512x16xf32, #tpu.memory_space<vmem>>, vector<512x16xf32>
    tpu.vector_store %arg6[%c0_17, %c0_18], %39 {strides = array<i32>} : memref<512x16xf32, #tpu.memory_space<vmem>>, vector<512x16xf32>,
    return
  }
  func.func @transform_0(%arg0: i32) -> (i32, i32) {
    %c0_i32 = arith.constant 0 : i32
    %c0_i32_0 = arith.constant 0 : i32
    return %arg0, %c0_i32 : i32, i32
  }
  func.func @transform_1(%arg0: i32) -> (i32, i32) {
    %c0_i32 = arith.constant 0 : i32
    %c0_i32_0 = arith.constant 0 : i32
    return %arg0, %c0_i32 : i32, i32
  }
  func.func @transform_2(%arg0: i32) -> (i32, i32, i32) {
    %c0_i32 = arith.constant 0 : i32
    %c0_i32_0 = arith.constant 0 : i32
    %c0_i32_1 = arith.constant 0 : i32
    %c0_i32_2 = arith.constant 0 : i32
    return %c0_i32, %c0_i32_0, %c0_i32_1 : i32, i32, i32
  }
  func.func @transform_3(%arg0: i32) -> (i32, i32) {
    %c0_i32 = arith.constant 0 : i32
    %c0_i32_0 = arith.constant 0 : i32
    return %arg0, %c0_i32 : i32, i32
  }
  func.func @transform_4(%arg0: i32) -> (i32, i32) {
    %c0_i32 = arith.constant 0 : i32
    %c0_i32_0 = arith.constant 0 : i32
    return %arg0, %c0_i32 : i32, i32
  }
  func.func @transform_5(%arg0: i32) -> (i32, i32) {
    %c0_i32 = arith.constant 0 : i32
    %c0_i32_0 = arith.constant 0 : i32
    return %arg0, %c0_i32 : i32, i32
  }
}

</mosaic_0001>

<bundles_post_ra>
// kernel: tpu_custom_call.1
= control target key start
LH: loop header
LB: loop body
LE: loop exit
PB: predicated region body
PF: predicated region fallthrough
CT: control target
= control target key end

     0   :  { %s6391_s18 = smov 0   ;;  %s9209_s0 = inlined_call_operand.vmem [shape: f32[4096,16], index: 0, kind: input, shape index: {}]   ;;  %s9210_s1 = inlined_call_operand.vmem [shape: s32[4096,1], index: 1, kind: input, shape index: {}]   ;;  %s9211_s2 = inlined_call_operand.vmem [shape: f32[3,16,48], index: 2, kind: input, shape index: {}]   ;;  %s9212_s3 = inlined_call_operand.vmem [shape: bf16[4096,16], index: 3, kind: output, shape index: {0}]   ;;  %s9213_s4 = inlined_call_operand.vmem [shape: bf16[4096,16], index: 4, kind: output, shape index: {1}]   ;;  %s9214_s5 = inlined_call_operand.vmem [shape: f32[4096,16], index: 5, kind: output, shape index: {2}]  }
   0x1 LB: > { %s4714_s19 = sadd.s32 4294967295, %s6355_s18   ;;  %p4718_p0 = scmp.ge.s32.totalorder %s6355_s18, 1  ;;  %s6355_s18 = sphi %s6391_s18, %s16_s18  }
   0x2   : > { %p204_p1 = scmp.lt.s32.totalorder %s6355_s18, 9 }
   0x4   : > { %p205_p2 = pnand %p4718_p0, %p204_p1 }
   0x6   : > { %208 = sbr.rel (%p205_p2) target bundleno = 688 (0x2b0), region = 32 }
   0xd   : > { %v597_v0 = vld [vmem:[%s9211_s2] sm:$0xff]  ;;  %v598_v1 = vld [vmem:[%s9211_s2 + $0x8] sm:$0xff]  ;;  %s4719_s24 = sshll.u32 %s4714_s19, 6  ;;  %v4921_v2 = vld [vmem:[%s9211_s2 + $0x10] sm:$0xff]  ;;  %v6357_v7 = vmov 0   ;;  %vm599_vm0 = vcmask 130048  }
   0xe   : > { %v5745_v3 = vpack.c.bf16 %v598_v1, %v597_v0  ;;  %p248_p3 = scmp.lt.s32.totalorder %s4719_s24, 511  ;;  %v4922_v4 = vld [vmem:[%s9211_s2 + $0x18] sm:$0xff]  ;;  %v5051_v5 = vld [vmem:[%s9211_s2 + $0x20] sm:$0xff]  ;;  %v5052_v6 = vld [vmem:[%s9211_s2 + $0x28] sm:$0xff]  ;;  %5782 = vset.pattern.permute.xlu1 %v6357_v7  ;;  %5771 = vset.pattern.permute.xlu0 %v6357_v7  ;;  %v9215_v19 = vmov 0.0   ;;  %s6359_s20 = smov 96  }
   0xf   : > { %v5749_v8 = vpack.c.bf16 %v4922_v4, %v4921_v2  ;;  %v5753_v9 = vpack.c.bf16 %v5052_v6, %v5051_v5  ;;  %s6360_s21 = smov 112  }
  0x10   : > { %5757 = vmatprep.subr.bf16.mxu1 %v5745_v3  ;;  %5746 = vmatprep.subr.bf16.mxu0 %v5745_v3  ;;  %s9711_s24 = smov (!%p248_p3, %s4719_s24), 511 }
  0x11   : > { %5758 = vmatpush3.bf16.msra.mxu1 %v5745_v3  ;;  %5748 = vmatpush3.bf16.msra.mxu0 %v5745_v3  ;;  %s6420_s8 = sshll.u32 %s9711_s24, 3  ;;  %s4724_s15 = sshll.u32 %s9711_s24, 2 }
  0x12   : > { %5750 = vmatprep.subr.bf16.mxu1 %v5749_v8  ;;  %5754 = vmatprep.subr.bf16.mxu0 %v5753_v9  ;;  %s6426_s11 = scalar_lea.vmem %s9209_s0, %s6420_s8  ;;  %s6432_s14 = scalar_lea.vmem %s9210_s1, %s6420_s8 }
  0x13   : > { %v6435_v10 = vld [vmem:[%s6426_s11] sm:$0xff]  ;;  %v6439_v12 = vld [vmem:[%s6426_s11 + $0x8] sm:$0xff]  ;;  %v6463_v18 = vld [vmem:[%s6426_s11 + $0x10] sm:$0xff]  ;;  %s7900_s19 = scalar_lea.vmem %s9212_s3, %s4724_s15  ;;  %s8718_s25 = scalar_lea.vmem %s9214_s5, %s6420_s8 }
  0x14   : > { %v309_v11 = vld [vmem:[%s6426_s11 + $0x100] sm:$0xff]  ;;  %5449 = vmatprep.mubr.msk.f32.mxu0 %vm599_vm0, %v6435_v10  ;;  %v310_v13 = vld [vmem:[%s6426_s11 + $0x108] sm:$0xff]  ;;  %v311_v22 = vld [vmem:[%s6426_s11 + $0x110] sm:$0xff]  ;;  %s8759_s28 = scalar_lea.vmem %s9213_s4, %s4724_s15 }
  0x15   : > { %5497 = vmatprep.mubr.msk.f32.mxu1 %vm599_vm0, %v309_v11  ;;  %v6446_v14 = vld [vmem:[%s6432_s14 + $0x20] sm:$0xff]  ;;  %v6449_v15 = vld [vmem:[%s6432_s14 + $0x28] sm:$0xff]  ;;  %5450 = vmatmul.mubr.msk.f32.vlgmr.msra.gmra.mrb[0].mxu0 %vm599_vm0, %v6439_v12  ;;  %v6471_v23 = vld [vmem:[%s6426_s11 + $0x18] sm:$0xff] }
  0x16   : > { %5498 = vmatmul.mubr.msk.f32.vlgmr.msra.gmra.mrb[0].mxu1 %vm599_vm0, %v310_v13  ;;  %vm409_vm1 = vcmp.eq.s32.totalorder %v6446_v14, 0  ;;  %vm410_vm2 = vcmp.eq.s32.totalorder %v6449_v15, 0  ;;  %v6457_v16 = vld [vmem:[%s6432_s14] sm:$0xff]  ;;  %v6460_v17 = vld [vmem:[%s6432_s14 + $0x8] sm:$0xff]  ;;  %5756 = vmatpush3.bf16.msra.mxu0 %v5753_v9  ;;  %v312_v27 = vld [vmem:[%s6426_s11 + $0x118] sm:$0xff] }
  0x17   : > { %5752 = vmatpush3.bf16.msra.mxu1 %v5749_v8  ;;  %v4733_v20 = vsel %vm409_vm1, 1.0, %v9215_v19  ;;  %v4734_v21 = vsel %vm410_vm2, 1.0, %v9215_v19  ;;  %vm405_vm3 = vcmp.eq.s32.totalorder %v6457_v16, 0  ;;  %vm406_vm4 = vcmp.eq.s32.totalorder %v6460_v17, 0  ;;  %5452 = vmatprep.mubr.msk.f32.mxu0 %vm599_vm0, %v6463_v18  ;;  %v6480_v28 = vld [vmem:[%s6432_s14 + $0x30] sm:$0xff]  ;;  %v6483_v29 = vld [vmem:[%s6432_s14 + $0x38] sm:$0xff] }
  0x18   : > { %v5783_v24 = vpack.i.bf16 %v4734_v21, %v4733_v20  ;;  %v4729_v25 = vsel %vm405_vm3, 1.0, %v9215_v19  ;;  %v4730_v26 = vsel %vm406_vm4, 1.0, %v9215_v19  ;;  %5500 = vmatprep.mubr.msk.f32.mxu1 %vm599_vm0, %v311_v22  ;;  %vm411_vm5 = vcmp.eq.s32.totalorder %v6480_v28, 0  ;;  %v6488_v31 = vld [vmem:[%s6432_s14 + $0x10] sm:$0xff]  ;;  %v6491_v32 = vld [vmem:[%s6432_s14 + $0x18] sm:$0xff]  ;;  %v6494_v33 = vld [vmem:[%s6426_s11 + $0x20] sm:$0xff] }
  0x19   : > { %v5772_v30 = vpack.i.bf16 %v4730_v26, %v4729_v25  ;;  %vm412_vm6 = vcmp.eq.s32.totalorder %v6483_v29, 0  ;;  %5453 = vmatmul.mubr.msk.f32.gmra.mrb[2].mxu0 %vm599_vm0, %v6471_v23  ;;  %v4735_v34 = vsel %vm411_vm5, 1.0, %v9215_v19  ;;  %vm407_vm7 = vcmp.eq.s32.totalorder %v6488_v31, 0  ;;  %v313_v36 = vld [vmem:[%s6426_s11 + $0x120] sm:$0xff]  ;;  %v6507_v40 = vld [vmem:[%s6426_s11 + $0x28] sm:$0xff]  ;;  %v6510_v41 = vld [vmem:[%s6432_s14 + $0x50] sm:$0xff] }
  0x1a   : > { %5784 = vperm.xlu1 %5782, %v5783_v24   ;;  %v4736_v35 = vsel %vm412_vm6, 1.0, %v9215_v19  ;;  %vm408_vm8 = vcmp.eq.s32.totalorder %v6491_v32, 0  ;;  %5501 = vmatmul.mubr.msk.f32.gmra.mrb[2].mxu1 %vm599_vm0, %v312_v27  ;;  %v4731_v38 = vsel %vm407_vm7, 1.0, %v9215_v19  ;;  %v6513_v42 = vld [vmem:[%s6432_s14 + $0x58] sm:$0xff]  ;;  %v314_v44 = vld [vmem:[%s6426_s11 + $0x128] sm:$0xff]  ;;  %vm415_vm9 = vcmp.eq.s32.totalorder %v6510_v41, 0 }
  0x1b   : > { %5773 = vperm.xlu0 %5771, %v5772_v30   ;;  %v5788_v37 = vpack.i.bf16 %v4736_v35, %v4735_v34  ;;  %v4732_v39 = vsel %vm408_vm8, 1.0, %v9215_v19  ;;  %5455 = vmatprep.mubr.msk.f32.mxu0 %vm599_vm0, %v6494_v33  ;;  %vm416_vm10 = vcmp.eq.s32.totalorder %v6513_v42, 0  ;;  %v6522_v45 = vld [vmem:[%s6432_s14 + $0x40] sm:$0xff]  ;;  %v6525_v46 = vld [vmem:[%s6432_s14 + $0x48] sm:$0xff]  ;;  %v4739_v47 = vsel %vm415_vm9, 1.0, %v9215_v19  ;;  %v6532_v49 = vld [vmem:[%s6426_s11 + $0x30] sm:$0xff] }
  0x1c   : > { %v5777_v43 = vpack.i.bf16 %v4732_v39, %v4731_v38  ;;  %5503 = vmatprep.mubr.msk.f32.mxu1 %vm599_vm0, %v313_v36  ;;  %v4740_v48 = vsel %vm416_vm10, 1.0, %v9215_v19  ;;  %vm413_vm11 = vcmp.eq.s32.totalorder %v6522_v45, 0  ;;  %vm414_vm12 = vcmp.eq.s32.totalorder %v6525_v46, 0  ;;  %v315_v50 = vld [vmem:[%s6426_s11 + $0x130] sm:$0xff]  ;;  %v6543_v55 = vld [vmem:[%s6432_s14 + $0x78] sm:$0xff]  ;;  %v6552_v58 = vld [vmem:[%s6432_s14 + $0x60] sm:$0xff] }
  0x1d   : > { %5456 = vmatmul.mubr.msk.f32.gmra.mrb[4].mxu0 %vm599_vm0, %v6507_v40  ;;  %v5798_v51 = vpack.i.bf16 %v4740_v48, %v4739_v47  ;;  %v4737_v52 = vsel %vm413_vm11, 1.0, %v9215_v19  ;;  %v4738_v53 = vsel %vm414_vm12, 1.0, %v9215_v19  ;;  %v6540_v54 = vld [vmem:[%s6432_s14 + $0x70] sm:$0xff]  ;;  %v6547_v57 = vld [vmem:[%s6426_s11 + $0x38] sm:$0xff]  ;;  %vm420_vm14 = vcmp.eq.s32.totalorder %v6543_v55, 0  ;;  %v6555_v59 = vld [vmem:[%s6432_s14 + $0x68] sm:$0xff] }
  0x1e   : > { %5789 = vperm.xlu1 %5782, %v5788_v37   ;;  %5504 = vmatmul.mubr.msk.f32.gmra.mrb[4].mxu1 %vm599_vm0, %v314_v44  ;;  %v5793_v56 = vpack.i.bf16 %v4738_v53, %v4737_v52  ;;  %vm419_vm13 = vcmp.eq.s32.totalorder %v6540_v54, 0  ;;  %v316_v60 = vld [vmem:[%s6426_s11 + $0x138] sm:$0xff]  ;;  %v4744_v62 = vsel %vm420_vm14, 1.0, %v9215_v19  ;;  %vm417_vm15 = vcmp.eq.s32.totalorder %v6552_v58, 0  ;;  %v6566_v63 = vld [vmem:[%s6426_s11 + $0x40] sm:$0xff]  ;;  %v6572_v3 = vld [vmem:[%s6432_s14 + $0x90] sm:$0xff] }
  0x1f   : > { %5778 = vperm.xlu0 %5771, %v5777_v43   ;;  %5458 = vmatprep.mubr.msk.f32.mxu0 %vm599_vm0, %v6532_v49  ;;  %v4743_v61 = vsel %vm419_vm13, 1.0, %v9215_v19  ;;  %vm418_vm1 = vcmp.eq.s32.totalorder %v6555_v59, 0  ;;  %v4741_v0 = vsel %vm417_vm15, 1.0, %v9215_v19  ;;  %v317_v2 = vld [vmem:[%s6426_s11 + $0x140] sm:$0xff]  ;;  %v6575_v4 = vld [vmem:[%s6432_s14 + $0x98] sm:$0xff]  ;;  %vm423_vm2 = vcmp.eq.s32.totalorder %v6572_v3, 0 }
  0x20   : > { %5506 = vmatprep.mubr.msk.f32.mxu1 %vm599_vm0, %v315_v50  ;;  %v4742_v1 = vsel %vm418_vm1, 1.0, %v9215_v19  ;;  %v5808_v5 = vpack.i.bf16 %v4744_v62, %v4743_v61  ;;  %vm424_vm3 = vcmp.eq.s32.totalorder %v6575_v4, 0  ;;  %v6582_v7 = vld [vmem:[%s6432_s14 + $0x80] sm:$0xff]  ;;  %v6585_v8 = vld [vmem:[%s6432_s14 + $0x88] sm:$0xff]  ;;  %v4747_v13 = vsel %vm423_vm2, 1.0, %v9215_v19  ;;  %v6602_v24 = vld [vmem:[%s6426_s11 + $0x50] sm:$0xff] }
  0x21   : > { %5459 = vmatmul.mubr.msk.f32.gmra.mrb[6].mxu0 %vm599_vm0, %v6547_v57  ;;  %v5803_v6 = vpack.i.bf16 %v4742_v1, %v4741_v0  ;;  %v6589_v9 = vld [vmem:[%s6426_s11 + $0x48] sm:$0xff]  ;;  %v4748_v20 = vsel %vm424_vm3, 1.0, %v9215_v19  ;;  %vm421_vm4 = vcmp.eq.s32.totalorder %v6582_v7, 0  ;;  %vm422_vm5 = vcmp.eq.s32.totalorder %v6585_v8, 0  ;;  %v6605_v25 = vld [vmem:[%s6432_s14 + $0xb0] sm:$0xff]  ;;  %v6608_v26 = vld [vmem:[%s6432_s14 + $0xb8] sm:$0xff] }
  0x22   : > { %5799 = vperm.xlu1 %5782, %v5798_v51   ;;  %5507 = vmatmul.mubr.msk.f32.gmra.mrb[6].mxu1 %vm599_vm0, %v316_v60  ;;  %v318_v11 = vld [vmem:[%s6426_s11 + $0x148] sm:$0xff]  ;;  %v4745_v21 = vsel %vm421_vm4, 1.0, %v9215_v19  ;;  %v4746_v22 = vsel %vm422_vm5, 1.0, %v9215_v19  ;;  %v319_v27 = vld [vmem:[%s6426_s11 + $0x150] sm:$0xff]  ;;  %vm427_vm6 = vcmp.eq.s32.totalorder %v6605_v25, 0  ;;  %vm428_vm7 = vcmp.eq.s32.totalorder %v6608_v26, 0 }
  0x23   : > { %5794 = vperm.xlu0 %5771, %v5793_v56   ;;  %5461 = vmatprep.mubr.msk.f32.mxu0 %vm599_vm0, %v6566_v63  ;;  %v6614_v30 = vld [vmem:[%s6432_s14 + $0xa0] sm:$0xff]  ;;  %v6617_v34 = vld [vmem:[%s6432_s14 + $0xa8] sm:$0xff]  ;;  %v5818_v35 = vpack.i.bf16 %v4748_v20, %v4747_v13  ;;  %v6622_v36 = vld [vmem:[%s6426_s11 + $0x58] sm:$0xff]  ;;  %v5813_v37 = vpack.i.bf16 %v4746_v22, %v4745_v21  ;;  %v4751_v39 = vsel %vm427_vm6, 1.0, %v9215_v19  ;;  %v4752_v43 = vsel %vm428_vm7, 1.0, %v9215_v19 }
  0x24   : > { %5509 = vmatprep.mubr.msk.f32.mxu1 %vm599_vm0, %v317_v2  ;;  %vm425_vm8 = vcmp.eq.s32.totalorder %v6614_v30, 0  ;;  %vm426_vm9 = vcmp.eq.s32.totalorder %v6617_v34, 0  ;;  %v320_v38 = vld [vmem:[%s6426_s11 + $0x158] sm:$0xff]  ;;  %v6631_v44 = vld [vmem:[%s6432_s14 + $0xd0] sm:$0xff]  ;;  %v6644_v51 = vld [vmem:[%s6432_s14 + $0xc0] sm:$0xff]  ;;  %v5828_v60 = vpack.i.bf16 %v4752_v43, %v4751_v39 }
  0x25   : > { %5462 = vmatmul.mubr.msk.f32.gmra.mrb[8].mxu0 %vm599_vm0, %v6589_v9  ;;  %v6634_v47 = vld [vmem:[%s6432_s14 + $0xd8] sm:$0xff]  ;;  %v4749_v48 = vsel %vm425_vm8, 1.0, %v9215_v19  ;;  %v4750_v50 = vsel %vm426_vm9, 1.0, %v9215_v19  ;;  %vm431_vm10 = vcmp.eq.s32.totalorder %v6631_v44, 0  ;;  %v6647_v52 = vld [vmem:[%s6432_s14 + $0xc8] sm:$0xff]  ;;  %v6650_v53 = vld [vmem:[%s6426_s11 + $0x60] sm:$0xff] }
  0x26   : > { %5809 = vperm.xlu1 %5782, %v5808_v5   ;;  %5510 = vmatmul.mubr.msk.f32.gmra.mrb[8].mxu1 %vm599_vm0, %v318_v11  ;;  %vm432_vm11 = vcmp.eq.s32.totalorder %v6634_v47, 0  ;;  %v321_v56 = vld [vmem:[%s6426_s11 + $0x160] sm:$0xff]  ;;  %vm429_vm12 = vcmp.eq.s32.totalorder %v6644_v51, 0  ;;  %vm430_vm13 = vcmp.eq.s32.totalorder %v6647_v52, 0  ;;  %v6658_v61 = vld [vmem:[%s6432_s14 + $0xf0] sm:$0xff]  ;;  %v6661_v62 = vld [vmem:[%s6432_s14 + $0xf8] sm:$0xff]  ;;  %v5823_v0 = vpack.i.bf16 %v4750_v50, %v4749_v48 }
  0x27   : > { %5804 = vperm.xlu0 %5771, %v5803_v6   ;;  %5464 = vmatprep.mubr.msk.f32.mxu0 %vm599_vm0, %v6602_v24  ;;  %9347 = vst [vmem:[#allocation2_spill] sm:$0xff] %v6661_v62  ;;  %v6665_v1 = vld [vmem:[%s6426_s11 + $0x68] sm:$0xff]  ;;  %v4755_v2 = vsel %vm431_vm10, 1.0, %v9215_v19  ;;  %v4756_v5 = vsel %vm432_vm11, 1.0, %v9215_v19  ;;  %v6674_v6 = vld [vmem:[%s6432_s14 + $0xe0] sm:$0xff]  ;;  %v4753_v20 = vsel %vm429_vm12, 1.0, %v9215_v19 }
  0x28   : > { %5512 = vmatprep.mubr.msk.f32.mxu1 %vm599_vm0, %v319_v27  ;;  %9348 = vst [vmem:[#allocation3_spill] sm:$0xff] %v6665_v1  ;;  %9349 = vst [vmem:[#allocation4_spill] sm:$0xff] %v6674_v6  ;;  %v6677_v11 = vld [vmem:[%s6432_s14 + $0xe8] sm:$0xff]  ;;  %v4754_v21 = vsel %vm430_vm13, 1.0, %v9215_v19  ;;  %v6690_v22 = vld [vmem:[%s6426_s11 + $0x70] sm:$0xff]  ;;  %vm435_vm14 = vcmp.eq.s32.totalorder %v6658_v61, 0 }
  0x29   : > { %5465 = vmatmul.mubr.msk.f32.gmra.mrb[10].mxu0 %vm599_vm0, %v6622_v36  ;;  %9350 = vst [vmem:[#allocation5_spill] sm:$0xff] %v6677_v11  ;;  %v322_v13 = vld [vmem:[%s6426_s11 + $0x168] sm:$0xff]  ;;  %9351 = vst [vmem:[#allocation6_spill] sm:$0xff] %v6690_v22  ;;  %vm436_vm15 = vcmp.eq.s32.totalorder %v6661_v62, 0  ;;  %v323_v27 = vld [vmem:[%s6426_s11 + $0x170] sm:$0xff]  ;;  %vm433_vm1 = vcmp.eq.s32.totalorder %v6674_v6, 0  ;;  %v5833_v48 = vpack.i.bf16 %v4754_v21, %v4753_v20 }
  0x2a   : > { %5819 = vperm.xlu1 %5782, %v5818_v35   ;;  %5513 = vmatmul.mubr.msk.f32.gmra.mrb[10].mxu1 %vm599_vm0, %v320_v38  ;;  %vm434_vm2 = vcmp.eq.s32.totalorder %v6677_v11, 0  ;;  %v6698_v35 = vld [vmem:[%s6432_s14 + $0x110] sm:$0xff]  ;;  %v5838_v38 = vpack.i.bf16 %v4756_v5, %v4755_v2  ;;  %v6706_v39 = vld [vmem:[%s6432_s14 + $0x100] sm:$0xff]  ;;  %v6709_v43 = vld [vmem:[%s6432_s14 + $0x108] sm:$0xff]  ;;  %v4757_v2 = vsel %vm433_vm1, 1.0, %v9215_v19  ;;  %v9363_v62 = vmov 0.0  }
  0x2b   : > { %5814 = vperm.xlu0 %5771, %v5813_v37   ;;  %5467 = vmatprep.mubr.msk.f32.mxu0 %vm599_vm0, %v6650_v53  ;;  %9352 = vst [vmem:[#allocation7_spill] sm:$0xff] %v6698_v35  ;;  %v6701_v37 = vld [vmem:[%s6432_s14 + $0x118] sm:$0xff]  ;;  %9354 = vst [vmem:[#allocation9_spill] sm:$0xff] %v6706_v39  ;;  %v4758_v5 = vsel %vm434_vm2, 1.0, %v9215_v19  ;;  %vm439_vm3 = vcmp.eq.s32.totalorder %v6698_v35, 0  ;;  %v325_v20 = vld [vmem:[%s6426_s11 + $0x180] sm:$0xff] }
  0x2c   : > { %5515 = vmatprep.mubr.msk.f32.mxu1 %vm599_vm0, %v321_v56  ;;  %9353 = vst [vmem:[#allocation8_spill] sm:$0xff] %v6701_v37  ;;  %9355 = vst [vmem:[#allocation10_spill] sm:$0xff] %v6709_v43  ;;  %v6713_v50 = vld [vmem:[%s6426_s11 + $0x78] sm:$0xff]  ;;  %v4759_v56 = vsel %vm435_vm14, 1.0, %v9215_v19  ;;  %vm440_vm4 = vcmp.eq.s32.totalorder %v6701_v37, 0  ;;  %vm437_vm5 = vcmp.eq.s32.totalorder %v6706_v39, 0  ;;  %v5843_v11 = vpack.i.bf16 %v4758_v5, %v4757_v2 }
  0x2d   : > { %5468 = vmatmul.mubr.msk.f32.gmra.mrb[12].mxu0 %vm599_vm0, %v6665_v1  ;;  %9356 = vst [vmem:[#allocation11_spill] sm:$0xff] %v6713_v50  ;;  %vm438_vm6 = vcmp.eq.s32.totalorder %v6709_v43, 0  ;;  %v6740_v21 = vld [vmem:[%s6432_s14 + $0x130] sm:$0xff]  ;;  %v6751_v1 = vld [vmem:[%s6432_s14 + $0x128] sm:$0xff]  ;;  %v6790_v43 = vld [vmem:[%s6432_s14 + $0x140] sm:$0xff] }
  0x2e   : > { %5829 = vperm.xlu1 %5782, %v5828_v60   ;;  %5516 = vmatmul.mubr.msk.f32.gmra.mrb[12].mxu1 %vm599_vm0, %v322_v13  ;;  %v4760_v60 = vsel %vm436_vm15, 1.0, %v9215_v19  ;;  %v6732_v13 = vld [vmem:[%s6426_s11 + $0x80] sm:$0xff]  ;;  %9358 = vst [vmem:[#allocation13_spill] sm:$0xff] %v6740_v21  ;;  %9361 = vst [vmem:[#allocation16_spill] sm:$0xff] %v6751_v1  ;;  %v6755_v6 = vld [vmem:[%s6426_s11 + $0x88] sm:$0xff]  ;;  %vm443_vm7 = vcmp.eq.s32.totalorder %v6740_v21, 0 }
  0x2f   : > { %5824 = vperm.xlu0 %5771, %v5823_v0   ;;  %5470 = vmatprep.mubr.msk.f32.mxu0 %vm599_vm0, %v6690_v22  ;;  %v324_v0 = vld [vmem:[%s6426_s11 + $0x178] sm:$0xff]  ;;  %9357 = vst [vmem:[#allocation12_spill] sm:$0xff] %v6732_v13  ;;  %v5848_v19 = vpack.i.bf16 %v4760_v60, %v4759_v56  ;;  %v6748_v22 = vld [vmem:[%s6432_s14 + $0x120] sm:$0xff]  ;;  %9362 = vst [vmem:[#allocation17_spill] sm:$0xff] %v6755_v6  ;;  %v4764_v56 = vsel %vm440_vm4, 1.0, %v9363_v62  ;;  %v4761_v60 = vsel %vm437_vm5, 1.0, %v9363_v62 }
  0x30   : > { %5518 = vmatprep.mubr.msk.f32.mxu1 %vm599_vm0, %v323_v27  ;;  %v6743_v27 = vld [vmem:[%s6432_s14 + $0x138] sm:$0xff]  ;;  %9360 = vst [vmem:[#allocation15_spill] sm:$0xff] %v6748_v22  ;;  %v6774_v2 = vld [vmem:[%s6426_s11 + $0x90] sm:$0xff]  ;;  %vm441_vm9 = vcmp.eq.s32.totalorder %v6748_v22, 0  ;;  %vm442_vm10 = vcmp.eq.s32.totalorder %v6751_v1, 0  ;;  %9367 = vst [vmem:[#allocation21_spill] sm:$0xff] %v6790_v43 }
  0x31   : > { %9359 = vst [vmem:[#allocation14_spill] sm:$0xff] %v6743_v27  ;;  %5471 = vmatmul.mubr.msk.f32.gmra.mrb[14].mxu0 %vm599_vm0, %v6713_v50  ;;  %9364 = vst [vmem:[#allocation18_spill] sm:$0xff] %v6774_v2  ;;  %vm444_vm8 = vcmp.eq.s32.totalorder %v6743_v27, 0  ;;  %v327_v5 = vld [vmem:[%s6426_s11 + $0x190] sm:$0xff]  ;;  %v6793_v39 = vld [vmem:[%s6432_s14 + $0x148] sm:$0xff]  ;;  %vm445_vm13 = vcmp.eq.s32.totalorder %v6790_v43, 0 }
  0x32   : > { %5839 = vperm.xlu1 %5782, %v5838_v38   ;;  %5519 = vmatmul.mubr.msk.f32.gmra.mrb[14].mxu1 %vm599_vm0, %v324_v0  ;;  %v4763_v38 = vsel %vm439_vm3, 1.0, %v9363_v62  ;;  %v4762_v0 = vsel %vm438_vm6, 1.0, %v9363_v62  ;;  %9368 = vst [vmem:[#allocation22_spill] sm:$0xff] %v6793_v39  ;;  %v6797_v35 = vld [vmem:[%s6426_s11 + $0x98] sm:$0xff]  ;;  %vm446_vm14 = vcmp.eq.s32.totalorder %v6793_v39, 0  ;;  %v6832_v1 = vld [vmem:[%s6432_s14 + $0x160] sm:$0xff] }
  0x33   : > { %5834 = vperm.xlu0 %5771, %v5833_v48   ;;  %5473 = vmatprep.mubr.msk.f32.mxu0 %vm599_vm0, %v6732_v13  ;;  %v326_v48 = vld [vmem:[%s6426_s11 + $0x188] sm:$0xff]  ;;  %v6785_v13 = vld [vmem:[%s6432_s14 + $0x158] sm:$0xff]  ;;  %v5858_v50 = vpack.i.bf16 %v4764_v56, %v4763_v38  ;;  %v5853_v37 = vpack.i.bf16 %v4762_v0, %v4761_v60  ;;  %9369 = vst [vmem:[#allocation23_spill] sm:$0xff] %v6797_v35  ;;  %v4768_v38 = vsel %vm444_vm8, 1.0, %v9363_v62  ;;  %v4765_v56 = vsel %vm441_vm9, 1.0, %v9363_v62  ;;  %v6816_v60 = vld [vmem:[%s6426_s11 + $0xa0] sm:$0xff] }
  0x34   : > { %5521 = vmatprep.mubr.msk.f32.mxu1 %vm599_vm0, %v325_v20  ;;  %v6782_v20 = vld [vmem:[%s6432_s14 + $0x150] sm:$0xff]  ;;  %9366 = vst [vmem:[#allocation20_spill] sm:$0xff] %v6785_v13  ;;  %9370 = vst [vmem:[#allocation24_spill] sm:$0xff] %v6816_v60  ;;  %vm448_vm12 = vcmp.eq.s32.totalorder %v6785_v13, 0  ;;  %v329_v0 = vld [vmem:[%s6426_s11 + $0x1a0] sm:$0xff]  ;;  %vm449_vm2 = vcmp.eq.s32.totalorder %v6832_v1, 0 }
  0x35   : > { %9365 = vst [vmem:[#allocation19_spill] sm:$0xff] %v6782_v20  ;;  %5474 = vmatmul.mubr.msk.f32.gmra.mrb[16].mxu0 %vm599_vm0, %v6755_v6  ;;  %vm447_vm11 = vcmp.eq.s32.totalorder %v6782_v20, 0  ;;  %9373 = vst [vmem:[#allocation27_spill] sm:$0xff] %v6832_v1  ;;  %v6835_v22 = vld [vmem:[%s6432_s14 + $0x168] sm:$0xff]  ;;  %v6874_v39 = vld [vmem:[%s6432_s14 + $0x180] sm:$0xff] }
  0x36   : > { %5849 = vperm.xlu1 %5782, %v5848_v19   ;;  %5522 = vmatmul.mubr.msk.f32.gmra.mrb[16].mxu1 %vm599_vm0, %v326_v48  ;;  %v4767_v19 = vsel %vm443_vm7, 1.0, %v9363_v62  ;;  %v4766_v48 = vsel %vm442_vm10, 1.0, %v9363_v62  ;;  %9374 = vst [vmem:[#allocation28_spill] sm:$0xff] %v6835_v22  ;;  %v6839_v21 = vld [vmem:[%s6426_s11 + $0xa8] sm:$0xff]  ;;  %vm450_vm3 = vcmp.eq.s32.totalorder %v6835_v22, 0  ;;  %9379 = vst [vmem:[#allocation33_spill] sm:$0xff] %v6874_v39 }
  0x37   : > { %5844 = vperm.xlu0 %5771, %v5843_v11   ;;  %5476 = vmatprep.mubr.msk.f32.mxu0 %vm599_vm0, %v6774_v2  ;;  %v328_v11 = vld [vmem:[%s6426_s11 + $0x198] sm:$0xff]  ;;  %v5868_v6 = vpack.i.bf16 %v4768_v38, %v4767_v19  ;;  %v5863_v27 = vpack.i.bf16 %v4766_v48, %v4765_v56  ;;  %9375 = vst [vmem:[#allocation29_spill] sm:$0xff] %v6839_v21  ;;  %v4772_v19 = vsel %vm448_vm12, 1.0, %v9363_v62  ;;  %v4769_v38 = vsel %vm445_vm13, 1.0, %v9363_v62  ;;  %v6858_v56 = vld [vmem:[%s6426_s11 + $0xb0] sm:$0xff]  ;;  %v6877_v43 = vld [vmem:[%s6432_s14 + $0x188] sm:$0xff] }
  0x38   : > { %5524 = vmatprep.mubr.msk.f32.mxu1 %vm599_vm0, %v327_v5  ;;  %v6824_v5 = vld [vmem:[%s6432_s14 + $0x170] sm:$0xff]  ;;  %v6827_v2 = vld [vmem:[%s6432_s14 + $0x178] sm:$0xff]  ;;  %9376 = vst [vmem:[#allocation30_spill] sm:$0xff] %v6858_v56  ;;  %9380 = vst [vmem:[#allocation34_spill] sm:$0xff] %v6877_v43  ;;  %vm453_vm6 = vcmp.eq.s32.totalorder %v6874_v39, 0  ;;  %vm454_vm7 = vcmp.eq.s32.totalorder %v6877_v43, 0 }
  0x39   : > { %9371 = vst [vmem:[#allocation25_spill] sm:$0xff] %v6824_v5  ;;  %9372 = vst [vmem:[#allocation26_spill] sm:$0xff] %v6827_v2  ;;  %5477 = vmatmul.mubr.msk.f32.gmra.mrb[18].mxu0 %vm599_vm0, %v6797_v35  ;;  %vm451_vm15 = vcmp.eq.s32.totalorder %v6824_v5, 0  ;;  %vm452_vm1 = vcmp.eq.s32.totalorder %v6827_v2, 0  ;;  %v331_v48 = vld [vmem:[%s6426_s11 + $0x1b0] sm:$0xff]  ;;  %v6881_v20 = vld [vmem:[%s6426_s11 + $0xb8] sm:$0xff] }
  0x3a   : > { %5859 = vperm.xlu1 %5782, %v5858_v50   ;;  %5525 = vmatmul.mubr.msk.f32.gmra.mrb[18].mxu1 %vm599_vm0, %v328_v11  ;;  %v4771_v50 = vsel %vm447_vm11, 1.0, %v9363_v62  ;;  %v4770_v11 = vsel %vm446_vm14, 1.0, %v9363_v62  ;;  %9381 = vst [vmem:[#allocation35_spill] sm:$0xff] %v6881_v20  ;;  %v6916_v22 = vld [vmem:[%s6432_s14 + $0x1a0] sm:$0xff]  ;;  %v6919_v1 = vld [vmem:[%s6432_s14 + $0x1a8] sm:$0xff] }
  0x3b   : > { %5854 = vperm.xlu0 %5771, %v5853_v37   ;;  %5479 = vmatprep.mubr.msk.f32.mxu0 %vm599_vm0, %v6816_v60  ;;  %v330_v37 = vld [vmem:[%s6426_s11 + $0x1a8] sm:$0xff]  ;;  %v6869_v60 = vld [vmem:[%s6432_s14 + $0x198] sm:$0xff]  ;;  %v5878_v35 = vpack.i.bf16 %v4772_v19, %v4771_v50  ;;  %v5873_v13 = vpack.i.bf16 %v4770_v11, %v4769_v38  ;;  %v4776_v50 = vsel %vm452_vm1, 1.0, %v9363_v62  ;;  %v4773_v19 = vsel %vm449_vm2, 1.0, %v9363_v62  ;;  %v6900_v38 = vld [vmem:[%s6426_s11 + $0xc0] sm:$0xff]  ;;  %9385 = vst [vmem:[#allocation39_spill] sm:$0xff] %v6916_v22 }
  0x3c   : > { %5527 = vmatprep.mubr.msk.f32.mxu1 %vm599_vm0, %v329_v0  ;;  %v6866_v0 = vld [vmem:[%s6432_s14 + $0x190] sm:$0xff]  ;;  %9378 = vst [vmem:[#allocation32_spill] sm:$0xff] %v6869_v60  ;;  %9382 = vst [vmem:[#allocation36_spill] sm:$0xff] %v6900_v38  ;;  %vm456_vm5 = vcmp.eq.s32.totalorder %v6869_v60, 0  ;;  %v333_v11 = vld [vmem:[%s6426_s11 + $0x1c0] sm:$0xff]  ;;  %vm457_vm10 = vcmp.eq.s32.totalorder %v6916_v22, 0 }
  0x3d   : > { %9377 = vst [vmem:[#allocation31_spill] sm:$0xff] %v6866_v0  ;;  %5480 = vmatmul.mubr.msk.f32.gmra.mrb[20].mxu0 %vm599_vm0, %v6839_v21  ;;  %vm455_vm4 = vcmp.eq.s32.totalorder %v6866_v0, 0  ;;  %9386 = vst [vmem:[#allocation40_spill] sm:$0xff] %v6919_v1  ;;  %v6923_v5 = vld [vmem:[%s6426_s11 + $0xc8] sm:$0xff]  ;;  %vm458_vm11 = vcmp.eq.s32.totalorder %v6919_v1, 0  ;;  %v6958_v43 = vld [vmem:[%s6432_s14 + $0x1c0] sm:$0xff] }
  0x3e   : > { %5869 = vperm.xlu1 %5782, %v5868_v6   ;;  %5528 = vmatmul.mubr.msk.f32.gmra.mrb[20].mxu1 %vm599_vm0, %v330_v37  ;;  %v4775_v6 = vsel %vm451_vm15, 1.0, %v9363_v62  ;;  %v4774_v37 = vsel %vm450_vm3, 1.0, %v9363_v62  ;;  %9387 = vst [vmem:[#allocation41_spill] sm:$0xff] %v6923_v5  ;;  %v6961_v39 = vld [vmem:[%s6432_s14 + $0x1c8] sm:$0xff]  ;;  %v6965_v0 = vld [vmem:[%s6426_s11 + $0xd8] sm:$0xff]  ;;  %vm461_vm14 = vcmp.eq.s32.totalorder %v6958_v43, 0 }
  0x3f   : > { %5864 = vperm.xlu0 %5771, %v5863_v27   ;;  %5482 = vmatprep.mubr.msk.f32.mxu0 %vm599_vm0, %v6858_v56  ;;  %v332_v27 = vld [vmem:[%s6426_s11 + $0x1b8] sm:$0xff]  ;;  %v5888_v21 = vpack.i.bf16 %v4776_v50, %v4775_v6  ;;  %v5883_v2 = vpack.i.bf16 %v4774_v37, %v4773_v19  ;;  %v4780_v6 = vsel %vm456_vm5, 1.0, %v9363_v62  ;;  %v4777_v50 = vsel %vm453_vm6, 1.0, %v9363_v62  ;;  %v6942_v19 = vld [vmem:[%s6426_s11 + $0xd0] sm:$0xff]  ;;  %9389 = vst [vmem:[#allocation43_spill] sm:$0xff] %v6965_v0  ;;  %v7000_v1 = vld [vmem:[%s6432_s14 + $0x1e0] sm:$0xff] }
  0x40   : > { %5530 = vmatprep.mubr.msk.f32.mxu1 %vm599_vm0, %v331_v48  ;;  %v6908_v48 = vld [vmem:[%s6432_s14 + $0x1b0] sm:$0xff]  ;;  %v6911_v56 = vld [vmem:[%s6432_s14 + $0x1b8] sm:$0xff]  ;;  %9388 = vst [vmem:[#allocation42_spill] sm:$0xff] %v6942_v19  ;;  %vm462_vm15 = vcmp.eq.s32.totalorder %v6961_v39, 0  ;;  %v7003_v22 = vld [vmem:[%s6432_s14 + $0x1e8] sm:$0xff]  ;;  %vm465_vm3 = vcmp.eq.s32.totalorder %v7000_v1, 0 }
  0x41   : > { %9383 = vst [vmem:[#allocation37_spill] sm:$0xff] %v6908_v48  ;;  %9384 = vst [vmem:[#allocation38_spill] sm:$0xff] %v6911_v56  ;;  %5483 = vmatmul.mubr.msk.f32.gmra.mrb[22].mxu0 %vm599_vm0, %v6881_v20  ;;  %vm459_vm8 = vcmp.eq.s32.totalorder %v6908_v48, 0  ;;  %vm460_vm9 = vcmp.eq.s32.totalorder %v6911_v56, 0  ;;  %v335_v37 = vld [vmem:[%s6426_s11 + $0x1d0] sm:$0xff]  ;;  %v7007_v48 = vld [vmem:[%s6426_s11 + $0xe8] sm:$0xff] }
  0x42   : > { %5879 = vperm.xlu1 %5782, %v5878_v35   ;;  %5531 = vmatmul.mubr.msk.f32.gmra.mrb[22].mxu1 %vm599_vm0, %v332_v27  ;;  %v4779_v35 = vsel %vm455_vm4, 1.0, %v9363_v62  ;;  %v4778_v27 = vsel %vm454_vm7, 1.0, %v9363_v62  ;;  %9393 = vst [vmem:[#allocation47_spill] sm:$0xff] %v7003_v22  ;;  %vm466_vm4 = vcmp.eq.s32.totalorder %v7003_v22, 0  ;;  %v4789_v22 = vsel %vm465_vm3, 1.0, %v9363_v62 }
  0x43   : > { %5874 = vperm.xlu0 %5771, %v5873_v13   ;;  %5485 = vmatprep.mubr.msk.f32.mxu0 %vm599_vm0, %v6900_v38  ;;  %v334_v13 = vld [vmem:[%s6426_s11 + $0x1c8] sm:$0xff]  ;;  %v6953_v38 = vld [vmem:[%s6432_s14 + $0x1d8] sm:$0xff]  ;;  %v5898_v20 = vpack.i.bf16 %v4780_v6, %v4779_v35  ;;  %v5893_v60 = vpack.i.bf16 %v4778_v27, %v4777_v50  ;;  %v4784_v35 = vsel %vm460_vm9, 1.0, %v9363_v62  ;;  %v4781_v6 = vsel %vm457_vm10, 1.0, %v9363_v62  ;;  %v6984_v50 = vld [vmem:[%s6426_s11 + $0xe0] sm:$0xff] }
  0x44   : > { %5533 = vmatprep.mubr.msk.f32.mxu1 %vm599_vm0, %v333_v11  ;;  %v6950_v11 = vld [vmem:[%s6432_s14 + $0x1d0] sm:$0xff]  ;;  %9390 = vst [vmem:[#allocation44_spill] sm:$0xff] %v6984_v50  ;;  %vm464_vm13 = vcmp.eq.s32.totalorder %v6953_v38, 0  ;;  %v337_v27 = vld [vmem:[%s6426_s11 + $0x1e0] sm:$0xff]  ;;  %vm1627_vm5 = vcmp.eq.s32.totalorder %v6488_v31, 1  ;;  %vm1628_vm6 = vcmp.eq.s32.totalorder %v6491_v32, 1 }
  0x45   : > { %5486 = vmatmul.mubr.msk.f32.gmra.mrb[24].mxu0 %vm599_vm0, %v6923_v5  ;;  %vm463_vm12 = vcmp.eq.s32.totalorder %v6950_v11, 0  ;;  %vm1625_vm7 = vcmp.eq.s32.totalorder %v6457_v16, 1  ;;  %vm1631_vm9 = vcmp.eq.s32.totalorder %v6480_v28, 1  ;;  %vm1632_vm10 = vcmp.eq.s32.totalorder %v6483_v29, 1 }
  0x46   : > { %5889 = vperm.xlu1 %5782, %v5888_v21   ;;  %5534 = vmatmul.mubr.msk.f32.gmra.mrb[24].mxu1 %vm599_vm0, %v334_v13  ;;  %v4783_v21 = vsel %vm459_vm8, 1.0, %v9363_v62  ;;  %v4782_v13 = vsel %vm458_vm11, 1.0, %v9363_v62  ;;  %vm1626_vm8 = vcmp.eq.s32.totalorder %v6460_v17, 1  ;;  %v4857_v16 = vsel %vm1625_vm7, 1.0, %v9363_v62 }
  0x47   : > { %5884 = vperm.xlu0 %5771, %v5883_v2   ;;  %5488 = vmatprep.mubr.msk.f32.mxu0 %vm599_vm0, %v6942_v19  ;;  %v336_v2 = vld [vmem:[%s6426_s11 + $0x1d8] sm:$0xff]  ;;  %v5908_v5 = vpack.i.bf16 %v4784_v35, %v4783_v21  ;;  %v5903_v56 = vpack.i.bf16 %v4782_v13, %v4781_v6  ;;  %v4788_v21 = vsel %vm464_vm13, 1.0, %v9363_v62  ;;  %v4785_v35 = vsel %vm461_vm14, 1.0, %v9363_v62  ;;  %v7028_v6 = vld [vmem:[%s6426_s11 + $0xf0] sm:$0xff] }
  0x48   : > { %5536 = vmatprep.mubr.msk.f32.mxu1 %vm599_vm0, %v335_v37  ;;  %v6992_v37 = vld [vmem:[%s6432_s14 + $0x1f0] sm:$0xff]  ;;  %v6995_v19 = vld [vmem:[%s6432_s14 + $0x1f8] sm:$0xff]  ;;  %v4858_v17 = vsel %vm1626_vm8, 1.0, %v9363_v62  ;;  %vm1629_vm11 = vcmp.eq.s32.totalorder %v6446_v14, 1  ;;  %v4863_v32 = vsel %vm1631_vm9, 1.0, %v9363_v62  ;;  %v4864_v28 = vsel %vm1632_vm10, 1.0, %v9363_v62 }
  0x49   : > { %9391 = vst [vmem:[#allocation45_spill] sm:$0xff] %v6992_v37  ;;  %9392 = vst [vmem:[#allocation46_spill] sm:$0xff] %v6995_v19  ;;  %5489 = vmatmul.mubr.msk.f32.gmra.mrb[26].mxu0 %vm599_vm0, %v6965_v0  ;;  %vm467_vm1 = vcmp.eq.s32.totalorder %v6992_v37, 0  ;;  %vm468_vm2 = vcmp.eq.s32.totalorder %v6995_v19, 0  ;;  %v339_v13 = vld [vmem:[%s6426_s11 + $0x1f0] sm:$0xff]  ;;  %v7037_v37 = vld [vmem:[%s6426_s11 + $0xf8] sm:$0xff] }
  0x4a   : > { %5899 = vperm.xlu1 %5782, %v5898_v20   ;;  %5537 = vmatmul.mubr.msk.f32.gmra.mrb[26].mxu1 %vm599_vm0, %v336_v2  ;;  %v4787_v20 = vsel %vm463_vm12, 1.0, %v9363_v62  ;;  %v4786_v2 = vsel %vm462_vm15, 1.0, %v9363_v62  ;;  %v4791_v19 = vsel %vm467_vm1, 1.0, %v9363_v62  ;;  %v4792_v0 = vsel %vm468_vm2, 1.0, %v9363_v62 }
  0x4b   : > { %5894 = vperm.xlu0 %5771, %v5893_v60   ;;  %5491 = vmatprep.mubr.msk.f32.mxu0 %vm599_vm0, %v6984_v50  ;;  %v338_v60 = vld [vmem:[%s6426_s11 + $0x1e8] sm:$0xff]  ;;  %v5913_v50 = vpack.i.bf16 %v4786_v2, %v4785_v35  ;;  %v4860_v35 = vsel %vm1628_vm6, 1.0, %v9363_v62  ;;  %vm1630_vm12 = vcmp.eq.s32.totalorder %v6449_v15, 1  ;;  %v4861_v14 = vsel %vm1629_vm11, 1.0, %v9363_v62  ;;  %v9398_v2 = vld [vmem:[#allocation6_spill] sm:$0xff] }
  0x4c   : > { %5539 = vmatprep.mubr.msk.f32.mxu1 %vm599_vm0, %v337_v27  ;;  %v5918_v27 = vpack.i.bf16 %v4788_v21, %v4787_v20  ;;  %v4790_v20 = vsel %vm466_vm4, 1.0, %v9363_v62  ;;  %v4862_v15 = vsel %vm1630_vm12, 1.0, %v9363_v62  ;;  %vm1635_vm13 = vcmp.eq.s32.totalorder %v6510_v41, 1 }
  0x4d   : > { %5492 = vmatmul.mubr.msk.f32.gmra.mrb[28].mxu0 %vm599_vm0, %v7007_v48  ;;  %v5923_v21 = vpack.i.bf16 %v4790_v20, %v4789_v22  ;;  %vm1636_vm14 = vcmp.eq.s32.totalorder %v6513_v42, 1  ;;  %vm1633_vm15 = vcmp.eq.s32.totalorder %v6522_v45, 1  ;;  %vm1634_vm1 = vcmp.eq.s32.totalorder %v6525_v46, 1  ;;  %v9396_v22 = vld [vmem:[#allocation5_spill] sm:$0xff]  ;;  %v9400_v20 = vld [vmem:[#allocation8_spill] sm:$0xff] }
  0x4e   : > { %5909 = vperm.xlu1 %5782, %v5908_v5   ;;  %5540 = vmatmul.mubr.msk.f32.gmra.mrb[28].mxu1 %vm599_vm0, %v338_v60  ;;  %v340_v5 = vld [vmem:[%s6426_s11 + $0x1f8] sm:$0xff]  ;;  %v4859_v60 = vsel %vm1627_vm5, 1.0, %v9363_v62  ;;  %v4867_v29 = vsel %vm1635_vm13, 1.0, %v9363_v62  ;;  %v4868_v41 = vsel %vm1636_vm14, 1.0, %v9363_v62  ;;  %v4865_v42 = vsel %vm1633_vm15, 1.0, %v9363_v62 }
  0x4f   : > { %5904 = vperm.xlu0 %5771, %v5903_v56   ;;  %5494 = vmatprep.mubr.msk.f32.mxu0 %vm599_vm0, %v7028_v6  ;;  %v5928_v56 = vpack.i.bf16 %v4792_v0, %v4791_v19  ;;  %v5938_v31 = vpack.i.bf16 %v4860_v35, %v4859_v60  ;;  %v4866_v45 = vsel %vm1634_vm1, 1.0, %v9363_v62  ;;  %vm1639_vm2 = vcmp.eq.s32.totalorder %v6540_v54, 1  ;;  %v9397_v0 = vld [vmem:[#allocation3_spill] sm:$0xff] }
  0x50   : > { %5542 = vmatprep.mubr.msk.f32.mxu1 %vm599_vm0, %v339_v13  ;;  %vm1640_vm3 = vcmp.eq.s32.totalorder %v6543_v55, 1  ;;  %vm1637_vm4 = vcmp.eq.s32.totalorder %v6552_v58, 1  ;;  %vm1638_vm5 = vcmp.eq.s32.totalorder %v6555_v59, 1  ;;  %v4871_v46 = vsel %vm1639_vm2, 1.0, %v9363_v62  ;;  %v9403_v60 = vld [vmem:[#allocation11_spill] sm:$0xff] }
  0x51   : > { %5495 = vmatmul.mubr.msk.f32.gmra.mrb[30].mxu0 %vm599_vm0, %v7037_v37  ;;  %v4872_v54 = vsel %vm1640_vm3, 1.0, %v9363_v62  ;;  %v4869_v55 = vsel %vm1637_vm4, 1.0, %v9363_v62  ;;  %v4870_v58 = vsel %vm1638_vm5, 1.0, %v9363_v62  ;;  %vm1643_vm6 = vcmp.eq.s32.totalorder %v6572_v3, 1 }
  0x52   : > { %5919 = vperm.xlu1 %5782, %v5918_v27   ;;  %5543 = vmatmul.mubr.msk.f32.gmra.mrb[30].mxu1 %vm599_vm0, %v340_v5  ;;  %vm1644_vm7 = vcmp.eq.s32.totalorder %v6575_v4, 1  ;;  %vm1641_vm8 = vcmp.eq.s32.totalorder %v6582_v7, 1  ;;  %vm1642_vm9 = vcmp.eq.s32.totalorder %v6585_v8, 1  ;;  %v4875_v59 = vsel %vm1643_vm6, 1.0, %v9363_v62  ;;  %v9399_v5 = vld [vmem:[#allocation7_spill] sm:$0xff] }
  0x53   : > { %5914 = vperm.xlu0 %5771, %v5913_v50   ;;  %5549 = vmatprep.mubr.msk.f32.mxu1 %vm599_vm0, %v6435_v10  ;;  %v4876_v3 = vsel %vm1644_vm7, 1.0, %v9363_v62  ;;  %v4873_v4 = vsel %vm1641_vm8, 1.0, %v9363_v62  ;;  %v4874_v7 = vsel %vm1642_vm9, 1.0, %v9363_v62  ;;  %vm1647_vm10 = vcmp.eq.s32.totalorder %v6605_v25, 1 }
  0x54   : > { %5649 = vmatprep.mubr.msk.f32.mxu0 %vm599_vm0, %v6435_v10  ;;  %v5933_v10 = vpack.i.bf16 %v4858_v17, %v4857_v16  ;;  %vm1648_vm11 = vcmp.eq.s32.totalorder %v6608_v26, 1  ;;  %vm1645_vm12 = vcmp.eq.s32.totalorder %v6614_v30, 1  ;;  %vm1646_vm13 = vcmp.eq.s32.totalorder %v6617_v34, 1 }
  0x55   : > { %5650 = vmatmul.mubr.msk.f32.vlgmr.msra.gmra.mrb[32].mxu0 %vm599_vm0, %v6439_v12  ;;  %v4879_v8 = vsel %vm1647_vm10, 1.0, %v9363_v62  ;;  %v4880_v25 = vsel %vm1648_vm11, 1.0, %v9363_v62  ;;  %v4877_v26 = vsel %vm1645_vm12, 1.0, %v9363_v62  ;;  %v4878_v30 = vsel %vm1646_vm13, 1.0, %v9363_v62 }
  0x56   : > { %5929 = vperm.xlu1 %5782, %v5928_v56   ;;  %5550 = vmatmul.mubr.msk.f32.vlgmr.msra.gmra.mrb[32].mxu1 %vm599_vm0, %v6439_v12  ;;  %v5948_v12 = vpack.i.bf16 %v4864_v28, %v4863_v32  ;;  %vm1651_vm14 = vcmp.eq.s32.totalorder %v6631_v44, 1  ;;  %vm1652_vm15 = vcmp.eq.s32.totalorder %v6634_v47, 1  ;;  %vm1649_vm1 = vcmp.eq.s32.totalorder %v6644_v51, 1  ;;  %v9401_v56 = vld [vmem:[#allocation9_spill] sm:$0xff] }
  0x57   : > { %5924 = vperm.xlu0 %5771, %v5923_v21   ;;  %5552 = vmatprep.mubr.msk.f32.mxu1 %vm599_vm0, %v6463_v18  ;;  %vm1650_vm2 = vcmp.eq.s32.totalorder %v6647_v52, 1  ;;  %v4883_v34 = vsel %vm1651_vm14, 1.0, %v9363_v62  ;;  %v4884_v44 = vsel %vm1652_vm15, 1.0, %v9363_v62  ;;  %v4881_v47 = vsel %vm1649_vm1, 1.0, %v9363_v62  ;;  %v9394_v52 = vld [vmem:[#allocation2_spill] sm:$0xff] }
  0x58   : > { %5652 = vmatprep.mubr.msk.f32.mxu0 %vm599_vm0, %v6463_v18  ;;  %v5943_v18 = vpack.i.bf16 %v4862_v15, %v4861_v14  ;;  %v4882_v51 = vsel %vm1650_vm2, 1.0, %v9363_v62  ;;  %vm1655_vm3 = vcmp.eq.s32.totalorder %v6658_v61, 1  ;;  %vm1656_vm4 = vcmp.eq.s32.totalorder %v9394_v52, 1  ;;  %v9402_v21 = vld [vmem:[#allocation10_spill] sm:$0xff]  ;;  %v9405_v14 = vld [vmem:[#allocation13_spill] sm:$0xff] }
  0x59   : > { %5653 = vmatmul.mubr.msk.f32.gmra.mrb[34].mxu0 %vm599_vm0, %v6471_v23  ;;  %vm1654_vm6 = vcmp.eq.s32.totalorder %v9396_v22, 1  ;;  %v5998_v19 = vpack.i.bf16 %v4884_v44, %v4883_v34  ;;  %v4887_v50 = vsel %vm1655_vm3, 1.0, %v9363_v62  ;;  %v4888_v61 = vsel %vm1656_vm4, 1.0, %v9363_v62  ;;  %v9406_v15 = vld [vmem:[#allocation14_spill] sm:$0xff]  ;;  %v9421_v34 = vld [vmem:[#allocation29_spill] sm:$0xff] }
  0x5a   : > { %5939 = vperm.xlu1 %5782, %v5938_v31   ;;  %5553 = vmatmul.mubr.msk.f32.gmra.mrb[34].mxu1 %vm599_vm0, %v6471_v23  ;;  %v5958_v23 = vpack.i.bf16 %v4868_v41, %v4867_v29  ;;  %v4886_v27 = vsel %vm1654_vm6, 1.0, %v9363_v62  ;;  %vm1659_vm7 = vcmp.eq.s32.totalorder %v9399_v5, 1  ;;  %vm1660_vm8 = vcmp.eq.s32.totalorder %v9400_v20, 1  ;;  %v9409_v29 = vld [vmem:[#allocation17_spill] sm:$0xff] }
  0x5b   : > { %5934 = vperm.xlu0 %5771, %v5933_v10   ;;  %5555 = vmatprep.mubr.msk.f32.mxu1 %vm599_vm0, %v6494_v33  ;;  %vm1657_vm9 = vcmp.eq.s32.totalorder %v9401_v56, 1  ;;  %vm1658_vm10 = vcmp.eq.s32.totalorder %v9402_v21, 1  ;;  %v6008_v35 = vpack.i.bf16 %v4888_v61, %v4887_v50  ;;  %v4891_v17 = vsel %vm1659_vm7, 1.0, %v9363_v62  ;;  %v9404_v10 = vld [vmem:[#allocation12_spill] sm:$0xff]  ;;  %v9425_v50 = vld [vmem:[#allocation33_spill] sm:$0xff]  ;;  %v9426_v61 = vld [vmem:[#allocation34_spill] sm:$0xff] }
  0x5c   : > { %5655 = vmatprep.mubr.msk.f32.mxu0 %vm599_vm0, %v6494_v33  ;;  %v5953_v33 = vpack.i.bf16 %v4866_v45, %v4865_v42  ;;  %v4892_v31 = vsel %vm1660_vm8, 1.0, %v9363_v62  ;;  %v4889_v32 = vsel %vm1657_vm9, 1.0, %v9363_v62  ;;  %v4890_v28 = vsel %vm1658_vm10, 1.0, %v9363_v62  ;;  %v9428_v56 = vld [vmem:[#allocation36_spill] sm:$0xff] }
  0x5d   : > { %5656 = vmatmul.mubr.msk.f32.gmra.mrb[36].mxu0 %vm599_vm0, %v6507_v40  ;;  %vm1663_vm11 = vcmp.eq.s32.totalorder %v9405_v14, 1  ;;  %vm1664_vm12 = vcmp.eq.s32.totalorder %v9406_v15, 1  ;;  %v6018_v41 = vpack.i.bf16 %v4892_v31, %v4891_v17  ;;  %v6013_v42 = vpack.i.bf16 %v4890_v28, %v4889_v32  ;;  %v9431_v17 = vld [vmem:[#allocation39_spill] sm:$0xff]  ;;  %v9432_v31 = vld [vmem:[#allocation40_spill] sm:$0xff] }
  0x5e   : > { %5949 = vperm.xlu1 %5782, %v5948_v12   ;;  %5556 = vmatmul.mubr.msk.f32.gmra.mrb[36].mxu1 %vm599_vm0, %v6507_v40  ;;  %v5968_v40 = vpack.i.bf16 %v4872_v54, %v4871_v46  ;;  %v9407_v12 = vld [vmem:[#allocation15_spill] sm:$0xff]  ;;  %v4895_v45 = vsel %vm1663_vm11, 1.0, %v9363_v62  ;;  %vm1673_vm10 = vcmp.eq.s32.totalorder %v9425_v50, 1  ;;  %vm1674_vm11 = vcmp.eq.s32.totalorder %v9426_v61, 1  ;;  %v6265_v50 = vld [vmem:[%s6432_s14 + $0x58] sm:$0xff] }
  0x5f   : > { %5944 = vperm.xlu0 %5771, %v5943_v18   ;;  %5558 = vmatprep.mubr.msk.f32.mxu1 %vm599_vm0, %v6532_v49  ;;  %vm1661_vm13 = vcmp.eq.s32.totalorder %v9407_v12, 1  ;;  %v9408_v18 = vld [vmem:[#allocation16_spill] sm:$0xff]  ;;  %v4905_v21 = vsel %vm1673_vm10, 1.0, %v9363_v62  ;;  %v9434_v12 = vld [vmem:[#allocation42_spill] sm:$0xff] }
  0x60   : > { %5658 = vmatprep.mubr.msk.f32.mxu0 %vm599_vm0, %v6532_v49  ;;  %v5963_v49 = vpack.i.bf16 %v4870_v58, %v4869_v55  ;;  %vm1662_vm14 = vcmp.eq.s32.totalorder %v9408_v18, 1  ;;  %v4893_v46 = vsel %vm1661_vm13, 1.0, %v9363_v62  ;;  %v9411_v55 = vld [vmem:[#allocation19_spill] sm:$0xff]  ;;  %v9412_v58 = vld [vmem:[#allocation20_spill] sm:$0xff] }
  0x61   : > { %5659 = vmatmul.mubr.msk.f32.gmra.mrb[38].mxu0 %vm599_vm0, %v6547_v57  ;;  %v4894_v54 = vsel %vm1662_vm14, 1.0, %v9363_v62  ;;  %vm1667_vm15 = vcmp.eq.s32.totalorder %v9411_v55, 1  ;;  %vm1668_vm1 = vcmp.eq.s32.totalorder %v9412_v58, 1  ;;  %vm1677_vm14 = vcmp.eq.s32.totalorder %v9431_v17, 1 }
  0x62   : > { %5959 = vperm.xlu1 %5782, %v5958_v23   ;;  %5559 = vmatmul.mubr.msk.f32.gmra.mrb[38].mxu1 %vm599_vm0, %v6547_v57  ;;  %v5978_v57 = vpack.i.bf16 %v4876_v3, %v4875_v59  ;;  %v4896_v23 = vsel %vm1664_vm12, 1.0, %v9363_v62  ;;  %v9415_v59 = vld [vmem:[#allocation23_spill] sm:$0xff]  ;;  %v4909_v18 = vsel %vm1677_vm14, 1.0, %v9363_v62 }
  0x63   : > { %5954 = vperm.xlu0 %5771, %v5953_v33   ;;  %5561 = vmatprep.mubr.msk.f32.mxu1 %vm599_vm0, %v6566_v63  ;;  %v9410_v33 = vld [vmem:[#allocation18_spill] sm:$0xff]  ;;  %v6028_v3 = vpack.i.bf16 %v4896_v23, %v4895_v45 }
  0x64   : > { %5661 = vmatprep.mubr.msk.f32.mxu0 %vm599_vm0, %v6566_v63  ;;  %v5973_v63 = vpack.i.bf16 %v4874_v7, %v4873_v4  ;;  %v6023_v4 = vpack.i.bf16 %v4894_v54, %v4893_v46  ;;  %v4899_v7 = vsel %vm1667_vm15, 1.0, %v9363_v62  ;;  %vm1678_vm15 = vcmp.eq.s32.totalorder %v9432_v31, 1  ;;  %v9438_v46 = vld [vmem:[#allocation46_spill] sm:$0xff]  ;;  %v9439_v54 = vld [vmem:[#allocation47_spill] sm:$0xff]  ;;  %v6270_v31 = vld [vmem:[%s6432_s14 + $0x70] sm:$0xff] }
  0x65   : > { %5662 = vmatmul.mubr.msk.f32.gmra.mrb[40].mxu0 %vm599_vm0, %v6589_v9 }
  0x66   : > { %5969 = vperm.xlu1 %5782, %v5968_v40   ;;  %5562 = vmatmul.mubr.msk.f32.gmra.mrb[40].mxu1 %vm599_vm0, %v6589_v9  ;;  %v5988_v9 = vpack.i.bf16 %v4880_v25, %v4879_v8  ;;  %v9413_v40 = vld [vmem:[#allocation21_spill] sm:$0xff] }
  0x67   : > { %5964 = vperm.xlu0 %5771, %v5963_v49   ;;  %5564 = vmatprep.mubr.msk.f32.mxu1 %vm599_vm0, %v6602_v24  ;;  %vm1665_vm2 = vcmp.eq.s32.totalorder %v9413_v40, 1  ;;  %v9414_v49 = vld [vmem:[#allocation22_spill] sm:$0xff] }
  0x68   : > { %5664 = vmatprep.mubr.msk.f32.mxu0 %vm599_vm0, %v6602_v24  ;;  %v5983_v24 = vpack.i.bf16 %v4878_v30, %v4877_v26  ;;  %vm1666_vm3 = vcmp.eq.s32.totalorder %v9414_v49, 1  ;;  %v4897_v8 = vsel %vm1665_vm2, 1.0, %v9363_v62  ;;  %v9417_v26 = vld [vmem:[#allocation25_spill] sm:$0xff]  ;;  %v9418_v30 = vld [vmem:[#allocation26_spill] sm:$0xff]  ;;  %vm1684_vm2 = vcmp.eq.s32.totalorder %v6953_v38, 1 }
  0x69   : > { %5665 = vmatmul.mubr.msk.f32.gmra.mrb[42].mxu0 %vm599_vm0, %v6622_v36  ;;  %v4898_v25 = vsel %vm1666_vm3, 1.0, %v9363_v62  ;;  %vm1671_vm4 = vcmp.eq.s32.totalorder %v9417_v26, 1  ;;  %vm1681_vm3 = vcmp.eq.s32.totalorder %v6958_v43, 1  ;;  %v9437_v38 = vld [vmem:[#allocation45_spill] sm:$0xff] }
  0x6a   : > { %5979 = vperm.xlu1 %5782, %v5978_v57   ;;  %5565 = vmatmul.mubr.msk.f32.gmra.mrb[42].mxu1 %vm599_vm0, %v6622_v36  ;;  %v9395_v36 = vld [vmem:[#allocation4_spill] sm:$0xff]  ;;  %v4900_v57 = vsel %vm1668_vm1, 1.0, %v9363_v62  ;;  %vm1683_vm1 = vcmp.eq.s32.totalorder %v6950_v11, 1  ;;  %v4916_v11 = vsel %vm1684_vm2, 1.0, %v9363_v62 }
  0x6b   : > { %5974 = vperm.xlu0 %5771, %v5973_v63   ;;  %5567 = vmatprep.mubr.msk.f32.mxu1 %vm599_vm0, %v6650_v53  ;;  %vm1653_vm5 = vcmp.eq.s32.totalorder %v9395_v36, 1  ;;  %v9416_v63 = vld [vmem:[#allocation24_spill] sm:$0xff]  ;;  %v6038_v44 = vpack.i.bf16 %v4900_v57, %v4899_v7  ;;  %v9422_v36 = vld [vmem:[#allocation30_spill] sm:$0xff]  ;;  %v4915_v23 = vsel %vm1683_vm1, 1.0, %v9363_v62  ;;  %v6256_v7 = vld [vmem:[%s6432_s14 + $0x8] sm:$0xff] }
  0x6c   : > { %5667 = vmatprep.mubr.msk.f32.mxu0 %vm599_vm0, %v6650_v53  ;;  %v5993_v53 = vpack.i.bf16 %v4882_v51, %v4881_v47  ;;  %v4885_v13 = vsel %vm1653_vm5, 1.0, %v9363_v62  ;;  %vm1672_vm5 = vcmp.eq.s32.totalorder %v9418_v30, 1  ;;  %v6033_v47 = vpack.i.bf16 %v4898_v25, %v4897_v8  ;;  %v6257_v25 = vld [vmem:[%s6426_s11 + $0x100] sm:$0xff] }
  0x6d   : > { %5668 = vmatmul.mubr.msk.f32.gmra.mrb[44].mxu0 %vm599_vm0, %v9397_v0  ;;  %v6003_v16 = vpack.i.bf16 %v4886_v27, %v4885_v13  ;;  %v4903_v51 = vsel %vm1671_vm4, 1.0, %v9363_v62  ;;  %v4904_v52 = vsel %vm1672_vm5, 1.0, %v9363_v62  ;;  %vm1682_vm4 = vcmp.eq.s32.totalorder %v6961_v39, 1 }
  0x6e   : > { %5989 = vperm.xlu1 %5782, %v5988_v9   ;;  %5568 = vmatmul.mubr.msk.f32.gmra.mrb[44].mxu1 %vm599_vm0, %v9397_v0  ;;  %v9419_v9 = vld [vmem:[#allocation27_spill] sm:$0xff]  ;;  %v6048_v13 = vpack.i.bf16 %v4904_v52, %v4903_v51  ;;  %v4913_v39 = vsel %vm1681_vm3, 1.0, %v9363_v62  ;;  %v4914_v43 = vsel %vm1682_vm4, 1.0, %v9363_v62  ;;  %vm1687_vm5 = vcmp.eq.s32.totalorder %v9437_v38, 1  ;;  %v6278_v38 = vld [vmem:[%s6432_s14 + $0x80] sm:$0xff] }
  0x6f   : > { %5984 = vperm.xlu0 %5771, %v5983_v24   ;;  %5570 = vmatprep.mubr.msk.f32.mxu1 %vm599_vm0, %v9398_v2  ;;  %vm1669_vm6 = vcmp.eq.s32.totalorder %v9419_v9, 1  ;;  %v9420_v24 = vld [vmem:[#allocation28_spill] sm:$0xff]  ;;  %v6078_v55 = vpack.i.bf16 %v4916_v11, %v4915_v23  ;;  %v6073_v58 = vpack.i.bf16 %v4914_v43, %v4913_v39  ;;  %v4919_v40 = vsel %vm1687_vm5, 1.0, %v9363_v62  ;;  %v6277_v39 = vld [vmem:[%s6432_s14 + $0x98] sm:$0xff] }
  0x70   : > { %5670 = vmatprep.mubr.msk.f32.mxu0 %vm599_vm0, %v9398_v2  ;;  %vm1670_vm7 = vcmp.eq.s32.totalorder %v9420_v24, 1  ;;  %v4901_v22 = vsel %vm1669_vm6, 1.0, %v9363_v62  ;;  %v9427_v2 = vld [vmem:[#allocation35_spill] sm:$0xff]  ;;  %vm1688_vm6 = vcmp.eq.s32.totalorder %v9438_v46, 1  ;;  %v6258_v9 = vld [vmem:[%s6432_s14 + $0x30] sm:$0xff]  ;;  %v6259_v24 = vld [vmem:[%s6432_s14 + $0x38] sm:$0xff] }
  0x71   : > { %5671 = vmatmul.mubr.msk.f32.gmra.mrb[46].mxu0 %vm599_vm0, %v9403_v60  ;;  %v4902_v0 = vsel %vm1670_vm7, 1.0, %v9363_v62  ;;  %vm1685_vm7 = vcmp.eq.s32.totalorder %v7000_v1, 1  ;;  %v4920_v49 = vsel %vm1688_vm6, 1.0, %v9363_v62  ;;  %vm2660_vm14 = vcmp.eq.s32.totalorder %v6259_v24, 2  ;;  %v6279_v46 = vld [vmem:[%s6432_s14 + $0x88] sm:$0xff] }
  0x72   : > { %5999 = vperm.xlu1 %5782, %v5998_v19   ;;  %5571 = vmatmul.mubr.msk.f32.gmra.mrb[46].mxu1 %vm599_vm0, %v9403_v60  ;;  %v9423_v19 = vld [vmem:[#allocation31_spill] sm:$0xff]  ;;  %v6043_v27 = vpack.i.bf16 %v4902_v0, %v4901_v22  ;;  %v4906_v60 = vsel %vm1674_vm11, 1.0, %v9363_v62  ;;  %v4917_v1 = vsel %vm1685_vm7, 1.0, %v9363_v62  ;;  %v6263_v22 = vld [vmem:[%s6426_s11 + $0x110] sm:$0xff]  ;;  %vm2664_vm3 = vcmp.eq.s32.totalorder %v6265_v50, 2 }
  0x73   : > { %5994 = vperm.xlu0 %5771, %v5993_v53   ;;  %5573 = vmatprep.mubr.msk.f32.mxu1 %vm599_vm0, %v9404_v10  ;;  %vm1675_vm8 = vcmp.eq.s32.totalorder %v9423_v19, 1  ;;  %v9424_v53 = vld [vmem:[#allocation32_spill] sm:$0xff]  ;;  %v6053_v28 = vpack.i.bf16 %v4906_v60, %v4905_v21  ;;  %v4998_v60 = vsel %vm2664_vm3, 1.0, %v9363_v62  ;;  %vm2667_vm6 = vcmp.eq.s32.totalorder %v6270_v31, 2 }
  0x74   : > { %5673 = vmatprep.mubr.msk.f32.mxu0 %vm599_vm0, %v9404_v10  ;;  %vm1676_vm9 = vcmp.eq.s32.totalorder %v9424_v53, 1  ;;  %v4907_v5 = vsel %vm1675_vm8, 1.0, %v9363_v62  ;;  %v9433_v10 = vld [vmem:[#allocation41_spill] sm:$0xff]  ;;  %vm1686_vm8 = vcmp.eq.s32.totalorder %v9439_v54, 1  ;;  %v6264_v53 = vld [vmem:[%s6432_s14 + $0x50] sm:$0xff] }
  0x75   : > { %5674 = vmatmul.mubr.msk.f32.gmra.mrb[48].mxu0 %vm599_vm0, %v9409_v29  ;;  %v4908_v20 = vsel %vm1676_vm9, 1.0, %v9363_v62  ;;  %vm2663_vm2 = vcmp.eq.s32.totalorder %v6264_v53, 2 }
  0x76   : > { %6009 = vperm.xlu1 %5782, %v6008_v35   ;;  %5574 = vmatmul.mubr.msk.f32.gmra.mrb[48].mxu1 %vm599_vm0, %v9409_v29  ;;  %v9429_v35 = vld [vmem:[#allocation37_spill] sm:$0xff]  ;;  %v6058_v32 = vpack.i.bf16 %v4908_v20, %v4907_v5  ;;  %v4910_v29 = vsel %vm1678_vm15, 1.0, %v9363_v62  ;;  %v4997_v21 = vsel %vm2663_vm2, 1.0, %v9363_v62 }
  0x77   : > { %6004 = vperm.xlu0 %5771, %v6003_v16   ;;  %5576 = vmatprep.mubr.msk.f32.mxu1 %vm599_vm0, %v9410_v33  ;;  %vm1679_vm12 = vcmp.eq.s32.totalorder %v9429_v35, 1  ;;  %v9430_v16 = vld [vmem:[#allocation38_spill] sm:$0xff]  ;;  %v6063_v45 = vpack.i.bf16 %v4910_v29, %v4909_v18  ;;  %v6268_v5 = vld [vmem:[%s6426_s11 + $0x118] sm:$0xff]  ;;  %v6118_v18 = vpack.i.bf16 %v4998_v60, %v4997_v21  ;;  %v6294_v21 = vld [vmem:[%s6432_s14 + $0xf0] sm:$0xff] }
  0x78   : > { %5676 = vmatprep.mubr.msk.f32.mxu0 %vm599_vm0, %v9410_v33  ;;  %vm1680_vm13 = vcmp.eq.s32.totalorder %v9430_v16, 1  ;;  %v4911_v14 = vsel %vm1679_vm12, 1.0, %v9363_v62  ;;  %v9436_v33 = vld [vmem:[#allocation44_spill] sm:$0xff]  ;;  %vm2654_vm12 = vcmp.eq.s32.totalorder %v6256_v7, 2  ;;  %v6269_v35 = vld [vmem:[%s6426_s11 + $0x120] sm:$0xff]  ;;  %v6283_v7 = vld [vmem:[%s6432_s14 + $0xb8] sm:$0xff] }
  0x79   : > { %5677 = vmatmul.mubr.msk.f32.gmra.mrb[50].mxu0 %vm599_vm0, %v9415_v59  ;;  %v4912_v15 = vsel %vm1680_vm13, 1.0, %v9363_v62  ;;  %v4988_v30 = vsel %vm2654_vm12, 1.0, %v9363_v62  ;;  %vm2659_vm13 = vcmp.eq.s32.totalorder %v6258_v9, 2  ;;  %vm2669_vm12 = vcmp.eq.s32.totalorder %v6278_v38, 2  ;;  %v6295_v60 = vld [vmem:[%s6432_s14 + $0xf8] sm:$0xff] }
  0x7a   : > { %6019 = vperm.xlu1 %5782, %v6018_v41   ;;  %5577 = vmatmul.mubr.msk.f32.gmra.mrb[50].mxu1 %vm599_vm0, %v9415_v59  ;;  %v9435_v41 = vld [vmem:[#allocation43_spill] sm:$0xff]  ;;  %v4918_v59 = vsel %vm1686_vm8, 1.0, %v9363_v62  ;;  %v4993_v52 = vsel %vm2659_vm13, 1.0, %v9363_v62  ;;  %vm2670_vm13 = vcmp.eq.s32.totalorder %v6279_v46, 2  ;;  %v6304_v46 = vld [vmem:[%s6426_s11 + $0x178] sm:$0xff] }
  0x7b   : > { %6014 = vperm.xlu0 %5771, %v6013_v42   ;;  %5579 = vmatprep.mubr.msk.f32.mxu1 %vm599_vm0, %v9416_v63  ;;  %v6068_v42 = vpack.i.bf16 %v4912_v15, %v4911_v14  ;;  %v6083_v57 = vpack.i.bf16 %v4918_v59, %v4917_v1  ;;  %v6273_v14 = vld [vmem:[%s6432_s14 + $0x68] sm:$0xff]  ;;  %v6281_v59 = vld [vmem:[%s6426_s11 + $0x140] sm:$0xff] }
  0x7c   : > { %5679 = vmatprep.mubr.msk.f32.mxu0 %vm599_vm0, %v9416_v63 }
  0x7d   : > { %5680 = vmatmul.mubr.msk.f32.gmra.mrb[52].mxu0 %vm599_vm0, %v9421_v34 }
  0x7e   : > { %6029 = vperm.xlu1 %5782, %v6028_v3   ;;  %5580 = vmatmul.mubr.msk.f32.gmra.mrb[52].mxu1 %vm599_vm0, %v9421_v34  ;;  %v6253_v3 = vld [vmem:[%s6432_s14 + $0x10] sm:$0xff]  ;;  %v6261_v34 = vld [vmem:[%s6432_s14 + $0x28] sm:$0xff] }
  0x7f   : > { %6024 = vperm.xlu0 %5771, %v6023_v4   ;;  %5582 = vmatprep.mubr.msk.f32.mxu1 %vm599_vm0, %v9422_v36  ;;  %vm2655_vm9 = vcmp.eq.s32.totalorder %v6253_v3, 2  ;;  %v6254_v4 = vld [vmem:[%s6432_s14 + $0x18] sm:$0xff]  ;;  %vm2658_vm1 = vcmp.eq.s32.totalorder %v6261_v34, 2  ;;  %v5003_v3 = vsel %vm2669_vm12, 1.0, %v9363_v62 }
  0x80   : > { %5682 = vmatprep.mubr.msk.f32.mxu0 %vm599_vm0, %v9422_v36  ;;  %vm2656_vm10 = vcmp.eq.s32.totalorder %v6254_v4, 2  ;;  %v4989_v63 = vsel %vm2655_vm9, 1.0, %v9363_v62  ;;  %v4994_v36 = vsel %vm2660_vm14, 1.0, %v9363_v62  ;;  %v4992_v19 = vsel %vm2658_vm1, 1.0, %v9363_v62 }
  0x81   : > { %5683 = vmatmul.mubr.msk.f32.gmra.mrb[54].mxu0 %vm599_vm0, %v9427_v2  ;;  %v4990_v8 = vsel %vm2656_vm10, 1.0, %v9363_v62  ;;  %v6108_v20 = vpack.i.bf16 %v4994_v36, %v4993_v52  ;;  %vm2666_vm9 = vcmp.eq.s32.totalorder %v6273_v14, 2  ;;  %v5004_v4 = vsel %vm2670_vm13, 1.0, %v9363_v62  ;;  %v6290_v36 = vld [vmem:[%s6432_s14 + $0xc0] sm:$0xff] }
  0x82   : > { %6039 = vperm.xlu1 %5782, %v6038_v44   ;;  %5583 = vmatmul.mubr.msk.f32.gmra.mrb[54].mxu1 %vm599_vm0, %v9427_v2  ;;  %v6262_v44 = vld [vmem:[%s6426_s11 + $0x108] sm:$0xff]  ;;  %v6266_v2 = vld [vmem:[%s6432_s14 + $0x40] sm:$0xff]  ;;  %v5000_v11 = vsel %vm2666_vm9, 1.0, %v9363_v62 }
  0x83   : > { %6034 = vperm.xlu0 %5771, %v6033_v47   ;;  %5585 = vmatprep.mubr.msk.f32.mxu1 %vm599_vm0, %v9428_v56  ;;  %v6098_v47 = vpack.i.bf16 %v4990_v8, %v4989_v63  ;;  %vm2661_vm4 = vcmp.eq.s32.totalorder %v6266_v2, 2  ;;  %v6285_v63 = vld [vmem:[%s6432_s14 + $0xa8] sm:$0xff] }
  0x84   : > { %5685 = vmatprep.mubr.msk.f32.mxu0 %vm599_vm0, %v9428_v56  ;;  %v4995_v16 = vsel %vm2661_vm4, 1.0, %v9363_v62  ;;  %vm2674_vm2 = vcmp.eq.s32.totalorder %v6285_v63, 2  ;;  %v6309_v63 = vld [vmem:[%s6432_s14 + $0x128] sm:$0xff] }
  0x85   : > { %5686 = vmatmul.mubr.msk.f32.gmra.mrb[56].mxu0 %vm599_vm0, %v9433_v10 }
  0x86   : > { %6049 = vperm.xlu1 %5782, %v6048_v13   ;;  %5586 = vmatmul.mubr.msk.f32.gmra.mrb[56].mxu1 %vm599_vm0, %v9433_v10  ;;  %v6267_v13 = vld [vmem:[%s6432_s14 + $0x48] sm:$0xff]  ;;  %v6271_v10 = vld [vmem:[%s6432_s14 + $0x78] sm:$0xff] }
  0x87   : > { %6044 = vperm.xlu0 %5771, %v6043_v27   ;;  %5588 = vmatprep.mubr.msk.f32.mxu1 %vm599_vm0, %v9434_v12  ;;  %vm2662_vm5 = vcmp.eq.s32.totalorder %v6267_v13, 2  ;;  %vm2668_vm7 = vcmp.eq.s32.totalorder %v6271_v10, 2  ;;  %v6298_v10 = vld [vmem:[%s6426_s11 + $0x168] sm:$0xff] }
  0x88   : > { %5688 = vmatprep.mubr.msk.f32.mxu0 %vm599_vm0, %v9434_v12  ;;  %v4996_v17 = vsel %vm2662_vm5, 1.0, %v9363_v62  ;;  %v6274_v12 = vld [vmem:[%s6426_s11 + $0x128] sm:$0xff]  ;;  %vm2677_vm5 = vcmp.eq.s32.totalorder %v6290_v36, 2  ;;  %v6313_v36 = vld [vmem:[%s6432_s14 + $0x158] sm:$0xff] }
  0x89   : > { %5689 = vmatmul.mubr.msk.f32.gmra.mrb[58].mxu0 %vm599_vm0, %v9435_v41  ;;  %v6113_v29 = vpack.i.bf16 %v4996_v17, %v4995_v16  ;;  %v6296_v16 = vld [vmem:[%s6432_s14 + $0xe0] sm:$0xff]  ;;  %v6297_v17 = vld [vmem:[%s6432_s14 + $0xe8] sm:$0xff] }
  0x8a   : > { %6059 = vperm.xlu1 %5782, %v6058_v32   ;;  %5589 = vmatmul.mubr.msk.f32.gmra.mrb[58].mxu1 %vm599_vm0, %v9435_v41  ;;  %v5001_v41 = vsel %vm2667_vm6, 1.0, %v9363_v62  ;;  %vm2681_vm9 = vcmp.eq.s32.totalorder %v6296_v16, 2 }
  0x8b   : > { %6054 = vperm.xlu0 %5771, %v6053_v28   ;;  %5591 = vmatprep.mubr.msk.f32.mxu1 %vm599_vm0, %v9436_v33  ;;  %v6272_v28 = vld [vmem:[%s6432_s14 + $0x60] sm:$0xff] }
  0x8c   : > { %5691 = vmatprep.mubr.msk.f32.mxu0 %vm599_vm0, %v9436_v33  ;;  %vm2665_vm8 = vcmp.eq.s32.totalorder %v6272_v28, 2  ;;  %v6276_v33 = vld [vmem:[%s6432_s14 + $0x90] sm:$0xff] }
  0x8d   : > { %5692 = vmatmul.mubr.msk.f32.gmra.mrb[60].mxu0 %vm599_vm0, %v7007_v48  ;;  %v4999_v23 = vsel %vm2665_vm8, 1.0, %v9363_v62  ;;  %vm2671_vm10 = vcmp.eq.s32.totalorder %v6276_v33, 2  ;;  %vm2684_vm8 = vcmp.eq.s32.totalorder %v6295_v60, 2  ;;  %v6302_v33 = vld [vmem:[%s6432_s14 + $0x100] sm:$0xff] }
  0x8e   : > { %6069 = vperm.xlu1 %5782, %v6068_v42   ;;  %5592 = vmatmul.mubr.msk.f32.gmra.mrb[60].mxu1 %vm599_vm0, %v7007_v48  ;;  %v6255_v48 = vld [vmem:[%s6432_s14] sm:$0xff]  ;;  %v5002_v42 = vsel %vm2668_vm7, 1.0, %v9363_v62  ;;  %vm2683_vm7 = vcmp.eq.s32.totalorder %v6294_v21, 2  ;;  %vm2685_vm13 = vcmp.eq.s32.totalorder %v6302_v33, 2  ;;  %v6323_v33 = vld [vmem:[%s6426_s11 + $0x1b0] sm:$0xff] }
  0x8f   : > { %6064 = vperm.xlu0 %5771, %v6063_v45   ;;  %5594 = vmatprep.mubr.msk.f32.mxu1 %vm599_vm0, %v7028_v6  ;;  %vm2653_vm11 = vcmp.eq.s32.totalorder %v6255_v48, 2  ;;  %v6275_v45 = vld [vmem:[%s6426_s11 + $0x130] sm:$0xff]  ;;  %v6317_v21 = vld [vmem:[%s6426_s11 + $0x1a0] sm:$0xff] }
  0x90   : > { %5694 = vmatprep.mubr.msk.f32.mxu0 %vm599_vm0, %v7028_v6  ;;  %v6088_v6 = vpack.i.bf16 %v4920_v49, %v4919_v40  ;;  %v4987_v26 = vsel %vm2653_vm11, 1.0, %v9363_v62  ;;  %vm2672_vm11 = vcmp.eq.s32.totalorder %v6277_v39, 2  ;;  %v6123_v40 = vpack.i.bf16 %v5000_v11, %v4999_v23  ;;  %v6282_v48 = vld [vmem:[%s6432_s14 + $0xb0] sm:$0xff]  ;;  %v6301_v23 = vld [vmem:[%s6432_s14 + $0x118] sm:$0xff]  ;;  %v6303_v39 = vld [vmem:[%s6432_s14 + $0x108] sm:$0xff] }
  0x91   : > { %5695 = vmatmul.mubr.msk.f32.gmra.mrb[62].mxu0 %vm599_vm0, %v7037_v37  ;;  %v6093_v51 = vpack.i.bf16 %v4988_v30, %v4987_v26  ;;  %v5005_v49 = vsel %vm2671_vm10, 1.0, %v9363_v62  ;;  %v5006_v1 = vsel %vm2672_vm11, 1.0, %v9363_v62  ;;  %vm2675_vm14 = vcmp.eq.s32.totalorder %v6282_v48, 2  ;;  %v6307_v48 = vld [vmem:[%s6432_s14 + $0x138] sm:$0xff] }
  0x92   : > { %6079 = vperm.xlu1 %5782, %v6078_v55   ;;  %5595 = vmatmul.mubr.msk.f32.gmra.mrb[62].mxu1 %vm599_vm0, %v7037_v37  ;;  %v6260_v37 = vld [vmem:[%s6432_s14 + $0x20] sm:$0xff]  ;;  %v6280_v55 = vld [vmem:[%s6426_s11 + $0x138] sm:$0xff]  ;;  %v6138_v26 = vpack.i.bf16 %v5006_v1, %v5005_v49  ;;  %v6133_v30 = vpack.i.bf16 %v5004_v4, %v5003_v3  ;;  %v5009_v9 = vsel %vm2675_vm14, 1.0, %v9363_v62  ;;  %vm2682_vm10 = vcmp.eq.s32.totalorder %v6297_v17, 2  ;;  %v6306_v4 = vld [vmem:[%s6432_s14 + $0x130] sm:$0xff] }
  0x93   : > { %6074 = vperm.xlu0 %5771, %v6073_v58   ;;  %5597 = vmatprep.mubr.msk.f32.mxu1 %vm599_vm0, %v6257_v25  ;;  %vm2657_vm15 = vcmp.eq.s32.totalorder %v6260_v37, 2  ;;  %v6128_v58 = vpack.i.bf16 %v5002_v42, %v5001_v41  ;;  %v6287_v37 = vld [vmem:[%s6426_s11 + $0x150] sm:$0xff]  ;;  %v5015_v41 = vsel %vm2681_vm9, 1.0, %v9363_v62  ;;  %v5016_v42 = vsel %vm2682_vm10, 1.0, %v9363_v62  ;;  %v6305_v1 = vld [vmem:[%s6426_s11 + $0x180] sm:$0xff] }
  0x94   : > { %5697 = vmatprep.mubr.msk.f32.mxu0 %vm599_vm0, %v6257_v25  ;;  %v4991_v0 = vsel %vm2657_vm15, 1.0, %v9363_v62  ;;  %vm2676_vm15 = vcmp.eq.s32.totalorder %v6283_v7, 2  ;;  %v6286_v25 = vld [vmem:[%s6426_s11 + $0x148] sm:$0xff]  ;;  %vm2688_vm12 = vcmp.eq.s32.totalorder %v6301_v23, 2  ;;  %vm2686_vm14 = vcmp.eq.s32.totalorder %v6303_v39, 2  ;;  %v6318_v17 = vld [vmem:[%s6432_s14 + $0x170] sm:$0xff] }
  0x95   : > { %5698 = vmatmul.mubr.msk.f32.gmra.mrb[64].mxu0 %vm599_vm0, %v6262_v44  ;;  %v6103_v56 = vpack.i.bf16 %v4992_v19, %v4991_v0  ;;  %v5010_v24 = vsel %vm2676_vm15, 1.0, %v9363_v62  ;;  %v6292_v19 = vld [vmem:[%s6426_s11 + $0x158] sm:$0xff]  ;;  %v5022_v49 = vsel %vm2688_vm12, 1.0, %v9363_v62  ;;  %v5020_v3 = vsel %vm2686_vm14, 1.0, %v9363_v62 }
  0x96   : > { %6089 = vperm.xlu1 %5782, %v6088_v6   ;;  %5598 = vmatmul.mubr.msk.f32.gmra.mrb[64].mxu1 %vm599_vm0, %v6262_v44  ;;  %v5008_v44 = vsel %vm2674_vm2, 1.0, %v9363_v62  ;;  %v6148_v53 = vpack.i.bf16 %v5010_v24, %v5009_v9  ;;  %vm2691_vm15 = vcmp.eq.s32.totalorder %v6306_v4, 2 }
  0x97   : > { %6084 = vperm.xlu0 %5771, %v6083_v57   ;;  %5600 = vmatprep.mubr.msk.f32.mxu1 %vm599_vm0, %v6263_v22  ;;  %v6284_v57 = vld [vmem:[%s6432_s14 + $0xa0] sm:$0xff]  ;;  %v5025_v24 = vsel %vm2691_vm15, 1.0, %v9363_v62 }
  0x98   : > { %5700 = vmatprep.mubr.msk.f32.mxu0 %vm599_vm0, %v6263_v22  ;;  %vm2673_vm1 = vcmp.eq.s32.totalorder %v6284_v57, 2  ;;  %v6291_v22 = vld [vmem:[%s6432_s14 + $0xc8] sm:$0xff]  ;;  %v6308_v57 = vld [vmem:[%s6432_s14 + $0x120] sm:$0xff] }
  0x99   : > { %v7333_v61 = vpop.permute.xlu1 %5784  ;;  %5701 = vmatmul.mubr.msk.f32.gmra.mrb[66].mxu0 %vm599_vm0, %v6268_v5  ;;  %v5007_v34 = vsel %vm2673_vm1, 1.0, %v9363_v62  ;;  %vm2678_vm6 = vcmp.eq.s32.totalorder %v6291_v22, 2  ;;  %vm2692_vm1 = vcmp.eq.s32.totalorder %v6307_v48, 2  ;;  %vm2689_vm2 = vcmp.eq.s32.totalorder %v6308_v57, 2 }
  0x9a   : > { %v7337_v27 = vpop.permute.xlu0 %5773  ;;  %6099 = vperm.xlu1 %5782, %v6098_v47   ;;  %5601 = vmatmul.mubr.msk.f32.gmra.mrb[66].mxu1 %vm599_vm0, %v6268_v5  ;;  %v6288_v47 = vld [vmem:[%s6432_s14 + $0xd0] sm:$0xff]  ;;  %v6143_v50 = vpack.i.bf16 %v5008_v44, %v5007_v34  ;;  %v6293_v5 = vld [vmem:[%s6426_s11 + $0x160] sm:$0xff]  ;;  %v5023_v44 = vsel %vm2689_vm2, 1.0, %v9363_v62 }
  0x9b   : > { %6094 = vperm.xlu0 %5771, %v6093_v51   ;;  %5603 = vmatprep.mubr.msk.f32.mxu1 %vm599_vm0, %v6269_v35  ;;  %vm2679_vm3 = vcmp.eq.s32.totalorder %v6288_v47, 2  ;;  %v6289_v51 = vld [vmem:[%s6432_s14 + $0xd8] sm:$0xff]  ;;  %v6311_v34 = vld [vmem:[%s6426_s11 + $0x190] sm:$0xff] }
  0x9c   : > { %5703 = vmatprep.mubr.msk.f32.mxu0 %vm599_vm0, %v6269_v35  ;;  %vm2680_vm4 = vcmp.eq.s32.totalorder %v6289_v51, 2  ;;  %v5013_v2 = vsel %vm2679_vm3, 1.0, %v9363_v62  ;;  %vm2690_vm3 = vcmp.eq.s32.totalorder %v6309_v63, 2  ;;  %v6312_v51 = vld [vmem:[%s6432_s14 + $0x150] sm:$0xff] }
  0x9d   : > { %v7353_v32 = vpop.permute.xlu1 %5789  ;;  %5704 = vmatmul.mubr.msk.f32.gmra.mrb[68].mxu0 %vm599_vm0, %v6274_v12  ;;  %v5014_v13 = vsel %vm2680_vm4, 1.0, %v9363_v62  ;;  %v5024_v47 = vsel %vm2690_vm3, 1.0, %v9363_v62  ;;  %vm2695_vm4 = vcmp.eq.s32.totalorder %v6312_v51, 2 }
  0x9e   : > { %v7357_v15 = vpop.permute.xlu0 %5778  ;;  %6109 = vperm.xlu1 %5782, %v6108_v20   ;;  %5604 = vmatmul.mubr.msk.f32.gmra.mrb[68].mxu1 %vm599_vm0, %v6274_v12  ;;  %v5011_v20 = vsel %vm2677_vm5, 1.0, %v9363_v62  ;;  %v6158_v28 = vpack.i.bf16 %v5014_v13, %v5013_v2  ;;  %v5017_v12 = vsel %vm2683_vm7, 1.0, %v9363_v62  ;;  %vm2696_vm5 = vcmp.eq.s32.totalorder %v6313_v36, 2  ;;  %v6316_v2 = vld [vmem:[%s6426_s11 + $0x198] sm:$0xff]  ;;  %v6334_v36 = vld [vmem:[%s6426_s11 + $0x1c8] sm:$0xff] }
  0x9f   : > { %6104 = vperm.xlu0 %5771, %v6103_v56   ;;  %5606 = vmatprep.mubr.msk.f32.mxu1 %vm599_vm0, %v6275_v45  ;;  %v5012_v56 = vsel %vm2678_vm6, 1.0, %v9363_v62 }
  0xa0   : > { %5706 = vmatprep.mubr.msk.f32.mxu0 %vm599_vm0, %v6275_v45  ;;  %v6153_v14 = vpack.i.bf16 %v5012_v56, %v5011_v20  ;;  %v6300_v45 = vld [vmem:[%s6432_s14 + $0x110] sm:$0xff]  ;;  %v5029_v20 = vsel %vm2695_vm4, 1.0, %v9363_v62  ;;  %v5030_v56 = vsel %vm2696_vm5, 1.0, %v9363_v62 }
  0xa1   : > { %v7373_v43 = vpop.permute.xlu1 %5799  ;;  %5707 = vmatmul.mubr.msk.f32.gmra.mrb[70].mxu0 %vm599_vm0, %v6280_v55  ;;  %vm2687_vm11 = vcmp.eq.s32.totalorder %v6300_v45, 2 }
  0xa2   : > { %v7377_v54 = vpop.permute.xlu0 %5794  ;;  %6119 = vperm.xlu1 %5782, %v6118_v18   ;;  %5607 = vmatmul.mubr.msk.f32.gmra.mrb[70].mxu1 %vm599_vm0, %v6280_v55  ;;  %v5018_v18 = vsel %vm2684_vm8, 1.0, %v9363_v62  ;;  %vm2699_vm8 = vcmp.eq.s32.totalorder %v6318_v17, 2  ;;  %v6338_v17 = vld [vmem:[%s6432_s14 + $0x1c0] sm:$0xff] }
  0xa3   : > { %6114 = vperm.xlu0 %5771, %v6113_v29   ;;  %5609 = vmatprep.mubr.msk.f32.mxu1 %vm599_vm0, %v6281_v59  ;;  %v6299_v29 = vld [vmem:[%s6426_s11 + $0x170] sm:$0xff]  ;;  %v6168_v55 = vpack.i.bf16 %v5018_v18, %v5017_v12  ;;  %v6321_v12 = vld [vmem:[%s6432_s14 + $0x168] sm:$0xff]  ;;  %v5033_v45 = vsel %vm2699_vm8, 1.0, %v9363_v62 }
  0xa4   : > { %5709 = vmatprep.mubr.msk.f32.mxu0 %vm599_vm0, %v6281_v59  ;;  %v5019_v59 = vsel %vm2685_vm13, 1.0, %v9363_v62 }
  0xa5   : > { %v7393_v6 = vpop.permute.xlu1 %5809  ;;  %5710 = vmatmul.mubr.msk.f32.gmra.mrb[72].mxu0 %vm599_vm0, %v6286_v25  ;;  %v6173_v9 = vpack.i.bf16 %v5020_v3, %v5019_v59  ;;  %v6328_v3 = vld [vmem:[%s6426_s11 + $0x1b8] sm:$0xff] }
  0xa6   : > { %v7397_v8 = vpop.permute.xlu0 %5804  ;;  %6129 = vperm.xlu1 %5782, %v6128_v58   ;;  %5610 = vmatmul.mubr.msk.f32.gmra.mrb[72].mxu1 %vm599_vm0, %v6286_v25  ;;  %v6163_v58 = vpack.i.bf16 %v5016_v42, %v5015_v41  ;;  %v6198_v41 = vpack.i.bf16 %v5030_v56, %v5029_v20 }
  0xa7   : > { %6124 = vperm.xlu0 %5771, %v6123_v40   ;;  %5612 = vmatprep.mubr.msk.f32.mxu1 %vm599_vm0, %v6287_v37  ;;  %v5021_v40 = vsel %vm2687_vm11, 1.0, %v9363_v62  ;;  %vm2698_vm11 = vcmp.eq.s32.totalorder %v6321_v12, 2  ;;  %v6340_v12 = vld [vmem:[%s6426_s11 + $0x1d8] sm:$0xff] }
  0xa8   : > { %5712 = vmatprep.mubr.msk.f32.mxu0 %vm599_vm0, %v6287_v37  ;;  %v5026_v37 = vsel %vm2692_vm1, 1.0, %v9363_v62 }
  0xa9   : > { %v7413_v52 = vpop.permute.xlu1 %5819  ;;  %5713 = vmatmul.mubr.msk.f32.gmra.mrb[74].mxu0 %vm599_vm0, %v6292_v19  ;;  %v6188_v13 = vpack.i.bf16 %v5026_v37, %v5025_v24  ;;  %v6330_v24 = vld [vmem:[%s6432_s14 + $0x1b0] sm:$0xff]  ;;  %v6331_v37 = vld [vmem:[%s6432_s14 + $0x1b8] sm:$0xff] }
  0xaa   : > { %v7417_v0 = vpop.permute.xlu0 %5814  ;;  %6139 = vperm.xlu1 %5782, %v6138_v26   ;;  %5613 = vmatmul.mubr.msk.f32.gmra.mrb[74].mxu1 %vm599_vm0, %v6292_v19  ;;  %v6310_v26 = vld [vmem:[%s6426_s11 + $0x188] sm:$0xff]  ;;  %v6314_v19 = vld [vmem:[%s6432_s14 + $0x140] sm:$0xff]  ;;  %vm2707_vm1 = vcmp.eq.s32.totalorder %v6330_v24, 2  ;;  %vm2708_vm2 = vcmp.eq.s32.totalorder %v6331_v37, 2 }
  0xab   : > { %6134 = vperm.xlu0 %5771, %v6133_v30   ;;  %5615 = vmatprep.mubr.msk.f32.mxu1 %vm599_vm0, %v6293_v5  ;;  %v6178_v30 = vpack.i.bf16 %v5022_v49, %v5021_v40  ;;  %vm2693_vm6 = vcmp.eq.s32.totalorder %v6314_v19, 2  ;;  %v6326_v49 = vld [vmem:[%s6432_s14 + $0x180] sm:$0xff] }
  0xac   : > { %5715 = vmatprep.mubr.msk.f32.mxu0 %vm599_vm0, %v6293_v5  ;;  %v6183_v5 = vpack.i.bf16 %v5024_v47, %v5023_v44  ;;  %v5027_v60 = vsel %vm2693_vm6, 1.0, %v9363_v62  ;;  %vm2701_vm14 = vcmp.eq.s32.totalorder %v6326_v49, 2  ;;  %v6332_v44 = vld [vmem:[%s6432_s14 + $0x1a0] sm:$0xff]  ;;  %v6333_v47 = vld [vmem:[%s6432_s14 + $0x1a8] sm:$0xff] }
  0xad   : > { %v7433_v35 = vpop.permute.xlu1 %5829  ;;  %5716 = vmatmul.mubr.msk.f32.gmra.mrb[76].mxu0 %vm599_vm0, %v6298_v10  ;;  %vm2705_vm3 = vcmp.eq.s32.totalorder %v6332_v44, 2  ;;  %vm2706_vm4 = vcmp.eq.s32.totalorder %v6333_v47, 2  ;;  %v6344_v49 = vld [vmem:[%s6432_s14 + $0x1e0] sm:$0xff]  ;;  %v6348_v47 = vld [vmem:[%s6426_s11 + $0x1f8] sm:$0xff] }
  0xae   : > { %v7437_v31 = vpop.permute.xlu0 %5824  ;;  %6149 = vperm.xlu1 %5782, %v6148_v53   ;;  %5616 = vmatmul.mubr.msk.f32.gmra.mrb[76].mxu1 %vm599_vm0, %v6298_v10  ;;  %v6315_v53 = vld [vmem:[%s6432_s14 + $0x148] sm:$0xff]  ;;  %v6319_v10 = vld [vmem:[%s6432_s14 + $0x178] sm:$0xff]  ;;  %v5039_v20 = vsel %vm2705_vm3, 1.0, %v9363_v62  ;;  %v5040_v56 = vsel %vm2706_vm4, 1.0, %v9363_v62 }
  0xaf   : > { %6144 = vperm.xlu0 %5771, %v6143_v50   ;;  %5618 = vmatprep.mubr.msk.f32.mxu1 %vm599_vm0, %v6299_v29  ;;  %vm2694_vm7 = vcmp.eq.s32.totalorder %v6315_v53, 2  ;;  %vm2700_vm9 = vcmp.eq.s32.totalorder %v6319_v10, 2  ;;  %v6339_v10 = vld [vmem:[%s6432_s14 + $0x1c8] sm:$0xff] }
  0xb0   : > { %5718 = vmatprep.mubr.msk.f32.mxu0 %vm599_vm0, %v6299_v29  ;;  %v5028_v16 = vsel %vm2694_vm7, 1.0, %v9363_v62  ;;  %v6322_v29 = vld [vmem:[%s6426_s11 + $0x1a8] sm:$0xff]  ;;  %v5034_v23 = vsel %vm2700_vm9, 1.0, %v9363_v62  ;;  %vm2709_vm7 = vcmp.eq.s32.totalorder %v6338_v17, 2  ;;  %vm2710_vm8 = vcmp.eq.s32.totalorder %v6339_v10, 2 }
  0xb1   : > { %v7453_v11 = vpop.permute.xlu1 %5839  ;;  %5719 = vmatmul.mubr.msk.f32.gmra.mrb[78].mxu0 %vm599_vm0, %v6304_v46  ;;  %v6193_v42 = vpack.i.bf16 %v5028_v16, %v5027_v60  ;;  %v6208_v4 = vpack.i.bf16 %v5034_v23, %v5033_v45  ;;  %v6337_v60 = vld [vmem:[%s6432_s14 + $0x1d8] sm:$0xff]  ;;  %v6341_v23 = vld [vmem:[%s6426_s11 + $0x1e0] sm:$0xff] }
  0xb2   : > { %v7457_v38 = vpop.permute.xlu0 %5834  ;;  %6159 = vperm.xlu1 %5782, %v6158_v28   ;;  %5619 = vmatmul.mubr.msk.f32.gmra.mrb[78].mxu1 %vm599_vm0, %v6304_v46  ;;  %v5032_v46 = vsel %vm2698_vm11, 1.0, %v9363_v62  ;;  %vm2712_vm6 = vcmp.eq.s32.totalorder %v6337_v60, 2  ;;  %vm2713_vm11 = vcmp.eq.s32.totalorder %v6344_v49, 2 }
  0xb3   : > { %6154 = vperm.xlu0 %5771, %v6153_v14   ;;  %5621 = vmatprep.mubr.msk.f32.mxu1 %vm599_vm0, %v6305_v1  ;;  %v6320_v14 = vld [vmem:[%s6432_s14 + $0x160] sm:$0xff]  ;;  %v5046_v45 = vsel %vm2712_vm6, 1.0, %v9363_v62 }
  0xb4   : > { %5721 = vmatprep.mubr.msk.f32.mxu0 %vm599_vm0, %v6305_v1  ;;  %vm2697_vm10 = vcmp.eq.s32.totalorder %v6320_v14, 2  ;;  %v6327_v1 = vld [vmem:[%s6432_s14 + $0x188] sm:$0xff] }
  0xb5   : > { %v7473_v7 = vpop.permute.xlu1 %5849  ;;  %5722 = vmatmul.mubr.msk.f32.gmra.mrb[80].mxu0 %vm599_vm0, %v6310_v26  ;;  %v5031_v39 = vsel %vm2697_vm10, 1.0, %v9363_v62  ;;  %vm2702_vm15 = vcmp.eq.s32.totalorder %v6327_v1, 2  ;;  %v6345_v1 = vld [vmem:[%s6432_s14 + $0x1e8] sm:$0xff] }
  0xb6   : > { %v7477_v25 = vpop.permute.xlu0 %5844  ;;  %6169 = vperm.xlu1 %5782, %v6168_v55   ;;  %5622 = vmatmul.mubr.msk.f32.gmra.mrb[80].mxu1 %vm599_vm0, %v6310_v26  ;;  %v6324_v55 = vld [vmem:[%s6432_s14 + $0x190] sm:$0xff]  ;;  %v6203_v48 = vpack.i.bf16 %v5032_v46, %v5031_v39  ;;  %v6329_v26 = vld [vmem:[%s6426_s11 + $0x1c0] sm:$0xff]  ;;  %v5044_v39 = vsel %vm2710_vm8, 1.0, %v9363_v62 }
  0xb7   : > { %6164 = vperm.xlu0 %5771, %v6163_v58   ;;  %5624 = vmatprep.mubr.msk.f32.mxu1 %vm599_vm0, %v6311_v34  ;;  %vm2703_vm12 = vcmp.eq.s32.totalorder %v6324_v55, 2  ;;  %v6325_v58 = vld [vmem:[%s6432_s14 + $0x198] sm:$0xff]  ;;  %v6342_v46 = vld [vmem:[%s6432_s14 + $0x1f0] sm:$0xff] }
  0xb8   : > { %5724 = vmatprep.mubr.msk.f32.mxu0 %vm599_vm0, %v6311_v34  ;;  %vm2704_vm13 = vcmp.eq.s32.totalorder %v6325_v58, 2  ;;  %v5037_v57 = vsel %vm2703_vm12, 1.0, %v9363_v62  ;;  %vm2715_vm9 = vcmp.eq.s32.totalorder %v6342_v46, 2  ;;  %v6343_v55 = vld [vmem:[%s6432_s14 + $0x1f8] sm:$0xff]  ;;  %vm2714_vm12 = vcmp.eq.s32.totalorder %v6345_v1, 2 }
  0xb9   : > { %v7493_v22 = vpop.permute.xlu1 %5859  ;;  %5725 = vmatmul.mubr.msk.f32.gmra.mrb[82].mxu0 %vm599_vm0, %v6316_v2  ;;  %v5038_v63 = vsel %vm2704_vm13, 1.0, %v9363_v62  ;;  %vm2716_vm10 = vcmp.eq.s32.totalorder %v6343_v55, 2  ;;  %v5048_v24 = vsel %vm2714_vm12, 1.0, %v9363_v62  ;;  %vm3937_vm13 = vcmask 125952  }
  0xba   : > { %9440 = vst [vmem:[#allocation2_spill] sm:$0xff] %v7493_v22  ;;  %v7497_v50 = vpop.permute.xlu0 %5854  ;;  %6179 = vperm.xlu1 %5782, %v6178_v30   ;;  %5625 = vmatmul.mubr.msk.f32.gmra.mrb[82].mxu1 %vm599_vm0, %v6316_v2  ;;  %v5035_v30 = vsel %vm2701_vm14, 1.0, %v9363_v62  ;;  %v6218_v19 = vpack.i.bf16 %v5038_v63, %v5037_v57  ;;  %v5041_v2 = vsel %vm2707_vm1, 1.0, %v9363_v62  ;;  %v5049_v63 = vsel %vm2715_vm9, 1.0, %v9363_v62 }
  0xbb   : > { %6174 = vperm.xlu0 %5771, %v6173_v9   ;;  %5627 = vmatprep.mubr.msk.f32.mxu1 %vm599_vm0, %v6317_v21  ;;  %v5036_v9 = vsel %vm2702_vm15, 1.0, %v9363_v62 }
  0xbc   : > { %5727 = vmatprep.mubr.msk.f32.mxu0 %vm599_vm0, %v6317_v21  ;;  %v6213_v53 = vpack.i.bf16 %v5036_v9, %v5035_v30  ;;  %v6336_v21 = vld [vmem:[%s6432_s14 + $0x1d0] sm:$0xff]  ;;  %v5047_v9 = vsel %vm2713_vm11, 1.0, %v9363_v62 }
  0xbd   : > { %v7513_v28 = vpop.permute.xlu1 %5869  ;;  %5728 = vmatmul.mubr.msk.f32.gmra.mrb[84].mxu0 %vm599_vm0, %v6322_v29  ;;  %vm2711_vm5 = vcmp.eq.s32.totalorder %v6336_v21, 2  ;;  %v6347_v30 = vld [vmem:[%s6426_s11 + $0x1f0] sm:$0xff] }
  0xbe   : > { %9441 = vst [vmem:[#allocation4_spill] sm:$0xff] %v7513_v28  ;;  %v7517_v18 = vpop.permute.xlu0 %5864  ;;  %6189 = vperm.xlu1 %5782, %v6188_v13   ;;  %5628 = vmatmul.mubr.msk.f32.gmra.mrb[84].mxu1 %vm599_vm0, %v6322_v29  ;;  %v5042_v13 = vsel %vm2708_vm2, 1.0, %v9363_v62 }
  0xbf   : > { %6184 = vperm.xlu0 %5771, %v6183_v5   ;;  %5630 = vmatprep.mubr.msk.f32.mxu1 %vm599_vm0, %v6323_v33  ;;  %v6335_v5 = vld [vmem:[%s6426_s11 + $0x1d0] sm:$0xff]  ;;  %v6228_v29 = vpack.i.bf16 %v5042_v13, %v5041_v2 }
  0xc0   : > { %5730 = vmatprep.mubr.msk.f32.mxu0 %vm599_vm0, %v6323_v33  ;;  %v5043_v33 = vsel %vm2709_vm7, 1.0, %v9363_v62 }
  0xc1   : > { %v7533_v40 = vpop.permute.xlu1 %5879  ;;  %5731 = vmatmul.mubr.msk.f32.gmra.mrb[86].mxu0 %vm599_vm0, %v6328_v3  ;;  %v6233_v57 = vpack.i.bf16 %v5044_v39, %v5043_v33 }
  0xc2   : > { %9442 = vst [vmem:[#allocation5_spill] sm:$0xff] %v7533_v40  ;;  %v7537_v59 = vpop.permute.xlu0 %5874  ;;  %6199 = vperm.xlu1 %5782, %v6198_v41   ;;  %5631 = vmatmul.mubr.msk.f32.gmra.mrb[86].mxu1 %vm599_vm0, %v6328_v3  ;;  %v6223_v41 = vpack.i.bf16 %v5040_v56, %v5039_v20 }
  0xc3   : > { %9443 = vst [vmem:[#allocation3_spill] sm:$0xff] %v7537_v59  ;;  %6194 = vperm.xlu0 %5771, %v6193_v42   ;;  %5633 = vmatprep.mubr.msk.f32.mxu1 %vm599_vm0, %v6329_v26  ;;  %v5045_v42 = vsel %vm2711_vm5, 1.0, %v9363_v62 }
  0xc4   : > { %5733 = vmatprep.mubr.msk.f32.mxu0 %vm599_vm0, %v6329_v26  ;;  %v5050_v26 = vsel %vm2716_vm10, 1.0, %v9363_v62 }
  0xc5   : > { %v7553_v34 = vpop.permute.xlu1 %5889  ;;  %5734 = vmatmul.mubr.msk.f32.gmra.mrb[88].mxu0 %vm599_vm0, %v6334_v36 }
  0xc6   : > { %9444 = vst [vmem:[#allocation6_spill] sm:$0xff] %v7553_v34  ;;  %v7557_v51 = vpop.permute.xlu0 %5884  ;;  %6209 = vperm.xlu1 %5782, %v6208_v4   ;;  %5634 = vmatmul.mubr.msk.f32.gmra.mrb[88].mxu1 %vm599_vm0, %v6334_v36  ;;  %v6346_v4 = vld [vmem:[%s6426_s11 + $0x1e8] sm:$0xff]  ;;  %v6248_v36 = vpack.i.bf16 %v5050_v26, %v5049_v63 }
  0xc7   : > { %9445 = vst [vmem:[#allocation7_spill] sm:$0xff] %v7557_v51  ;;  %6204 = vperm.xlu0 %5771, %v6203_v48   ;;  %5636 = vmatprep.mubr.msk.f32.mxu1 %vm599_vm0, %v6335_v5  ;;  %v6238_v48 = vpack.i.bf16 %v5046_v45, %v5045_v42 }
  0xc8   : > { %5736 = vmatprep.mubr.msk.f32.mxu0 %vm599_vm0, %v6335_v5 }
  0xc9   : > { %v7573_v16 = vpop.permute.xlu1 %5899  ;;  %5737 = vmatmul.mubr.msk.f32.gmra.mrb[90].mxu0 %vm599_vm0, %v6340_v12 }
  0xca   : > { %9446 = vst [vmem:[#allocation8_spill] sm:$0xff] %v7573_v16  ;;  %v7577_v14 = vpop.permute.xlu0 %5894  ;;  %6219 = vperm.xlu1 %5782, %v6218_v19   ;;  %5637 = vmatmul.mubr.msk.f32.gmra.mrb[90].mxu1 %vm599_vm0, %v6340_v12  ;;  %v6243_v19 = vpack.i.bf16 %v5048_v24, %v5047_v9 }
  0xcb   : > { %9447 = vst [vmem:[#allocation9_spill] sm:$0xff] %v7577_v14  ;;  %6214 = vperm.xlu0 %5771, %v6213_v53   ;;  %5639 = vmatprep.mubr.msk.f32.mxu1 %vm599_vm0, %v6341_v23 }
  0xcc   : > { %5739 = vmatprep.mubr.msk.f32.mxu0 %vm599_vm0, %v6341_v23 }
  0xcd   : > { %v7593_v58 = vpop.permute.xlu1 %5909  ;;  %5740 = vmatmul.mubr.msk.f32.gmra.mrb[92].mxu0 %vm599_vm0, %v6346_v4 }
  0xce   : > { %9448 = vst [vmem:[#allocation10_spill] sm:$0xff] %v7593_v58  ;;  %v7597_v3 = vpop.permute.xlu0 %5904  ;;  %6229 = vperm.xlu1 %5782, %v6228_v29   ;;  %5640 = vmatmul.mubr.msk.f32.gmra.mrb[92].mxu1 %vm599_vm0, %v6346_v4 }
  0xcf   : > { %9449 = vst [vmem:[#allocation11_spill] sm:$0xff] %v7597_v3  ;;  %6224 = vperm.xlu0 %5771, %v6223_v41   ;;  %5642 = vmatprep.mubr.msk.f32.mxu1 %vm599_vm0, %v6347_v30 }
  0xd0   : > { %5742 = vmatprep.mubr.msk.f32.mxu0 %vm599_vm0, %v6347_v30 }
  0xd1   : > { %v7611_v37 = vpop.permute.xlu1 %5919  ;;  %5743 = vmatmul.mubr.msk.f32.gmra.mrb[94].mxu0 %vm599_vm0, %v6348_v47 }
  0xd2   : > { %9450 = vst [vmem:[#allocation12_spill] sm:$0xff] %v7611_v37  ;;  %v7613_v44 = vpop.permute.xlu0 %5914  ;;  %6239 = vperm.xlu1 %5782, %v6238_v48   ;;  %5643 = vmatmul.mubr.msk.f32.gmra.mrb[94].mxu1 %vm599_vm0, %v6348_v47 }
  0xd3   : > { %9451 = vst [vmem:[#allocation13_spill] sm:$0xff] %v7613_v44  ;;  %6234 = vperm.xlu0 %5771, %v6233_v57  }
  0xd5   : > { %v7618_v53 = vpop.permute.xlu1 %5929 }
  0xd6   : > { %v7620_v2 = vpop.permute.xlu0 %5924  ;;  %6249 = vperm.xlu1 %5782, %v6248_v36  }
  0xd7   : > { %6244 = vperm.xlu0 %5771, %v6243_v19  }
  0xd9   : > { %v7622_v62 = vpop.permute.xlu1 %5939 }
  0xda   : > { %v7624_v13 = vpop.permute.xlu0 %5934 }
  0xdd   : > { %v7626_v5 = vpop.permute.xlu1 %5949 }
  0xde   : > { %v7628_v20 = vpop.permute.xlu0 %5944 }
  0xe1   : > { %v7630_v56 = vpop.permute.xlu1 %5959 }
  0xe2   : > { %v7632_v21 = vpop.permute.xlu0 %5954 }
  0xe5   : > { %v7634_v60 = vpop.permute.xlu1 %5969 }
  0xe6   : > { %9452 = vst [vmem:[#allocation14_spill] sm:$0xff] %v7634_v60  ;;  %v7636_v17 = vpop.permute.xlu0 %5964 }
  0xe8   : > { %v7640_v12 = vpop.f32.mrb[0].mxu0 }
  0xe9   : > { %v7638_v10 = vpop.permute.xlu1 %5979  ;;  %v7644_v41 = vpop.f32.mrb[0].mxu1 }
  0xea   : > { %9453 = vst [vmem:[#allocation15_spill] sm:$0xff] %v7638_v10  ;;  %v7642_v29 = vpop.permute.xlu0 %5974  ;;  %9455 = vst [vmem:[#allocation17_spill] sm:$0xff] %v7644_v41  ;;  %v7646_v42 = vpop.f32.mrb[1].mxu0 }
  0xeb   : > { %9454 = vst [vmem:[#allocation16_spill] sm:$0xff] %v7642_v29  ;;  %v7648_v45 = vpop.f32.mrb[1].mxu1 }
  0xec   : > { %9456 = vst [vmem:[#allocation18_spill] sm:$0xff] %v7648_v45  ;;  %v7652_v33 = vpop.f32.mrb[2].mxu0 }
  0xed   : > { %v7650_v23 = vpop.permute.xlu1 %5989  ;;  %v7656_v46 = vpop.f32.mrb[2].mxu1 }
  0xee   : > { %9457 = vst [vmem:[#allocation19_spill] sm:$0xff] %v7650_v23  ;;  %v7654_v39 = vpop.permute.xlu0 %5984  ;;  %9459 = vst [vmem:[#allocation21_spill] sm:$0xff] %v7656_v46  ;;  %v7658_v55 = vpop.f32.mrb[3].mxu0 }
  0xef   : > { %9458 = vst [vmem:[#allocation20_spill] sm:$0xff] %v7654_v39  ;;  %v7660_v49 = vpop.f32.mrb[3].mxu1 }
  0xf0   : > { %9460 = vst [vmem:[#allocation22_spill] sm:$0xff] %v7660_v49  ;;  %v7664_v4 = vpop.f32.mrb[4].mxu0 }
  0xf1   : > { %v7662_v1 = vpop.permute.xlu1 %5999  ;;  %v7668_v57 = vpop.f32.mrb[4].mxu1 }
  0xf2   : > { %9461 = vst [vmem:[#allocation23_spill] sm:$0xff] %v7662_v1  ;;  %v7666_v48 = vpop.permute.xlu0 %5994  ;;  %9463 = vst [vmem:[#allocation25_spill] sm:$0xff] %v7668_v57  ;;  %v7670_v63 = vpop.f32.mrb[5].mxu0 }
  0xf3   : > { %9462 = vst [vmem:[#allocation24_spill] sm:$0xff] %v7666_v48  ;;  %v7672_v26 = vpop.f32.mrb[5].mxu1 }
  0xf4   : > { %9464 = vst [vmem:[#allocation26_spill] sm:$0xff] %v7672_v26  ;;  %v7676_v9 = vpop.f32.mrb[6].mxu0 }
  0xf5   : > { %v7674_v30 = vpop.permute.xlu1 %6009  ;;  %v7680_v47 = vpop.f32.mrb[6].mxu1 }
  0xf6   : > { %9465 = vst [vmem:[#allocation27_spill] sm:$0xff] %v7674_v30  ;;  %v7678_v24 = vpop.permute.xlu0 %6004  ;;  %9467 = vst [vmem:[#allocation29_spill] sm:$0xff] %v7680_v47  ;;  %v7682_v36 = vpop.f32.mrb[7].mxu0 }
  0xf7   : > { %9466 = vst [vmem:[#allocation28_spill] sm:$0xff] %v7678_v24  ;;  %v7684_v19 = vpop.f32.mrb[7].mxu1 }
  0xf8   : > { %9468 = vst [vmem:[#allocation30_spill] sm:$0xff] %v7684_v19  ;;  %v7686_v49 = vpop.f32.mrb[8].mxu0 }
  0xf9   : > { %v7690_v57 = vpop.f32.mrb[8].mxu1  ;;  %v7692_v45 = vpop.f32.mrb[9].mxu0 }
  0xfa   : > { %v7688_v46 = vpop.permute.xlu0 %6014  ;;  %9470 = vst [vmem:[#allocation32_spill] sm:$0xff] %v7690_v57  ;;  %v7694_v26 = vpop.f32.mrb[9].mxu1 }
  0xfb   : > { %9469 = vst [vmem:[#allocation31_spill] sm:$0xff] %v7688_v46  ;;  %9471 = vst [vmem:[#allocation33_spill] sm:$0xff] %v7694_v26  ;;  %v7696_v41 = vpop.permute.xlu1 %6019 }
  0xfc   : > { %9472 = vst [vmem:[#allocation34_spill] sm:$0xff] %v7696_v41  ;;  %v7698_v30 = vpop.f32.mrb[10].mxu0 }
  0xfd   : > { %v7702_v47 = vpop.f32.mrb[10].mxu1  ;;  %v7704_v1 = vpop.f32.mrb[11].mxu0 }
  0xfe   : > { %v7700_v24 = vpop.permute.xlu0 %6024  ;;  %9474 = vst [vmem:[#allocation36_spill] sm:$0xff] %v7702_v47  ;;  %v7706_v19 = vpop.f32.mrb[11].mxu1 }
  0xff   : > { %9473 = vst [vmem:[#allocation35_spill] sm:$0xff] %v7700_v24  ;;  %9475 = vst [vmem:[#allocation37_spill] sm:$0xff] %v7706_v19  ;;  %v7710_v46 = vpop.permute.xlu1 %6029 }
 0x100   : > { %v7708_v48 = vpop.f32.mrb[12].mxu0  ;;  %9476 = vst [vmem:[#allocation38_spill] sm:$0xff] %v7710_v46 }
 0x101   : > { %v7712_v57 = vpop.f32.mrb[12].mxu1  ;;  %v7714_v23 = vpop.f32.mrb[13].mxu0 }
 0x102   : > { %9477 = vst [vmem:[#allocation39_spill] sm:$0xff] %v7712_v57  ;;  %v7716_v26 = vpop.f32.mrb[13].mxu1  ;;  %v7718_v41 = vpop.permute.xlu0 %6034 }
 0x103   : > { %9478 = vst [vmem:[#allocation40_spill] sm:$0xff] %v7716_v26  ;;  %9479 = vst [vmem:[#allocation41_spill] sm:$0xff] %v7718_v41  ;;  %v7728_v19 = vpop.permute.xlu1 %6039 }
 0x104   : > { %v7720_v39 = vpop.f32.mrb[14].mxu0  ;;  %9484 = vst [vmem:[#allocation46_spill] sm:$0xff] %v7728_v19 }
 0x105   : > { %9480 = vst [vmem:[#allocation42_spill] sm:$0xff] %v7720_v39  ;;  %v7722_v24 = vpop.f32.mrb[14].mxu1  ;;  %v7724_v47 = vpop.f32.mrb[15].mxu0 }
 0x106   : > { %9481 = vst [vmem:[#allocation43_spill] sm:$0xff] %v7722_v24  ;;  %9482 = vst [vmem:[#allocation44_spill] sm:$0xff] %v7724_v47  ;;  %v7726_v10 = vpop.f32.mrb[15].mxu1  ;;  %v7732_v46 = vpop.permute.xlu0 %6044 }
 0x107   : > { %9483 = vst [vmem:[#allocation45_spill] sm:$0xff] %v7726_v10  ;;  %9486 = vst [vmem:[#allocation48_spill] sm:$0xff] %v7732_v46  ;;  %v7742_v39 = vpop.permute.xlu1 %6049 }
 0x108   : > { %v7730_v29 = vpop.f32.mrb[16].mxu0  ;;  %9491 = vst [vmem:[#allocation53_spill] sm:$0xff] %v7742_v39 }
 0x109   : > { %9485 = vst [vmem:[#allocation47_spill] sm:$0xff] %v7730_v29  ;;  %v7734_v57 = vpop.f32.mrb[16].mxu1  ;;  %v7736_v60 = vpop.f32.mrb[17].mxu0 }
 0x10a   : > { %9487 = vst [vmem:[#allocation49_spill] sm:$0xff] %v7734_v57  ;;  %9488 = vst [vmem:[#allocation50_spill] sm:$0xff] %v7736_v60  ;;  %v7738_v26 = vpop.f32.mrb[17].mxu1  ;;  %v7750_v19 = vpop.permute.xlu0 %6054 }
 0x10b   : > { %9489 = vst [vmem:[#allocation51_spill] sm:$0xff] %v7738_v26  ;;  %9495 = vst [vmem:[#allocation57_spill] sm:$0xff] %v7750_v19  ;;  %v7760_v26 = vpop.permute.xlu1 %6059 }
 0x10c   : > { %v7740_v41 = vpop.f32.mrb[18].mxu0  ;;  %9500 = vst [vmem:[#allocation62_spill] sm:$0xff] %v7760_v26 }
 0x10d   : > { %9490 = vst [vmem:[#allocation52_spill] sm:$0xff] %v7740_v41  ;;  %v7744_v24 = vpop.f32.mrb[18].mxu1  ;;  %v7746_v47 = vpop.f32.mrb[19].mxu0 }
 0x10e   : > { %9492 = vst [vmem:[#allocation54_spill] sm:$0xff] %v7744_v24  ;;  %9493 = vst [vmem:[#allocation55_spill] sm:$0xff] %v7746_v47  ;;  %v7748_v10 = vpop.f32.mrb[19].mxu1  ;;  %v7764_v39 = vpop.permute.xlu0 %6064 }
 0x10f   : > { %9494 = vst [vmem:[#allocation56_spill] sm:$0xff] %v7748_v10  ;;  %9502 = vst [vmem:[#allocation64_spill] sm:$0xff] %v7764_v39 }
 0x110   : > { %v7752_v29 = vpop.f32.mrb[20].mxu0 }
 0x111   : > { %9496 = vst [vmem:[#allocation58_spill] sm:$0xff] %v7752_v29  ;;  %v7754_v46 = vpop.f32.mrb[20].mxu1  ;;  %v7756_v57 = vpop.f32.mrb[21].mxu0 }
 0x112   : > { %9497 = vst [vmem:[#allocation59_spill] sm:$0xff] %v7754_v46  ;;  %9498 = vst [vmem:[#allocation60_spill] sm:$0xff] %v7756_v57  ;;  %v7758_v60 = vpop.f32.mrb[21].mxu1  ;;  %v7774_v29 = vpop.permute.xlu1 %6069 }
 0x113   : > { %9499 = vst [vmem:[#allocation61_spill] sm:$0xff] %v7758_v60  ;;  %9507 = vst [vmem:[#allocation69_spill] sm:$0xff] %v7774_v29  ;;  %v5937_v29 = vunpack.i.h.bf16 %v7624_v13 }
 0x114   : > { %v7762_v41 = vpop.f32.mrb[22].mxu0 }
 0x115   : > { %9501 = vst [vmem:[#allocation63_spill] sm:$0xff] %v7762_v41  ;;  %v7766_v24 = vpop.f32.mrb[22].mxu1  ;;  %v7768_v47 = vpop.f32.mrb[23].mxu0 }
 0x116   : > { %9503 = vst [vmem:[#allocation65_spill] sm:$0xff] %v7766_v24  ;;  %9504 = vst [vmem:[#allocation66_spill] sm:$0xff] %v7768_v47  ;;  %v7770_v10 = vpop.f32.mrb[23].mxu1  ;;  %v7788_v47 = vpop.permute.xlu0 %6074 }
 0x117   : > { %9505 = vst [vmem:[#allocation67_spill] sm:$0xff] %v7770_v10  ;;  %9511 = vst [vmem:[#allocation73_spill] sm:$0xff] %v7788_v47  ;;  %v7812_v24 = vpop.permute.xlu1 %6079 }
 0x118   : > { %v7772_v19 = vpop.f32.mrb[24].mxu0  ;;  %9516 = vst [vmem:[#allocation78_spill] sm:$0xff] %v7812_v24 }
 0x119   : > { %9506 = vst [vmem:[#allocation68_spill] sm:$0xff] %v7772_v19  ;;  %v7776_v46 = vpop.f32.mrb[24].mxu1  ;;  %v7780_v57 = vpop.f32.mrb[25].mxu0 }
 0x11a   : > { %9508 = vst [vmem:[#allocation70_spill] sm:$0xff] %v7776_v46  ;;  %9509 = vst [vmem:[#allocation71_spill] sm:$0xff] %v7780_v57  ;;  %v7782_v41 = vpop.f32.mrb[25].mxu1 }
 0x11b   : > { %9510 = vst [vmem:[#allocation72_spill] sm:$0xff] %v7782_v41  ;;  %v7852_v22 = vpop.permute.xlu1 %6089 }
 0x11c   : > { %v7794_v57 = vpop.f32.mrb[26].mxu0  ;;  %9521 = vst [vmem:[#allocation83_spill] sm:$0xff] %v7852_v22 }
 0x11d   : > { %9512 = vst [vmem:[#allocation74_spill] sm:$0xff] %v7794_v57  ;;  %v7800_v41 = vpop.f32.mrb[26].mxu1  ;;  %v7806_v47 = vpop.f32.mrb[27].mxu0 }
 0x11e   : > { %9513 = vst [vmem:[#allocation75_spill] sm:$0xff] %v7800_v41  ;;  %9514 = vst [vmem:[#allocation76_spill] sm:$0xff] %v7806_v47  ;;  %v7808_v57 = vpop.f32.mrb[27].mxu1  ;;  %v9524_v41 = vunpack.i.h.bf16 %v7337_v27 }
 0x11f   : > { %9515 = vst [vmem:[#allocation77_spill] sm:$0xff] %v7808_v57  ;;  %v7822_v57 = vpop.permute.xlu0 %6084  ;;  %v6100_v44 = vpop.permute.xlu1 %6099 }
 0x120   : > { %v7820_v47 = vpop.f32.mrb[28].mxu0  ;;  %9518 = vst [vmem:[#allocation80_spill] sm:$0xff] %v7822_v57  ;;  %v1498_v58 = vmul.f32 %v9524_v41, %v7640_v12 }
 0x121   : > { %9517 = vst [vmem:[#allocation79_spill] sm:$0xff] %v7820_v47  ;;  %v7826_v24 = vpop.f32.mrb[28].mxu1  ;;  %v7834_v47 = vpop.f32.mrb[29].mxu0 }
 0x122   : > { %9519 = vst [vmem:[#allocation81_spill] sm:$0xff] %v7826_v24  ;;  %v7836_v57 = vpop.f32.mrb[29].mxu1 }
 0x123   : > { %9520 = vst [vmem:[#allocation82_spill] sm:$0xff] %v7836_v57  ;;  %v6095_v22 = vpop.permute.xlu0 %6094 }
 0x124   : > { %v7846_v24 = vpop.f32.mrb[30].mxu0  ;;  %v6097_v3 = vunpack.i.h.bf16 %v6095_v22  ;;  %v6096_v51 = vunpack.i.l.bf16 %v6095_v22 }
 0x125   : > { %v7854_v19 = vpop.f32.mrb[30].mxu1  ;;  %v7860_v40 = vpop.f32.mrb[31].mxu0 }
 0x126   : > { %9522 = vst [vmem:[#allocation84_spill] sm:$0xff] %v7854_v19  ;;  %v7862_v57 = vpop.f32.mrb[31].mxu1  ;;  %v5936_v19 = vunpack.i.l.bf16 %v7624_v13 }
 0x127   : > { %9523 = vst [vmem:[#allocation85_spill] sm:$0xff] %v7862_v57  ;;  %v9525_v57 = vunpack.i.l.bf16 %v7337_v27  ;;  %v6105_v13 = vpop.permute.xlu0 %6104 }
 0x128   : > { %v5651_v16 = vpop.f32.mrb[32].mxu0 }
 0x129   : > { %v5551_v39 = vpop.f32.mrb[32].mxu1  ;;  %v2914_v34 = vpop.f32.mrb[33].mxu0  ;;  %v1497_v10 = vmul.f32 %v9525_v57, %v7646_v42  ;;  %v3554_v12 = vmul.f32 %v6097_v3, %v5651_v16  ;;  %v5941_v42 = vunpack.i.l.bf16 %v7622_v62  ;;  %v9527_v3 = vunpack.i.l.bf16 %v7357_v15 }
 0x12a   : > { %v2526_v26 = vmul.f32 %v5937_v29, %v5551_v39  ;;  %v1886_v14 = vpop.f32.mrb[33].mxu1  ;;  %v5942_v29 = vunpack.i.h.bf16 %v7622_v62  ;;  %v3553_v28 = vmul.f32 %v6096_v51, %v2914_v34 }
 0x12b   : > { %v2525_v37 = vmul.f32 %v5936_v19, %v1886_v14  ;;  %v9526_v14 = vunpack.i.h.bf16 %v7357_v15  ;;  %v1499_v46 = vmul.f32 %v9527_v3, %v7658_v55  ;;  %v5947_v15 = vunpack.i.h.bf16 %v7628_v20 }
 0x12c   : > { %v2590_v59 = vadd.f32 %v2526_v26, %v1498_v58  ;;  %v5654_v41 = vpop.f32.mrb[34].mxu0  ;;  %v6102_v58 = vunpack.i.h.bf16 %v6100_v44 }
 0x12d   : > { %v2589_v60 = vadd.f32 %v2525_v37, %v1497_v10  ;;  %v5554_v27 = vpop.f32.mrb[34].mxu1  ;;  %v1500_v22 = vmul.f32 %v9526_v14, %v7652_v33  ;;  %v2924_v16 = vpop.f32.mrb[35].mxu0  ;;  %v6101_v37 = vunpack.i.l.bf16 %v6100_v44  ;;  %v9528_v44 = vunpack.i.h.bf16 %v7333_v61 }
 0x12e   : > { %v3618_v57 = vadd.f32 %v3554_v12, %v2590_v59  ;;  %v2528_v19 = vmul.f32 %v5942_v29, %v5554_v27  ;;  %v1896_v26 = vpop.f32.mrb[35].mxu1  ;;  %v3556_v10 = vmul.f32 %v6102_v58, %v5654_v41  ;;  %v6107_v14 = vunpack.i.h.bf16 %v6105_v13  ;;  %v6110_v58 = vpop.permute.xlu1 %6109 }
 0x12f   : > { %v3617_v34 = vadd.f32 %v3553_v28, %v2589_v60  ;;  %v2527_v51 = vmul.f32 %v5941_v42, %v1896_v26  ;;  %v3555_v29 = vmul.f32 %v6101_v37, %v2924_v16  ;;  %v5946_v28 = vunpack.i.l.bf16 %v7628_v20 }
 0x130   : > { %v5184_v59 = vpack.c.bf16 %v3618_v57, %v3618_v57  ;;  %v2592_v62 = vadd.f32 %v2528_v19, %v1500_v22  ;;  %4324 = vrot.lane.b32.xlu1 %v3618_v57, %s6359_s20  ;;  %v5657_v33 = vpop.f32.mrb[36].mxu0  ;;  %v1502_v60 = vmul.f32 %v9528_v44, %v7664_v4  ;;  %v6106_v16 = vunpack.i.l.bf16 %v6105_v13 }
 0x131   : > { %v5183_v55 = vpack.c.bf16 %v3617_v34, %v3617_v34  ;;  %v2591_v12 = vadd.f32 %v2527_v51, %v1499_v46  ;;  %v5557_v27 = vpop.f32.mrb[36].mxu1  ;;  %4322 = vrot.lane.b32.xlu0 %v3617_v34, %s6359_s20  ;;  %v2934_v57 = vpop.f32.mrb[37].mxu0  ;;  %v9529_v46 = vunpack.i.l.bf16 %v7333_v61  ;;  %v3558_v34 = vmul.f32 %v6107_v14, %v5657_v33 }
 0x132   : > { %3939 = vst.msk [vmem:[%s7900_s19 + $0x4] sm:$0xf] %vm3937_vm13, %v5184_v59  ;;  %v3620_v41 = vadd.f32 %v3556_v10, %v2592_v62  ;;  %v2530_v42 = vmul.f32 %v5947_v15, %v5557_v27  ;;  %v1906_v22 = vpop.f32.mrb[37].mxu1  ;;  %v5952_v51 = vunpack.i.h.bf16 %v7626_v5  ;;  %v5951_v15 = vunpack.i.l.bf16 %v7626_v5 }
 0x133   : > { %v1501_v19 = vmul.f32 %v9529_v46, %v7670_v63  ;;  %3938 = vst.msk [vmem:[%s7900_s19] sm:$0xf] %vm3937_vm13, %v5183_v55  ;;  %v3619_v26 = vadd.f32 %v3555_v29, %v2591_v12  ;;  %v2529_v20 = vmul.f32 %v5946_v28, %v1906_v22  ;;  %v3557_v63 = vmul.f32 %v6106_v16, %v2934_v57 }
 0x134   : > { %v5186_v3 = vpack.c.bf16 %v3620_v41, %v3620_v41  ;;  %v2594_v4 = vadd.f32 %v2530_v42, %v1502_v60  ;;  %4004 = vrot.lane.b32.xlu1 %v5184_v59, %s6360_s21  ;;  %v5660_v37 = vpop.f32.mrb[38].mxu0  ;;  %v9530_v13 = vunpack.i.h.bf16 %v7353_v32  ;;  %v6112_v29 = vunpack.i.h.bf16 %v6110_v58  ;;  %v6115_v42 = vpop.permute.xlu0 %6114 }
 0x135   : > { %v5185_v62 = vpack.c.bf16 %v3619_v26, %v3619_v26  ;;  %v2593_v61 = vadd.f32 %v2529_v20, %v1501_v19  ;;  %v5560_v10 = vpop.f32.mrb[38].mxu1  ;;  %4002 = vrot.lane.b32.xlu0 %v5183_v55, %s6360_s21  ;;  %v2944_v28 = vpop.f32.mrb[39].mxu0  ;;  %v9531_v44 = vunpack.i.l.bf16 %v7353_v32  ;;  %v6111_v14 = vunpack.i.l.bf16 %v6110_v58 }
 0x136   : > { %v1504_v12 = vmul.f32 %v9530_v13, %v7676_v9  ;;  %3941 = vst.msk [vmem:[%s7900_s19 + $0xc] sm:$0xf] %vm3937_vm13, %v5186_v3  ;;  %v7925_v33 = vadd.f32 %v3558_v34, %v2594_v4  ;;  %v2532_v59 = vmul.f32 %v5952_v51, %v5560_v10  ;;  %v1916_v27 = vpop.f32.mrb[39].mxu1  ;;  %v3560_v57 = vmul.f32 %v6112_v29, %v5660_v37 }
 0x137   : > { %v1503_v60 = vmul.f32 %v9531_v44, %v7682_v36  ;;  %3940 = vst.msk [vmem:[%s7900_s19 + $0x8] sm:$0xf] %vm3937_vm13, %v5185_v62  ;;  %v3621_v5 = vadd.f32 %v3557_v63, %v2593_v61  ;;  %v2531_v55 = vmul.f32 %v5951_v15, %v1916_v27  ;;  %v5957_v46 = vunpack.i.h.bf16 %v7632_v21 }
 0x138   : > { %v7934_v9 = vpack.c.bf16 %v7925_v33, %v7925_v33  ;;  %v2596_v22 = vadd.f32 %v2532_v59, %v1504_v12  ;;  %4328 = vrot.lane.b32.xlu1 %v3620_v41, %s6359_s20  ;;  %v5663_v19 = vpop.f32.mrb[40].mxu0  ;;  %v3559_v20 = vmul.f32 %v6111_v14, %v2944_v28  ;;  %v5956_v58 = vunpack.i.l.bf16 %v7632_v21 }
 0x139   : > { %v7938_v32 = vpack.c.bf16 %v3621_v5, %v3621_v5  ;;  %v2595_v36 = vadd.f32 %v2531_v55, %v1503_v60  ;;  %v5563_v16 = vpop.f32.mrb[40].mxu1  ;;  %4326 = vrot.lane.b32.xlu0 %v3619_v26, %s6359_s20  ;;  %v9532_v4 = vunpack.i.h.bf16 %v7377_v54  ;;  %v6117_v37 = vunpack.i.h.bf16 %v6115_v42  ;;  %v2954_v63 = vpop.f32.mrb[41].mxu0 }
 0x13a   : > { %3943 = vst.msk [vmem:[%s7900_s19 + $0x14] sm:$0xf] %vm3937_vm13, %v7934_v9  ;;  %v7948_v41 = vadd.f32 %v3560_v57, %v2596_v22  ;;  %v2534_v51 = vmul.f32 %v5957_v46, %v5563_v16  ;;  %v1926_v61 = vpop.f32.mrb[41].mxu1  ;;  %v9533_v10 = vunpack.i.l.bf16 %v7377_v54  ;;  %v6120_v26 = vpop.permute.xlu1 %6119  ;;  %v6116_v13 = vunpack.i.l.bf16 %v6115_v42 }
 0x13b   : > { %v1506_v34 = vmul.f32 %v9532_v4, %v7686_v49  ;;  %3942 = vst.msk [vmem:[%s7900_s19 + $0x10] sm:$0xf] %vm3937_vm13, %v7938_v32  ;;  %v7956_v21 = vadd.f32 %v3559_v20, %v2595_v36  ;;  %v2533_v49 = vmul.f32 %v5956_v58, %v1926_v61  ;;  %v3562_v29 = vmul.f32 %v6117_v37, %v5663_v19 }
 0x13c   : > { %v1505_v15 = vmul.f32 %v9533_v10, %v7692_v45  ;;  %v7960_v12 = vpack.c.bf16 %v7948_v41, %v7948_v41  ;;  %4008 = vrot.lane.b32.xlu1 %v5186_v3, %s6360_s21  ;;  %v5962_v54 = vunpack.i.h.bf16 %v7630_v56  ;;  %v5666_v45 = vpop.f32.mrb[42].mxu0  ;;  %v3561_v44 = vmul.f32 %v6116_v13, %v2954_v63 }
 0x13d   : > { %v2598_v59 = vadd.f32 %v2534_v51, %v1506_v34  ;;  %v7966_v27 = vpack.c.bf16 %v7956_v21, %v7956_v21  ;;  %v5566_v60 = vpop.f32.mrb[42].mxu1  ;;  %4006 = vrot.lane.b32.xlu0 %v5185_v62, %s6360_s21  ;;  %v5961_v42 = vunpack.i.l.bf16 %v7630_v56  ;;  %v9534_v55 = vunpack.i.h.bf16 %v7373_v43  ;;  %v2964_v19 = vpop.f32.mrb[43].mxu0 }
 0x13e   : > { %v2597_v28 = vadd.f32 %v2533_v49, %v1505_v15  ;;  %3945 = vst.msk [vmem:[%s7900_s19 + $0x1c] sm:$0xf] %vm3937_vm13, %v7960_v12  ;;  %v2536_v22 = vmul.f32 %v5962_v54, %v5566_v60  ;;  %v6122_v57 = vunpack.i.h.bf16 %v6120_v26  ;;  %v1936_v46 = vpop.f32.mrb[43].mxu1  ;;  %v9535_v36 = vunpack.i.l.bf16 %v7373_v43  ;;  %v6125_v62 = vpop.permute.xlu0 %6124 }
 0x13f   : > { %v1508_v14 = vmul.f32 %v9534_v55, %v7698_v30  ;;  %v7976_v3 = vadd.f32 %v3562_v29, %v2598_v59  ;;  %3944 = vst.msk [vmem:[%s7900_s19 + $0x18] sm:$0xf] %vm3937_vm13, %v7966_v27  ;;  %v2535_v30 = vmul.f32 %v5961_v42, %v1936_v46  ;;  %v6121_v16 = vunpack.i.l.bf16 %v6120_v26 }
 0x140   : > { %v1507_v20 = vmul.f32 %v9535_v36, %v7704_v1  ;;  %v7984_v56 = vadd.f32 %v3561_v44, %v2597_v28  ;;  %v3564_v34 = vmul.f32 %v6122_v57, %v5666_v45  ;;  %4332 = vrot.lane.b32.xlu1 %v7925_v33, %s6359_s20  ;;  %v5967_v43 = vunpack.i.h.bf16 %v7636_v17  ;;  %v5669_v1 = vpop.f32.mrb[44].mxu0  ;;  %v9539_v36 = vld [vmem:[#allocation42_spill] sm:$0xff] }
 0x141   : > { %v7988_v58 = vpack.c.bf16 %v7976_v3, %v7976_v3  ;;  %v2600_v4 = vadd.f32 %v2536_v22, %v1508_v14  ;;  %v3563_v61 = vmul.f32 %v6121_v16, %v2964_v19  ;;  %v5569_v63 = vpop.f32.mrb[44].mxu1  ;;  %4330 = vrot.lane.b32.xlu0 %v3621_v5, %s6359_s20  ;;  %v5966_v10 = vunpack.i.l.bf16 %v7636_v17  ;;  %v2974_v29 = vpop.f32.mrb[45].mxu0 }
 0x142   : > { %v7995_v51 = vpack.c.bf16 %v7984_v56, %v7984_v56  ;;  %v2599_v37 = vadd.f32 %v2535_v30, %v1507_v20  ;;  %v9536_v15 = vunpack.i.h.bf16 %v7397_v8  ;;  %v2538_v49 = vmul.f32 %v5967_v43, %v5569_v63  ;;  %v1946_v59 = vpop.f32.mrb[45].mxu1  ;;  %v6130_v5 = vpop.permute.xlu1 %6129  ;;  %v9541_v43 = vld [vmem:[#allocation44_spill] sm:$0xff] }
 0x143   : > { %3947 = vst.msk [vmem:[%s7900_s19 + $0x24] sm:$0xf] %vm3937_vm13, %v7988_v58  ;;  %v8005_v33 = vadd.f32 %v3564_v34, %v2600_v4  ;;  %v6127_v13 = vunpack.i.h.bf16 %v6125_v62  ;;  %v9537_v54 = vunpack.i.l.bf16 %v7397_v8  ;;  %v6126_v28 = vunpack.i.l.bf16 %v6125_v62  ;;  %v9538_v8 = vld [vmem:[#allocation14_spill] sm:$0xff] }
 0x144   : > { %v1510_v26 = vmul.f32 %v9536_v15, %v7708_v48  ;;  %3946 = vst.msk [vmem:[%s7900_s19 + $0x20] sm:$0xf] %vm3937_vm13, %v7995_v51  ;;  %v8013_v17 = vadd.f32 %v3563_v61, %v2599_v37  ;;  %v2537_v48 = vmul.f32 %v5966_v10, %v1946_v59  ;;  %4012 = vrot.lane.b32.xlu1 %v7934_v9, %s6360_s21  ;;  %v5672_v55 = vpop.f32.mrb[46].mxu0  ;;  %v5971_v19 = vunpack.i.l.bf16 %v9538_v8 }
 0x145   : > { %v1509_v45 = vmul.f32 %v9537_v54, %v7714_v23  ;;  %v8017_v44 = vpack.c.bf16 %v8005_v33, %v8005_v33  ;;  %v3566_v42 = vmul.f32 %v6127_v13, %v5669_v1  ;;  %v5972_v23 = vunpack.i.h.bf16 %v9538_v8  ;;  %v5572_v46 = vpop.f32.mrb[46].mxu1  ;;  %4010 = vrot.lane.b32.xlu0 %v7938_v32, %s6360_s21  ;;  %v2984_v34 = vpop.f32.mrb[47].mxu0 }
 0x146   : > { %v2602_v60 = vadd.f32 %v2538_v49, %v1510_v26  ;;  %v8024_v14 = vpack.c.bf16 %v8013_v17, %v8013_v17  ;;  %v3565_v57 = vmul.f32 %v6126_v28, %v2974_v29  ;;  %v9540_v20 = vunpack.i.h.bf16 %v7393_v6  ;;  %v1956_v4 = vpop.f32.mrb[47].mxu1  ;;  %v6135_v32 = vpop.permute.xlu0 %6134  ;;  %v9544_v28 = vld [vmem:[#allocation47_spill] sm:$0xff] }
 0x147   : > { %v2601_v22 = vadd.f32 %v2537_v48, %v1509_v45  ;;  %3949 = vst.msk [vmem:[%s7900_s19 + $0x2c] sm:$0xf] %vm3937_vm13, %v8017_v44  ;;  %v2540_v30 = vmul.f32 %v5972_v23, %v5572_v46  ;;  %v6132_v16 = vunpack.i.h.bf16 %v6130_v5  ;;  %v9542_v1 = vunpack.i.l.bf16 %v7393_v6  ;;  %v9543_v6 = vld [vmem:[#allocation16_spill] sm:$0xff] }
 0x148   : > { %v1512_v9 = vmul.f32 %v9540_v20, %v9539_v36  ;;  %v8035_v62 = vadd.f32 %v3566_v42, %v2602_v60  ;;  %3948 = vst.msk [vmem:[%s7900_s19 + $0x28] sm:$0xf] %vm3937_vm13, %v8024_v14  ;;  %v2539_v63 = vmul.f32 %v5971_v19, %v1956_v4  ;;  %v6131_v10 = vunpack.i.l.bf16 %v6130_v5  ;;  %4336 = vrot.lane.b32.xlu1 %v7948_v41, %s6359_s20  ;;  %v5675_v59 = vpop.f32.mrb[48].mxu0 }
 0x149   : > { %v1511_v37 = vmul.f32 %v9542_v1, %v9541_v43  ;;  %v8043_v61 = vadd.f32 %v3565_v57, %v2601_v22  ;;  %v3568_v49 = vmul.f32 %v6132_v16, %v5672_v55  ;;  %v5977_v13 = vunpack.i.h.bf16 %v9543_v6  ;;  %v5575_v5 = vpop.f32.mrb[48].mxu1  ;;  %4334 = vrot.lane.b32.xlu0 %v7956_v21, %s6359_s20  ;;  %v2994_v22 = vpop.f32.mrb[49].mxu0  ;;  %v9546_v57 = vld [vmem:[#allocation50_spill] sm:$0xff] }
 0x14a   : > { %v8047_v15 = vpack.c.bf16 %v8035_v62, %v8035_v62  ;;  %v2604_v26 = vadd.f32 %v2540_v30, %v1512_v9  ;;  %v3567_v45 = vmul.f32 %v6131_v10, %v2984_v34  ;;  %v5976_v48 = vunpack.i.l.bf16 %v9543_v6  ;;  %v1966_v55 = vpop.f32.mrb[49].mxu1  ;;  %v6140_v21 = vpop.permute.xlu1 %6139 }
 0x14b   : > { %v8054_v29 = vpack.c.bf16 %v8043_v61, %v8043_v61  ;;  %v2603_v54 = vadd.f32 %v2539_v63, %v1511_v37  ;;  %v9545_v60 = vunpack.i.h.bf16 %v7417_v0  ;;  %v2542_v8 = vmul.f32 %v5977_v13, %v5575_v5  ;;  %v9551_v5 = vld [vmem:[#allocation55_spill] sm:$0xff] }
 0x14c   : > { %3951 = vst.msk [vmem:[%s7900_s19 + $0x34] sm:$0xf] %vm3937_vm13, %v8047_v15  ;;  %v8065_v42 = vadd.f32 %v3568_v49, %v2604_v26  ;;  %v6137_v23 = vunpack.i.h.bf16 %v6135_v32  ;;  %v9547_v46 = vunpack.i.l.bf16 %v7417_v0  ;;  %v2541_v20 = vmul.f32 %v5976_v48, %v1966_v55  ;;  %4016 = vrot.lane.b32.xlu1 %v7960_v12, %s6360_s21  ;;  %v9548_v0 = vld [vmem:[#allocation15_spill] sm:$0xff]  ;;  %v5678_v43 = vpop.f32.mrb[50].mxu0  ;;  %v9549_v26 = vld [vmem:[#allocation52_spill] sm:$0xff] }
 0x14d   : > { %v1514_v41 = vmul.f32 %v9545_v60, %v9544_v28  ;;  %3950 = vst.msk [vmem:[%s7900_s19 + $0x30] sm:$0xf] %vm3937_vm13, %v8054_v29  ;;  %v8073_v36 = vadd.f32 %v3567_v45, %v2603_v54  ;;  %v6136_v9 = vunpack.i.l.bf16 %v6135_v32  ;;  %v5982_v34 = vunpack.i.h.bf16 %v9548_v0  ;;  %v5578_v32 = vpop.f32.mrb[50].mxu1  ;;  %4014 = vrot.lane.b32.xlu0 %v7966_v27, %s6360_s21  ;;  %v3004_v45 = vpop.f32.mrb[51].mxu0 }
 0x14e   : > { %v1513_v19 = vmul.f32 %v9547_v46, %v9546_v57  ;;  %v8077_v30 = vpack.c.bf16 %v8065_v42, %v8065_v42  ;;  %v3570_v4 = vmul.f32 %v6137_v23, %v5675_v59  ;;  %v5981_v10 = vunpack.i.l.bf16 %v9548_v0  ;;  %v1976_v54 = vpop.f32.mrb[51].mxu1  ;;  %v6145_v27 = vpop.permute.xlu0 %6144 }
 0x14f   : > { %v2606_v16 = vadd.f32 %v2542_v8, %v1514_v41  ;;  %v8084_v1 = vpack.c.bf16 %v8073_v36, %v8073_v36  ;;  %v3569_v63 = vmul.f32 %v6136_v9, %v2994_v22  ;;  %v9550_v49 = vunpack.i.h.bf16 %v7413_v52 }
 0x150   : > { %v2605_v37 = vadd.f32 %v2541_v20, %v1513_v19  ;;  %3953 = vst.msk [vmem:[%s7900_s19 + $0x3c] sm:$0xf] %vm3937_vm13, %v8077_v30  ;;  %v2544_v13 = vmul.f32 %v5982_v34, %v5578_v32  ;;  %v6142_v59 = vunpack.i.h.bf16 %v6140_v21  ;;  %v9552_v48 = vunpack.i.l.bf16 %v7413_v52  ;;  %4340 = vrot.lane.b32.xlu1 %v7976_v3, %s6359_s20  ;;  %v9553_v52 = vld [vmem:[#allocation20_spill] sm:$0xff]  ;;  %v5681_v46 = vpop.f32.mrb[52].mxu0 }
 0x151   : > { %v1516_v12 = vmul.f32 %v9550_v49, %v9549_v26  ;;  %v8095_v6 = vadd.f32 %v3570_v4, %v2606_v16  ;;  %3952 = vst.msk [vmem:[%s7900_s19 + $0x38] sm:$0xf] %vm3937_vm13, %v8084_v1  ;;  %v2543_v41 = vmul.f32 %v5981_v10, %v1976_v54  ;;  %v6141_v8 = vunpack.i.l.bf16 %v6140_v21  ;;  %v5581_v21 = vpop.f32.mrb[52].mxu1  ;;  %4338 = vrot.lane.b32.xlu0 %v7984_v56, %s6359_s20  ;;  %v9554_v4 = vld [vmem:[#allocation58_spill] sm:$0xff]  ;;  %v3014_v32 = vpop.f32.mrb[53].mxu0  ;;  %v9556_v10 = vld [vmem:[#allocation60_spill] sm:$0xff] }
 0x152   : > { %v1515_v28 = vmul.f32 %v9552_v48, %v9551_v5  ;;  %v8103_v60 = vadd.f32 %v3569_v63, %v2605_v37  ;;  %v3572_v22 = vmul.f32 %v6142_v59, %v5678_v43  ;;  %v5987_v57 = vunpack.i.h.bf16 %v9553_v52  ;;  %v1986_v63 = vpop.f32.mrb[53].mxu1  ;;  %v6150_v56 = vpop.permute.xlu1 %6149 }
 0x153   : > { %v8107_v23 = vpack.c.bf16 %v8095_v6, %v8095_v6  ;;  %v2608_v55 = vadd.f32 %v2544_v13, %v1516_v12  ;;  %v3571_v9 = vmul.f32 %v6141_v8, %v3004_v45  ;;  %v5986_v16 = vunpack.i.l.bf16 %v9553_v52  ;;  %v9559_v52 = vld [vmem:[#allocation63_spill] sm:$0xff] }
 0x154   : > { %v8114_v19 = vpack.c.bf16 %v8103_v60, %v8103_v60  ;;  %v2607_v20 = vadd.f32 %v2543_v41, %v1515_v28  ;;  %v9555_v0 = vunpack.i.h.bf16 %v7437_v31  ;;  %v2546_v43 = vmul.f32 %v5987_v57, %v5581_v21  ;;  %4020 = vrot.lane.b32.xlu1 %v7988_v58, %s6360_s21  ;;  %v5684_v28 = vpop.f32.mrb[54].mxu0 }
 0x155   : > { %3955 = vst.msk [vmem:[%s7900_s19 + $0x44] sm:$0xf] %vm3937_vm13, %v8107_v23  ;;  %v8125_v34 = vadd.f32 %v3572_v22, %v2608_v55  ;;  %v6147_v37 = vunpack.i.h.bf16 %v6145_v27  ;;  %v9557_v26 = vunpack.i.l.bf16 %v7437_v31  ;;  %v2545_v13 = vmul.f32 %v5986_v16, %v1986_v63  ;;  %v9558_v31 = vld [vmem:[#allocation19_spill] sm:$0xff]  ;;  %4018 = vrot.lane.b32.xlu0 %v7995_v51, %s6360_s21  ;;  %v3024_v16 = vpop.f32.mrb[55].mxu0  ;;  %v6155_v51 = vpop.permute.xlu0 %6154 }
 0x156   : > { %v1518_v3 = vmul.f32 %v9555_v0, %v9554_v4  ;;  %3954 = vst.msk [vmem:[%s7900_s19 + $0x40] sm:$0xf] %vm3937_vm13, %v8114_v19  ;;  %v8133_v12 = vadd.f32 %v3571_v9, %v2607_v20  ;;  %v6146_v59 = vunpack.i.l.bf16 %v6145_v27  ;;  %v5992_v48 = vunpack.i.h.bf16 %v9558_v31  ;;  %v5584_v27 = vpop.f32.mrb[54].mxu1  ;;  %v9561_v4 = vld [vmem:[#allocation66_spill] sm:$0xff] }
 0x157   : > { %v1517_v49 = vmul.f32 %v9557_v26, %v9556_v10  ;;  %v8137_v54 = vpack.c.bf16 %v8125_v34, %v8125_v34  ;;  %v3574_v5 = vmul.f32 %v6147_v37, %v5681_v46  ;;  %v5991_v22 = vunpack.i.l.bf16 %v9558_v31  ;;  %v1996_v21 = vpop.f32.mrb[55].mxu1 }
 0x158   : > { %v2610_v45 = vadd.f32 %v2546_v43, %v1518_v3  ;;  %v8144_v41 = vpack.c.bf16 %v8133_v12, %v8133_v12  ;;  %v3573_v55 = vmul.f32 %v6146_v59, %v3014_v32  ;;  %v9560_v57 = vunpack.i.h.bf16 %v7433_v35  ;;  %4344 = vrot.lane.b32.xlu1 %v8005_v33, %s6359_s20 }
 0x159   : > { %v2609_v8 = vadd.f32 %v2545_v13, %v1517_v49  ;;  %3957 = vst.msk [vmem:[%s7900_s19 + $0x4c] sm:$0xf] %vm3937_vm13, %v8137_v54  ;;  %v2548_v20 = vmul.f32 %v5992_v48, %v5584_v27  ;;  %v6152_v9 = vunpack.i.h.bf16 %v6150_v56  ;;  %v9562_v0 = vunpack.i.l.bf16 %v7433_v35  ;;  %v9563_v35 = vld [vmem:[#allocation24_spill] sm:$0xff]  ;;  %v5687_v13 = vpop.f32.mrb[56].mxu0  ;;  %4342 = vrot.lane.b32.xlu0 %v8013_v17, %s6359_s20  ;;  %v6160_v17 = vpop.permute.xlu1 %6159 }
 0x15a   : > { %v1520_v58 = vmul.f32 %v9560_v57, %v9559_v52  ;;  %v8155_v46 = vadd.f32 %v3574_v5, %v2610_v45  ;;  %3956 = vst.msk [vmem:[%s7900_s19 + $0x48] sm:$0xf] %vm3937_vm13, %v8144_v41  ;;  %v2547_v37 = vmul.f32 %v5991_v22, %v1996_v21  ;;  %v6151_v63 = vunpack.i.l.bf16 %v6150_v56  ;;  %v5587_v56 = vpop.f32.mrb[56].mxu1  ;;  %v3034_v48 = vpop.f32.mrb[57].mxu0  ;;  %v9566_v57 = vld [vmem:[#allocation71_spill] sm:$0xff] }
 0x15b   : > { %v1519_v3 = vmul.f32 %v9562_v0, %v9561_v4  ;;  %v8163_v43 = vadd.f32 %v3573_v55, %v2609_v8  ;;  %v3576_v26 = vmul.f32 %v6152_v9, %v5684_v28  ;;  %v5997_v49 = vunpack.i.h.bf16 %v9563_v35  ;;  %v9564_v28 = vld [vmem:[#allocation68_spill] sm:$0xff]  ;;  %v2006_v52 = vpop.f32.mrb[57].mxu1 }
 0x15c   : > { %v8167_v32 = vpack.c.bf16 %v8155_v46, %v8155_v46  ;;  %v2612_v10 = vadd.f32 %v2548_v20, %v1520_v58  ;;  %v3575_v5 = vmul.f32 %v6151_v63, %v3024_v16  ;;  %v5996_v31 = vunpack.i.l.bf16 %v9563_v35  ;;  %4024 = vrot.lane.b32.xlu1 %v8017_v44, %s6360_s21  ;;  %v5690_v63 = vpop.f32.mrb[58].mxu0 }
 0x15d   : > { %v8174_v59 = vpack.c.bf16 %v8163_v43, %v8163_v43  ;;  %v2611_v45 = vadd.f32 %v2547_v37, %v1519_v3  ;;  %v9565_v33 = vunpack.i.h.bf16 %v7457_v38  ;;  %v2550_v27 = vmul.f32 %v5997_v49, %v5587_v56  ;;  %4022 = vrot.lane.b32.xlu0 %v8024_v14, %s6360_s21  ;;  %v6165_v14 = vpop.permute.xlu0 %6164 }
 0x15e   : > { %3959 = vst.msk [vmem:[%s7900_s19 + $0x54] sm:$0xf] %vm3937_vm13, %v8167_v32  ;;  %v8185_v55 = vadd.f32 %v3576_v26, %v2612_v10  ;;  %v6157_v22 = vunpack.i.h.bf16 %v6155_v51  ;;  %v9567_v58 = vunpack.i.l.bf16 %v7457_v38  ;;  %v2549_v21 = vmul.f32 %v5996_v31, %v2006_v52  ;;  %v9568_v38 = vld [vmem:[#allocation23_spill] sm:$0xff] }
 0x15f   : > { %v1522_v8 = vmul.f32 %v9565_v33, %v9564_v28  ;;  %3958 = vst.msk [vmem:[%s7900_s19 + $0x50] sm:$0xf] %vm3937_vm13, %v8174_v59  ;;  %v8193_v9 = vadd.f32 %v3575_v5, %v2611_v45  ;;  %v6156_v16 = vunpack.i.l.bf16 %v6155_v51  ;;  %v6002_v37 = vunpack.i.h.bf16 %v9568_v38  ;;  %v5590_v51 = vpop.f32.mrb[58].mxu1  ;;  %v9569_v45 = vld [vmem:[#allocation74_spill] sm:$0xff] }
 0x160   : > { %v1521_v20 = vmul.f32 %v9567_v58, %v9566_v57  ;;  %v8197_v4 = vpack.c.bf16 %v8185_v55, %v8185_v55  ;;  %v3578_v3 = vmul.f32 %v6157_v22, %v5687_v13  ;;  %v6001_v49 = vunpack.i.l.bf16 %v9568_v38  ;;  %v3044_v13 = vpop.f32.mrb[59].mxu0  ;;  %v2016_v33 = vpop.f32.mrb[59].mxu1  ;;  %4348 = vrot.lane.b32.xlu1 %v8035_v62, %s6359_s20 }
 0x161   : > { %v2614_v0 = vadd.f32 %v2550_v27, %v1522_v8  ;;  %v8204_v10 = vpack.c.bf16 %v8193_v9, %v8193_v9  ;;  %v3577_v35 = vmul.f32 %v6156_v16, %v3034_v48  ;;  %v9570_v44 = vunpack.i.h.bf16 %v7453_v11  ;;  %v9571_v48 = vld [vmem:[#allocation76_spill] sm:$0xff]  ;;  %4346 = vrot.lane.b32.xlu0 %v8043_v61, %s6359_s20  ;;  %v6170_v61 = vpop.permute.xlu1 %6169 }
 0x162   : > { %v2613_v26 = vadd.f32 %v2549_v21, %v1521_v20  ;;  %3961 = vst.msk [vmem:[%s7900_s19 + $0x5c] sm:$0xf] %vm3937_vm13, %v8197_v4  ;;  %v2552_v31 = vmul.f32 %v6002_v37, %v5590_v51  ;;  %v6162_v28 = vunpack.i.h.bf16 %v6160_v17  ;;  %v9572_v8 = vunpack.i.l.bf16 %v7453_v11  ;;  %v9573_v11 = vld [vmem:[#allocation28_spill] sm:$0xff] }
 0x163   : > { %v1524_v5 = vmul.f32 %v9570_v44, %v9569_v45  ;;  %v8215_v56 = vadd.f32 %v3578_v3, %v2614_v0  ;;  %3960 = vst.msk [vmem:[%s7900_s19 + $0x58] sm:$0xf] %vm3937_vm13, %v8204_v10  ;;  %v2551_v52 = vmul.f32 %v6001_v49, %v2016_v33  ;;  %v6161_v57 = vunpack.i.l.bf16 %v6160_v17  ;;  %v5693_v0 = vpop.f32.mrb[60].mxu0  ;;  %v5593_v17 = vpop.f32.mrb[60].mxu1 }
 0x164   : > { %v1523_v27 = vmul.f32 %v9572_v8, %v9571_v48  ;;  %v8223_v22 = vadd.f32 %v3577_v35, %v2613_v26  ;;  %v3580_v21 = vmul.f32 %v6162_v28, %v5690_v63  ;;  %v6007_v16 = vunpack.i.h.bf16 %v9573_v11  ;;  %v3054_v63 = vpop.f32.mrb[61].mxu0  ;;  %v9574_v35 = vld [vmem:[#allocation79_spill] sm:$0xff]  ;;  %4028 = vrot.lane.b32.xlu1 %v8047_v15, %s6360_s21 }
 0x165   : > { %v8227_v58 = vpack.c.bf16 %v8215_v56, %v8215_v56  ;;  %v2616_v20 = vadd.f32 %v2552_v31, %v1524_v5  ;;  %v3579_v37 = vmul.f32 %v6161_v57, %v3044_v13  ;;  %v6006_v26 = vunpack.i.l.bf16 %v9573_v11  ;;  %v2026_v5 = vpop.f32.mrb[61].mxu1  ;;  %v5696_v57 = vpop.f32.mrb[62].mxu0  ;;  %4026 = vrot.lane.b32.xlu0 %v8054_v29, %s6360_s21 }
 0x166   : > { %v8234_v3 = vpack.c.bf16 %v8223_v22, %v8223_v22  ;;  %v2615_v38 = vadd.f32 %v2551_v52, %v1523_v27  ;;  %v9575_v62 = vunpack.i.h.bf16 %v7477_v25  ;;  %v2554_v45 = vmul.f32 %v6007_v16, %v5593_v17  ;;  %v6175_v29 = vpop.permute.xlu0 %6174 }
 0x167   : > { %3963 = vst.msk [vmem:[%s7900_s19 + $0x64] sm:$0xf] %vm3937_vm13, %v8227_v58  ;;  %v8245_v49 = vadd.f32 %v3580_v21, %v2616_v20  ;;  %v6167_v44 = vunpack.i.h.bf16 %v6165_v14  ;;  %v9576_v13 = vunpack.i.l.bf16 %v7477_v25  ;;  %v2553_v33 = vmul.f32 %v6006_v26, %v2026_v5  ;;  %v9577_v25 = vld [vmem:[#allocation27_spill] sm:$0xff] }
 0x168   : > { %v1526_v51 = vmul.f32 %v9575_v62, %v9574_v35  ;;  %3962 = vst.msk [vmem:[%s7900_s19 + $0x60] sm:$0xf] %vm3937_vm13, %v8234_v3  ;;  %v8253_v28 = vadd.f32 %v3579_v37, %v2615_v38  ;;  %v6166_v48 = vunpack.i.l.bf16 %v6165_v14  ;;  %v5596_v14 = vpop.f32.mrb[62].mxu1  ;;  %v6011_v16 = vunpack.i.l.bf16 %v9577_v25  ;;  %4352 = vrot.lane.b32.xlu1 %v8065_v42, %s6359_s20 }
 0x169   : > { %v1525_v31 = vmul.f32 %v9576_v13, %v7834_v47  ;;  %v8257_v8 = vpack.c.bf16 %v8245_v49, %v8245_v49  ;;  %v3582_v52 = vmul.f32 %v6167_v44, %v5693_v0  ;;  %v6012_v47 = vunpack.i.h.bf16 %v9577_v25  ;;  %v3064_v0 = vpop.f32.mrb[63].mxu0  ;;  %v2036_v35 = vpop.f32.mrb[63].mxu1  ;;  %4350 = vrot.lane.b32.xlu0 %v8073_v36, %s6359_s20 }
 0x16a   : > { %v2618_v27 = vadd.f32 %v2554_v45, %v1526_v51  ;;  %v8264_v20 = vpack.c.bf16 %v8253_v28, %v8253_v28  ;;  %v3581_v11 = vmul.f32 %v6166_v48, %v3054_v63  ;;  %v9578_v15 = vunpack.i.h.bf16 %v7473_v7  ;;  %v6180_v36 = vpop.permute.xlu1 %6179 }
 0x16b   : > { %v2617_v21 = vadd.f32 %v2553_v33, %v1525_v31  ;;  %3965 = vst.msk [vmem:[%s7900_s19 + $0x6c] sm:$0xf] %vm3937_vm13, %v8257_v8  ;;  %v2556_v17 = vmul.f32 %v6012_v47, %v5596_v14  ;;  %v6172_v26 = vunpack.i.h.bf16 %v6170_v61  ;;  %v9579_v63 = vunpack.i.l.bf16 %v7473_v7  ;;  %v9580_v7 = vld [vmem:[#allocation31_spill] sm:$0xff]  ;;  %v5699_v31 = vpop.f32.mrb[64].mxu0  ;;  %v9581_v47 = vld [vmem:[#allocation17_spill] sm:$0xff] }
 0x16c   : > { %v1528_v38 = vmul.f32 %v9578_v15, %v7846_v24  ;;  %v8275_v37 = vadd.f32 %v3582_v52, %v2618_v27  ;;  %3964 = vst.msk [vmem:[%s7900_s19 + $0x68] sm:$0xf] %vm3937_vm13, %v8264_v20  ;;  %v2555_v45 = vmul.f32 %v6011_v16, %v2036_v35  ;;  %v6171_v24 = vunpack.i.l.bf16 %v6170_v61  ;;  %v5599_v61 = vpop.f32.mrb[64].mxu1  ;;  %v3074_v25 = vpop.f32.mrb[65].mxu0  ;;  %4032 = vrot.lane.b32.xlu1 %v8077_v30, %s6360_s21 }
 0x16d   : > { %v1527_v62 = vmul.f32 %v9579_v63, %v7860_v40  ;;  %v8283_v51 = vadd.f32 %v3581_v11, %v2617_v21  ;;  %v3584_v13 = vmul.f32 %v6172_v26, %v5696_v57  ;;  %v6017_v40 = vunpack.i.h.bf16 %v9580_v7  ;;  %v2046_v16 = vpop.f32.mrb[65].mxu1  ;;  %4030 = vrot.lane.b32.xlu0 %v8084_v1, %s6360_s21  ;;  %v6185_v1 = vpop.permute.xlu0 %6184 }
 0x16e   : > { %v8287_v44 = vpack.c.bf16 %v8275_v37, %v8275_v37  ;;  %v2620_v5 = vadd.f32 %v2556_v17, %v1528_v38  ;;  %v3583_v27 = vmul.f32 %v6171_v24, %v3064_v0  ;;  %v6016_v52 = vunpack.i.l.bf16 %v9580_v7  ;;  %v9583_v0 = vld [vmem:[#allocation18_spill] sm:$0xff] }
 0x16f   : > { %v8294_v33 = vpack.c.bf16 %v8283_v51, %v8283_v51  ;;  %v2619_v48 = vadd.f32 %v2555_v45, %v1527_v62  ;;  %v9582_v42 = vunpack.i.h.bf16 %v7497_v50  ;;  %v2558_v11 = vmul.f32 %v6017_v40, %v5599_v61  ;;  %v9587_v61 = vld [vmem:[#allocation2_spill] sm:$0xff] }
 0x170   : > { %3967 = vst.msk [vmem:[%s7900_s19 + $0x74] sm:$0xf] %vm3937_vm13, %v8287_v44  ;;  %v8305_v21 = vadd.f32 %v3584_v13, %v2620_v5  ;;  %v6177_v14 = vunpack.i.h.bf16 %v6175_v29  ;;  %v9584_v15 = vunpack.i.l.bf16 %v7497_v50  ;;  %v2557_v26 = vmul.f32 %v6016_v52, %v2046_v16  ;;  %v9585_v50 = vld [vmem:[#allocation34_spill] sm:$0xff]  ;;  %v5702_v5 = vpop.f32.mrb[66].mxu0  ;;  %4356 = vrot.lane.b32.xlu1 %v8095_v6, %s6359_s20 }
 0x171   : > { %v1530_v57 = vmul.f32 %v9582_v42, %v9581_v47  ;;  %3966 = vst.msk [vmem:[%s7900_s19 + $0x70] sm:$0xf] %vm3937_vm13, %v8294_v33  ;;  %v8313_v17 = vadd.f32 %v3583_v27, %v2619_v48  ;;  %v6176_v35 = vunpack.i.l.bf16 %v6175_v29  ;;  %v6022_v24 = vunpack.i.h.bf16 %v9585_v50  ;;  %v5602_v29 = vpop.f32.mrb[66].mxu1  ;;  %v9586_v27 = vld [vmem:[#allocation21_spill] sm:$0xff]  ;;  %4354 = vrot.lane.b32.xlu0 %v8103_v60, %s6359_s20  ;;  %v6190_v60 = vpop.permute.xlu1 %6189 }
 0x172   : > { %v1529_v38 = vmul.f32 %v9584_v15, %v9583_v0  ;;  %v8317_v63 = vpack.c.bf16 %v8305_v21, %v8305_v21  ;;  %v3586_v45 = vmul.f32 %v6177_v14, %v5699_v31  ;;  %v6021_v48 = vunpack.i.l.bf16 %v9585_v50  ;;  %v3084_v31 = vpop.f32.mrb[67].mxu0 }
 0x173   : > { %v2622_v62 = vadd.f32 %v2558_v11, %v1530_v57  ;;  %v8324_v13 = vpack.c.bf16 %v8313_v17, %v8313_v17  ;;  %v3585_v40 = vmul.f32 %v6176_v35, %v3074_v25  ;;  %v9588_v30 = vunpack.i.h.bf16 %v9587_v61  ;;  %v2056_v11 = vpop.f32.mrb[67].mxu1  ;;  %v9589_v25 = vld [vmem:[#allocation22_spill] sm:$0xff] }
 0x174   : > { %v2621_v7 = vadd.f32 %v2557_v26, %v1529_v38  ;;  %3969 = vst.msk [vmem:[%s7900_s19 + $0x7c] sm:$0xf] %vm3937_vm13, %v8317_v63  ;;  %v2560_v42 = vmul.f32 %v6022_v24, %v5602_v29  ;;  %v6182_v57 = vunpack.i.h.bf16 %v6180_v36  ;;  %v9590_v14 = vunpack.i.l.bf16 %v9587_v61  ;;  %v5705_v24 = vpop.f32.mrb[68].mxu0  ;;  %4036 = vrot.lane.b32.xlu1 %v8107_v23, %s6360_s21 }
 0x175   : > { %v1532_v52 = vmul.f32 %v9588_v30, %v9586_v27  ;;  %v8335_v47 = vadd.f32 %v3586_v45, %v2622_v62  ;;  %3968 = vst.msk [vmem:[%s7900_s19 + $0x78] sm:$0xf] %vm3937_vm13, %v8324_v13  ;;  %v2559_v15 = vmul.f32 %v6021_v48, %v2056_v11  ;;  %v6181_v38 = vunpack.i.l.bf16 %v6180_v36  ;;  %v9591_v45 = vld [vmem:[#allocation35_spill] sm:$0xff]  ;;  %v5605_v36 = vpop.f32.mrb[68].mxu1  ;;  %v9592_v27 = vld [vmem:[#allocation25_spill] sm:$0xff]  ;;  %4034 = vrot.lane.b32.xlu0 %v8114_v19, %s6360_s21  ;;  %v6195_v19 = vpop.permute.xlu0 %6194 }
 0x176   : > { %v1531_v16 = vmul.f32 %v9590_v14, %v9589_v25  ;;  %v8343_v0 = vadd.f32 %v3585_v40, %v2621_v7  ;;  %v3588_v62 = vmul.f32 %v6182_v57, %v5702_v5  ;;  %v6027_v50 = vunpack.i.h.bf16 %v9591_v45  ;;  %v3094_v5 = vpop.f32.mrb[69].mxu0  ;;  %v2066_v57 = vpop.f32.mrb[69].mxu1 }
 0x177   : > { %v8347_v26 = vpack.c.bf16 %v8335_v47, %v8335_v47  ;;  %v2624_v35 = vadd.f32 %v2560_v42, %v1532_v52  ;;  %v3587_v29 = vmul.f32 %v6181_v38, %v3084_v31  ;;  %v6026_v48 = vunpack.i.l.bf16 %v9591_v45  ;;  %v9594_v31 = vld [vmem:[#allocation26_spill] sm:$0xff] }
 0x178   : > { %v8354_v7 = vpack.c.bf16 %v8343_v0, %v8343_v0  ;;  %v2623_v40 = vadd.f32 %v2559_v15, %v1531_v16  ;;  %v9593_v6 = vunpack.i.h.bf16 %v7517_v18  ;;  %v2562_v52 = vmul.f32 %v6027_v50, %v5605_v36  ;;  %v5708_v50 = vpop.f32.mrb[70].mxu0  ;;  %4360 = vrot.lane.b32.xlu1 %v8125_v34, %s6359_s20 }
 0x179   : > { %3971 = vst.msk [vmem:[%s7900_s19 + $0x84] sm:$0xf] %vm3937_vm13, %v8347_v26  ;;  %v8365_v30 = vadd.f32 %v3588_v62, %v2624_v35  ;;  %v6187_v42 = vunpack.i.h.bf16 %v6185_v1  ;;  %v9595_v11 = vunpack.i.l.bf16 %v7517_v18  ;;  %v2561_v16 = vmul.f32 %v6026_v48, %v2066_v57  ;;  %v9596_v18 = vld [vmem:[#allocation38_spill] sm:$0xff]  ;;  %4358 = vrot.lane.b32.xlu0 %v8133_v12, %s6359_s20  ;;  %v6200_v12 = vpop.permute.xlu1 %6199 }
 0x17a   : > { %v1534_v61 = vmul.f32 %v9593_v6, %v9592_v27  ;;  %3970 = vst.msk [vmem:[%s7900_s19 + $0x80] sm:$0xf] %vm3937_vm13, %v8354_v7  ;;  %v8373_v14 = vadd.f32 %v3587_v29, %v2623_v40  ;;  %v6186_v15 = vunpack.i.l.bf16 %v6185_v1  ;;  %v6032_v45 = vunpack.i.h.bf16 %v9596_v18  ;;  %v5608_v1 = vpop.f32.mrb[70].mxu1  ;;  %v9597_v27 = vld [vmem:[#allocation29_spill] sm:$0xff]  ;;  %v9598_v6 = vld [vmem:[#allocation4_spill] sm:$0xff] }
 0x17b   : > { %v1533_v25 = vmul.f32 %v9595_v11, %v9594_v31  ;;  %v8377_v38 = vpack.c.bf16 %v8365_v30, %v8365_v30  ;;  %v3590_v62 = vmul.f32 %v6187_v42, %v5705_v24  ;;  %v6031_v48 = vunpack.i.l.bf16 %v9596_v18  ;;  %v3104_v24 = vpop.f32.mrb[71].mxu0  ;;  %v2076_v31 = vpop.f32.mrb[71].mxu1 }
 0x17c   : > { %v2626_v35 = vadd.f32 %v2562_v52, %v1534_v61  ;;  %v8384_v40 = vpack.c.bf16 %v8373_v14, %v8373_v14  ;;  %v3589_v36 = vmul.f32 %v6186_v15, %v3094_v5  ;;  %v9599_v23 = vunpack.i.h.bf16 %v9598_v6  ;;  %v9600_v5 = vld [vmem:[#allocation30_spill] sm:$0xff]  ;;  %4040 = vrot.lane.b32.xlu1 %v8137_v54, %s6360_s21 }
 0x17d   : > { %v2625_v29 = vadd.f32 %v2561_v16, %v1533_v25  ;;  %3973 = vst.msk [vmem:[%s7900_s19 + $0x8c] sm:$0xf] %vm3937_vm13, %v8377_v38  ;;  %v2564_v42 = vmul.f32 %v6032_v45, %v5608_v1  ;;  %v6192_v57 = vunpack.i.h.bf16 %v6190_v60  ;;  %v9601_v11 = vunpack.i.l.bf16 %v9598_v6  ;;  %v9602_v1 = vld [vmem:[#allocation41_spill] sm:$0xff]  ;;  %v5711_v6 = vpop.f32.mrb[72].mxu0  ;;  %4038 = vrot.lane.b32.xlu0 %v8144_v41, %s6360_s21  ;;  %v6205_v41 = vpop.permute.xlu0 %6204 }
 0x17e   : > { %v1536_v61 = vmul.f32 %v9599_v23, %v9597_v27  ;;  %v8395_v52 = vadd.f32 %v3590_v62, %v2626_v35  ;;  %3972 = vst.msk [vmem:[%s7900_s19 + $0x88] sm:$0xf] %vm3937_vm13, %v8384_v40  ;;  %v2563_v15 = vmul.f32 %v6031_v48, %v2076_v31  ;;  %v6191_v18 = vunpack.i.l.bf16 %v6190_v60  ;;  %v5611_v60 = vpop.f32.mrb[72].mxu1 }
 0x17f   : > { %v1535_v25 = vmul.f32 %v9601_v11, %v9600_v5  ;;  %v8403_v16 = vadd.f32 %v3589_v36, %v2625_v29  ;;  %v3592_v45 = vmul.f32 %v6192_v57, %v5708_v50  ;;  %v6037_v27 = vunpack.i.h.bf16 %v9602_v1  ;;  %v3114_v50 = vpop.f32.mrb[73].mxu0 }
 0x180   : > { %v8407_v35 = vpack.c.bf16 %v8395_v52, %v8395_v52  ;;  %v2628_v62 = vadd.f32 %v2564_v42, %v1536_v61  ;;  %v3591_v48 = vmul.f32 %v6191_v18, %v3104_v24  ;;  %v6036_v23 = vunpack.i.l.bf16 %v9602_v1  ;;  %v9603_v61 = vld [vmem:[#allocation32_spill] sm:$0xff]  ;;  %v9604_v42 = vld [vmem:[#allocation3_spill] sm:$0xff]  ;;  %v9607_v24 = vld [vmem:[#allocation33_spill] sm:$0xff]  ;;  %4364 = vrot.lane.b32.xlu1 %v8155_v46, %s6359_s20 }
 0x181   : > { %v8414_v29 = vpack.c.bf16 %v8403_v16, %v8403_v16  ;;  %v2627_v36 = vadd.f32 %v2563_v15, %v1535_v25  ;;  %v9605_v34 = vunpack.i.h.bf16 %v9604_v42  ;;  %v2566_v5 = vmul.f32 %v6037_v27, %v5611_v60  ;;  %v2086_v25 = vpop.f32.mrb[73].mxu1  ;;  %v9610_v60 = vld [vmem:[#allocation46_spill] sm:$0xff]  ;;  %4362 = vrot.lane.b32.xlu0 %v8163_v43, %s6359_s20  ;;  %v6210_v43 = vpop.permute.xlu1 %6209 }
 0x182   : > { %3975 = vst.msk [vmem:[%s7900_s19 + $0x94] sm:$0xf] %vm3937_vm13, %v8407_v35  ;;  %v8425_v31 = vadd.f32 %v3592_v45, %v2628_v62  ;;  %v6197_v11 = vunpack.i.h.bf16 %v6195_v19  ;;  %v9608_v15 = vunpack.i.l.bf16 %v9604_v42  ;;  %v2565_v39 = vmul.f32 %v6036_v23, %v2086_v25 }
 0x183   : > { %v1538_v57 = vmul.f32 %v9605_v34, %v9603_v61  ;;  %3974 = vst.msk [vmem:[%s7900_s19 + $0x90] sm:$0xf] %vm3937_vm13, %v8414_v29  ;;  %v8433_v1 = vadd.f32 %v3591_v48, %v2627_v36  ;;  %v6196_v61 = vunpack.i.l.bf16 %v6195_v19  ;;  %v6042_v42 = vunpack.i.h.bf16 %v9610_v60  ;;  %v5714_v34 = vpop.f32.mrb[74].mxu0  ;;  %v5614_v19 = vpop.f32.mrb[74].mxu1 }
 0x184   : > { %9606 = vst [vmem:[#allocation14_spill] sm:$0xff] %v8425_v31  ;;  %v1537_v18 = vmul.f32 %v9608_v15, %v9607_v24  ;;  %v8437_v62 = vpack.c.bf16 %v8425_v31, %v8425_v31  ;;  %v3594_v27 = vmul.f32 %v6197_v11, %v5711_v6  ;;  %v3124_v6 = vpop.f32.mrb[75].mxu0  ;;  %v9612_v11 = vld [vmem:[#allocation5_spill] sm:$0xff]  ;;  %4044 = vrot.lane.b32.xlu1 %v8167_v32, %s6360_s21 }
 0x185   : > { %9609 = vst [vmem:[#allocation42_spill] sm:$0xff] %v8433_v1  ;;  %v2630_v45 = vadd.f32 %v2566_v5, %v1538_v57  ;;  %v8444_v36 = vpack.c.bf16 %v8433_v1, %v8433_v1  ;;  %v3593_v23 = vmul.f32 %v6196_v61, %v3114_v50  ;;  %v6041_v57 = vunpack.i.l.bf16 %v9610_v60  ;;  %v9611_v5 = vld [vmem:[#allocation36_spill] sm:$0xff]  ;;  %v9615_v50 = vld [vmem:[#allocation37_spill] sm:$0xff]  ;;  %4042 = vrot.lane.b32.xlu0 %v8174_v59, %s6360_s21  ;;  %v6215_v59 = vpop.permute.xlu0 %6214 }
 0x186   : > { %v2629_v48 = vadd.f32 %v2565_v39, %v1537_v18  ;;  %v9613_v54 = vunpack.i.h.bf16 %v9612_v11  ;;  %3977 = vst.msk [vmem:[%s7900_s19 + $0x9c] sm:$0xf] %vm3937_vm13, %v8437_v62  ;;  %v2568_v15 = vmul.f32 %v6042_v42, %v5614_v19  ;;  %v6202_v1 = vunpack.i.h.bf16 %v6200_v12  ;;  %v2096_v39 = vpop.f32.mrb[75].mxu1  ;;  %v9618_v19 = vld [vmem:[#allocation48_spill] sm:$0xff] }
 0x187   : > { %v8455_v24 = vadd.f32 %v3594_v27, %v2630_v45  ;;  %v9616_v18 = vunpack.i.l.bf16 %v9612_v11  ;;  %3976 = vst.msk [vmem:[%s7900_s19 + $0x98] sm:$0xf] %vm3937_vm13, %v8444_v36  ;;  %v2567_v31 = vmul.f32 %v6041_v57, %v2096_v39  ;;  %v6047_v11 = vunpack.i.h.bf16 %v9618_v19 }
 0x188   : > { %v1540_v25 = vmul.f32 %v9613_v54, %v9611_v5  ;;  %v8463_v60 = vadd.f32 %v3593_v23, %v2629_v48  ;;  %v6201_v5 = vunpack.i.l.bf16 %v6200_v12  ;;  %v3596_v42 = vmul.f32 %v6202_v1, %v5714_v34  ;;  %v5717_v54 = vpop.f32.mrb[76].mxu0  ;;  %v5617_v12 = vpop.f32.mrb[76].mxu1  ;;  %v9619_v34 = vld [vmem:[#allocation39_spill] sm:$0xff]  ;;  %4368 = vrot.lane.b32.xlu1 %v8185_v55, %s6359_s20 }
 0x189   : > { %9614 = vst [vmem:[#allocation44_spill] sm:$0xff] %v8455_v24  ;;  %v1539_v61 = vmul.f32 %v9616_v18, %v9615_v50  ;;  %v8467_v45 = vpack.c.bf16 %v8455_v24, %v8455_v24  ;;  %v3134_v1 = vpop.f32.mrb[77].mxu0  ;;  %v2570_v18 = vmul.f32 %v6047_v11, %v5617_v12  ;;  %v9626_v12 = vld [vmem:[#allocation53_spill] sm:$0xff]  ;;  %4366 = vrot.lane.b32.xlu0 %v8193_v9, %s6359_s20  ;;  %v6220_v9 = vpop.permute.xlu1 %6219 }
 0x18a   : > { %9617 = vst [vmem:[#allocation16_spill] sm:$0xff] %v8463_v60  ;;  %v2632_v27 = vadd.f32 %v2568_v15, %v1540_v25  ;;  %v8474_v48 = vpack.c.bf16 %v8463_v60, %v8463_v60  ;;  %v3595_v57 = vmul.f32 %v6201_v5, %v3124_v6  ;;  %v6046_v25 = vunpack.i.l.bf16 %v9618_v19  ;;  %v9620_v15 = vld [vmem:[#allocation7_spill] sm:$0xff]  ;;  %v9623_v6 = vld [vmem:[#allocation40_spill] sm:$0xff] }
 0x18b   : > { %v2631_v23 = vadd.f32 %v2567_v31, %v1539_v61  ;;  %v9621_v46 = vunpack.i.h.bf16 %v9620_v15  ;;  %3979 = vst.msk [vmem:[%s7900_s19 + $0xa4] sm:$0xf] %vm3937_vm13, %v8467_v45  ;;  %v6207_v60 = vunpack.i.h.bf16 %v6205_v41  ;;  %v2106_v31 = vpop.f32.mrb[77].mxu1  ;;  %v9624_v61 = vunpack.i.l.bf16 %v9620_v15 }
 0x18c   : > { %v8485_v50 = vadd.f32 %v3596_v42, %v2632_v27  ;;  %3978 = vst.msk [vmem:[%s7900_s19 + $0xa0] sm:$0xf] %vm3937_vm13, %v8474_v48  ;;  %v2569_v24 = vmul.f32 %v6046_v25, %v2106_v31  ;;  %v6052_v15 = vunpack.i.h.bf16 %v9626_v12  ;;  %4048 = vrot.lane.b32.xlu1 %v8197_v4, %s6360_s21 }
 0x18d   : > { %v1542_v39 = vmul.f32 %v9621_v46, %v9619_v34  ;;  %v1541_v5 = vmul.f32 %v9624_v61, %v9623_v6  ;;  %v8493_v19 = vadd.f32 %v3595_v57, %v2631_v23  ;;  %v6206_v34 = vunpack.i.l.bf16 %v6205_v41  ;;  %v5720_v46 = vpop.f32.mrb[78].mxu0  ;;  %v5620_v41 = vpop.f32.mrb[78].mxu1  ;;  %4046 = vrot.lane.b32.xlu0 %v8204_v10, %s6360_s21 }
 0x18e   : > { %9622 = vst [vmem:[#allocation47_spill] sm:$0xff] %v8485_v50  ;;  %v8497_v27 = vpack.c.bf16 %v8485_v50, %v8485_v50  ;;  %v3598_v11 = vmul.f32 %v6207_v60, %v5717_v54  ;;  %v3144_v60 = vpop.f32.mrb[79].mxu0  ;;  %v9627_v54 = vld [vmem:[#allocation43_spill] sm:$0xff]  ;;  %v2572_v61 = vmul.f32 %v6052_v15, %v5620_v41  ;;  %v9634_v41 = vld [vmem:[#allocation57_spill] sm:$0xff]  ;;  %v6225_v10 = vpop.permute.xlu0 %6224 }
 0x18f   : > { %9625 = vst [vmem:[#allocation50_spill] sm:$0xff] %v8493_v19  ;;  %v2634_v42 = vadd.f32 %v2570_v18, %v1542_v39  ;;  %v8504_v23 = vpack.c.bf16 %v8493_v19, %v8493_v19  ;;  %v2633_v57 = vadd.f32 %v2569_v24, %v1541_v5  ;;  %v3597_v25 = vmul.f32 %v6206_v34, %v3134_v1  ;;  %v9628_v18 = vld [vmem:[#allocation6_spill] sm:$0xff]  ;;  %v2116_v24 = vpop.f32.mrb[79].mxu1  ;;  %v9631_v1 = vld [vmem:[#allocation45_spill] sm:$0xff] }
 0x190   : > { %v6051_v39 = vunpack.i.l.bf16 %v9626_v12  ;;  %v9629_v32 = vunpack.i.h.bf16 %v9628_v18  ;;  %3981 = vst.msk [vmem:[%s7900_s19 + $0xac] sm:$0xf] %vm3937_vm13, %v8497_v27  ;;  %v6212_v19 = vunpack.i.h.bf16 %v6210_v43  ;;  %v9632_v5 = vunpack.i.l.bf16 %v9628_v18  ;;  %4372 = vrot.lane.b32.xlu1 %v8215_v56, %s6359_s20 }
 0x191   : > { %v8515_v6 = vadd.f32 %v3598_v11, %v2634_v42  ;;  %3980 = vst.msk [vmem:[%s7900_s19 + $0xa8] sm:$0xf] %vm3937_vm13, %v8504_v23  ;;  %v8523_v12 = vadd.f32 %v3597_v25, %v2633_v57  ;;  %v6057_v18 = vunpack.i.h.bf16 %v9634_v41  ;;  %4370 = vrot.lane.b32.xlu0 %v8223_v22, %s6359_s20 }
 0x192   : > { %v1544_v31 = vmul.f32 %v9629_v32, %v9627_v54  ;;  %v1543_v34 = vmul.f32 %v9632_v5, %v9631_v1  ;;  %v2571_v50 = vmul.f32 %v6051_v39, %v2116_v24  ;;  %v6211_v54 = vunpack.i.l.bf16 %v6210_v43  ;;  %v5723_v32 = vpop.f32.mrb[80].mxu0  ;;  %v5623_v43 = vpop.f32.mrb[80].mxu1 }
 0x193   : > { %9630 = vst [vmem:[#allocation15_spill] sm:$0xff] %v8515_v6  ;;  %9633 = vst [vmem:[#allocation52_spill] sm:$0xff] %v8523_v12  ;;  %v8527_v42 = vpack.c.bf16 %v8515_v6, %v8515_v6  ;;  %v3600_v15 = vmul.f32 %v6212_v19, %v5720_v46  ;;  %v8534_v57 = vpack.c.bf16 %v8523_v12, %v8523_v12  ;;  %v3154_v19 = vpop.f32.mrb[81].mxu0  ;;  %v9635_v46 = vld [vmem:[#allocation49_spill] sm:$0xff]  ;;  %v6217_v12 = vunpack.i.h.bf16 %v6215_v59 }
 0x194   : > { %v2636_v11 = vadd.f32 %v2572_v61, %v1544_v31  ;;  %v2635_v25 = vadd.f32 %v2571_v50, %v1543_v34  ;;  %v3599_v39 = vmul.f32 %v6211_v54, %v3144_v60  ;;  %v6056_v31 = vunpack.i.l.bf16 %v9634_v41  ;;  %v9636_v61 = vld [vmem:[#allocation9_spill] sm:$0xff]  ;;  %v2126_v50 = vpop.f32.mrb[81].mxu1  ;;  %v9639_v60 = vld [vmem:[#allocation51_spill] sm:$0xff]  ;;  %4052 = vrot.lane.b32.xlu1 %v8227_v58, %s6360_s21 }
 0x195   : > { %v9637_v55 = vunpack.i.h.bf16 %v9636_v61  ;;  %3983 = vst.msk [vmem:[%s7900_s19 + $0xb4] sm:$0xf] %vm3937_vm13, %v8527_v42  ;;  %v2574_v5 = vmul.f32 %v6057_v18, %v5623_v43  ;;  %v9640_v34 = vunpack.i.l.bf16 %v9636_v61  ;;  %3982 = vst.msk [vmem:[%s7900_s19 + $0xb0] sm:$0xf] %vm3937_vm13, %v8534_v57  ;;  %v3602_v18 = vmul.f32 %v6217_v12, %v5723_v32  ;;  %v9642_v43 = vld [vmem:[#allocation62_spill] sm:$0xff]  ;;  %4050 = vrot.lane.b32.xlu0 %v8234_v3, %s6360_s21  ;;  %v6235_v3 = vpop.permute.xlu0 %6234 }
 0x196   : > { %v8545_v1 = vadd.f32 %v3600_v15, %v2636_v11  ;;  %v8553_v41 = vadd.f32 %v3599_v39, %v2635_v25  ;;  %v2573_v6 = vmul.f32 %v6056_v31, %v2126_v50  ;;  %v6062_v61 = vunpack.i.h.bf16 %v9642_v43  ;;  %v9643_v32 = vld [vmem:[#allocation54_spill] sm:$0xff] }
 0x197   : > { %v1546_v24 = vmul.f32 %v9637_v55, %v9635_v46  ;;  %v1545_v54 = vmul.f32 %v9640_v34, %v9639_v60  ;;  %v6216_v46 = vunpack.i.l.bf16 %v6215_v59  ;;  %v5726_v55 = vpop.f32.mrb[82].mxu0  ;;  %v5626_v59 = vpop.f32.mrb[82].mxu1 }
 0x198   : > { %9638 = vst [vmem:[#allocation55_spill] sm:$0xff] %v8545_v1  ;;  %9641 = vst [vmem:[#allocation20_spill] sm:$0xff] %v8553_v41  ;;  %v8557_v11 = vpack.c.bf16 %v8545_v1, %v8545_v1  ;;  %v8564_v25 = vpack.c.bf16 %v8553_v41, %v8553_v41  ;;  %v3164_v12 = vpop.f32.mrb[83].mxu0  ;;  %v2576_v34 = vmul.f32 %v6062_v61, %v5626_v59  ;;  %v6222_v41 = vunpack.i.h.bf16 %v6220_v9  ;;  %v9650_v59 = vld [vmem:[#allocation64_spill] sm:$0xff] }
 0x199   : > { %v2638_v15 = vadd.f32 %v2574_v5, %v1546_v24  ;;  %v2637_v39 = vadd.f32 %v2573_v6, %v1545_v54  ;;  %v3601_v31 = vmul.f32 %v6216_v46, %v3154_v19  ;;  %v6061_v24 = vunpack.i.l.bf16 %v9642_v43  ;;  %v9644_v5 = vld [vmem:[#allocation8_spill] sm:$0xff]  ;;  %v2136_v6 = vpop.f32.mrb[83].mxu1  ;;  %4376 = vrot.lane.b32.xlu1 %v8245_v49, %s6359_s20  ;;  %4374 = vrot.lane.b32.xlu0 %v8253_v28, %s6359_s20 }
 0x19a   : > { %v9645_v4 = vunpack.i.h.bf16 %v9644_v5  ;;  %3985 = vst.msk [vmem:[%s7900_s19 + $0xbc] sm:$0xf] %vm3937_vm13, %v8557_v11  ;;  %v9647_v19 = vld [vmem:[#allocation56_spill] sm:$0xff]  ;;  %v9648_v54 = vunpack.i.l.bf16 %v9644_v5  ;;  %3984 = vst.msk [vmem:[%s7900_s19 + $0xb8] sm:$0xf] %vm3937_vm13, %v8564_v25  ;;  %v3604_v61 = vmul.f32 %v6222_v41, %v5726_v55  ;;  %v6067_v5 = vunpack.i.h.bf16 %v9650_v59  ;;  %v9651_v55 = vld [vmem:[#allocation59_spill] sm:$0xff] }
 0x19b   : > { %v8575_v60 = vadd.f32 %v3602_v18, %v2638_v15  ;;  %v8583_v43 = vadd.f32 %v3601_v31, %v2637_v39  ;;  %v2575_v1 = vmul.f32 %v6061_v24, %v2136_v6  ;;  %v5629_v24 = vpop.f32.mrb[84].mxu1 }
 0x19c   : > { %v1548_v50 = vmul.f32 %v9645_v4, %v9643_v32  ;;  %v1547_v46 = vmul.f32 %v9648_v54, %v9647_v19  ;;  %v6221_v32 = vunpack.i.l.bf16 %v6220_v9  ;;  %v5729_v4 = vpop.f32.mrb[84].mxu0  ;;  %v6230_v19 = vpop.permute.xlu1 %6229 }
 0x19d   : > { %9646 = vst [vmem:[#allocation58_spill] sm:$0xff] %v8575_v60  ;;  %9649 = vst [vmem:[#allocation60_spill] sm:$0xff] %v8583_v43  ;;  %v8587_v15 = vpack.c.bf16 %v8575_v60, %v8575_v60  ;;  %v8594_v39 = vpack.c.bf16 %v8583_v43, %v8583_v43  ;;  %v3174_v41 = vpop.f32.mrb[85].mxu0  ;;  %v2578_v43 = vmul.f32 %v6067_v5, %v5629_v24  ;;  %v9658_v5 = vld [vmem:[#allocation69_spill] sm:$0xff]  ;;  %4056 = vrot.lane.b32.xlu1 %v8257_v8, %s6360_s21 }
 0x19e   : > { %v2640_v18 = vadd.f32 %v2576_v34, %v1548_v50  ;;  %v2639_v31 = vadd.f32 %v2575_v1, %v1547_v46  ;;  %v3603_v9 = vmul.f32 %v6221_v32, %v3164_v12  ;;  %v6066_v50 = vunpack.i.l.bf16 %v9650_v59  ;;  %v9652_v34 = vld [vmem:[#allocation11_spill] sm:$0xff]  ;;  %v2146_v12 = vpop.f32.mrb[85].mxu1  ;;  %v9655_v46 = vld [vmem:[#allocation61_spill] sm:$0xff]  ;;  %4054 = vrot.lane.b32.xlu0 %v8264_v20, %s6360_s21 }
 0x19f   : > { %v9653_v56 = vunpack.i.h.bf16 %v9652_v34  ;;  %3987 = vst.msk [vmem:[%s7900_s19 + $0xc4] sm:$0xf] %vm3937_vm13, %v8587_v15  ;;  %v6227_v1 = vunpack.i.h.bf16 %v6225_v10  ;;  %v9656_v32 = vunpack.i.l.bf16 %v9652_v34  ;;  %3986 = vst.msk [vmem:[%s7900_s19 + $0xc0] sm:$0xf] %vm3937_vm13, %v8594_v39  ;;  %v6072_v24 = vunpack.i.h.bf16 %v9658_v5  ;;  %v5732_v34 = vpop.f32.mrb[86].mxu0 }
 0x1a0   : > { %v8605_v54 = vadd.f32 %v3604_v61, %v2640_v18  ;;  %v8613_v59 = vadd.f32 %v3603_v9, %v2639_v31  ;;  %v2577_v60 = vmul.f32 %v6066_v50, %v2146_v12 }
 0x1a1   : > { %v1550_v6 = vmul.f32 %v9653_v56, %v9651_v55  ;;  %v1549_v22 = vmul.f32 %v9656_v32, %v9655_v46  ;;  %v6226_v55 = vunpack.i.l.bf16 %v6225_v10  ;;  %v3606_v61 = vmul.f32 %v6227_v1, %v5729_v4  ;;  %v5632_v10 = vpop.f32.mrb[86].mxu1  ;;  %v3184_v4 = vpop.f32.mrb[87].mxu0  ;;  %v9661_v1 = vld [vmem:[#allocation10_spill] sm:$0xff]  ;;  %4380 = vrot.lane.b32.xlu1 %v8275_v37, %s6359_s20 }
 0x1a2   : > { %9654 = vst [vmem:[#allocation19_spill] sm:$0xff] %v8605_v54  ;;  %9657 = vst [vmem:[#allocation63_spill] sm:$0xff] %v8613_v59  ;;  %v8617_v56 = vpack.c.bf16 %v8605_v54, %v8605_v54  ;;  %v8624_v31 = vpack.c.bf16 %v8613_v59, %v8613_v59  ;;  %v9662_v58 = vunpack.i.h.bf16 %v9661_v1  ;;  %v2580_v32 = vmul.f32 %v6072_v24, %v5632_v10  ;;  %v9667_v10 = vld [vmem:[#allocation73_spill] sm:$0xff] }
 0x1a3   : > { %v2642_v18 = vadd.f32 %v2578_v43, %v1550_v6  ;;  %v2641_v9 = vadd.f32 %v2577_v60, %v1549_v22  ;;  %v3605_v50 = vmul.f32 %v6226_v55, %v3174_v41  ;;  %v6071_v43 = vunpack.i.l.bf16 %v9658_v5  ;;  %v9660_v6 = vld [vmem:[#allocation65_spill] sm:$0xff]  ;;  %v2156_v60 = vpop.f32.mrb[87].mxu1  ;;  %v9664_v41 = vld [vmem:[#allocation67_spill] sm:$0xff]  ;;  %4378 = vrot.lane.b32.xlu0 %v8283_v51, %s6359_s20 }
 0x1a4   : > { %9659 = vst [vmem:[#allocation66_spill] sm:$0xff] %v8624_v31  ;;  %v1552_v12 = vmul.f32 %v9662_v58, %v9660_v6  ;;  %3989 = vst.msk [vmem:[%s7900_s19 + $0xcc] sm:$0xf] %vm3937_vm13, %v8617_v56  ;;  %v6232_v59 = vunpack.i.h.bf16 %v6230_v19  ;;  %v9665_v22 = vunpack.i.l.bf16 %v9661_v1  ;;  %v6231_v6 = vunpack.i.l.bf16 %v6230_v19  ;;  %v6240_v58 = vpop.permute.xlu1 %6239 }
 0x1a5   : > { %v8635_v46 = vadd.f32 %v3606_v61, %v2642_v18  ;;  %3988 = vst.msk [vmem:[%s7900_s19 + $0xc8] sm:$0xf] %vm3937_vm13, %v8624_v31  ;;  %v8643_v5 = vadd.f32 %v3605_v50, %v2641_v9  ;;  %v2579_v54 = vmul.f32 %v6071_v43, %v2156_v60  ;;  %v6077_v1 = vunpack.i.h.bf16 %v9667_v10  ;;  %v5635_v43 = vpop.f32.mrb[88].mxu1  ;;  %4060 = vrot.lane.b32.xlu1 %v8287_v44, %s6360_s21 }
 0x1a6   : > { %v1551_v55 = vmul.f32 %v9665_v22, %v9664_v41  ;;  %v2644_v61 = vadd.f32 %v2580_v32, %v1552_v12  ;;  %v3608_v24 = vmul.f32 %v6232_v59, %v5732_v34  ;;  %v5735_v41 = vpop.f32.mrb[88].mxu0  ;;  %v3607_v50 = vmul.f32 %v6231_v6, %v3184_v4  ;;  %v9668_v34 = vld [vmem:[#allocation70_spill] sm:$0xff]  ;;  %v9669_v32 = vld [vmem:[#allocation13_spill] sm:$0xff]  ;;  %v9671_v4 = vld [vmem:[#allocation72_spill] sm:$0xff] }
 0x1a7   : > { %9663 = vst [vmem:[#allocation24_spill] sm:$0xff] %v8635_v46  ;;  %9666 = vst [vmem:[#allocation68_spill] sm:$0xff] %v8643_v5  ;;  %v8647_v18 = vpack.c.bf16 %v8635_v46, %v8635_v46  ;;  %v8654_v9 = vpack.c.bf16 %v8643_v5, %v8643_v5  ;;  %v6076_v12 = vunpack.i.l.bf16 %v9667_v10  ;;  %v3194_v59 = vpop.f32.mrb[89].mxu0  ;;  %v9670_v49 = vunpack.i.h.bf16 %v9669_v32  ;;  %4058 = vrot.lane.b32.xlu0 %v8294_v33, %s6360_s21 }
 0x1a8   : > { %v2643_v19 = vadd.f32 %v2579_v54, %v1551_v55  ;;  %v8665_v22 = vadd.f32 %v3608_v24, %v2644_v61  ;;  %v2582_v5 = vmul.f32 %v6077_v1, %v5635_v43  ;;  %v6237_v46 = vunpack.i.h.bf16 %v6235_v3  ;;  %v2166_v54 = vpop.f32.mrb[89].mxu1  ;;  %v9674_v1 = vld [vmem:[#allocation78_spill] sm:$0xff] }
 0x1a9   : > { %v1554_v60 = vmul.f32 %v9670_v49, %v9668_v34  ;;  %3991 = vst.msk [vmem:[%s7900_s19 + $0xd4] sm:$0xf] %vm3937_vm13, %v8647_v18  ;;  %v9672_v55 = vunpack.i.l.bf16 %v9669_v32  ;;  %3990 = vst.msk [vmem:[%s7900_s19 + $0xd0] sm:$0xf] %vm3937_vm13, %v8654_v9  ;;  %v2581_v10 = vmul.f32 %v6076_v12, %v2166_v54  ;;  %v6236_v31 = vunpack.i.l.bf16 %v6235_v3  ;;  %v5738_v32 = vpop.f32.mrb[90].mxu0  ;;  %v9676_v12 = vld [vmem:[#allocation12_spill] sm:$0xff]  ;;  %v8692_v54 = vpop.permute.xlu1 %6249  ;;  %4384 = vrot.lane.b32.xlu1 %v8305_v21, %s6359_s20 }
 0x1aa   : > { %v8673_v28 = vadd.f32 %v3607_v50, %v2643_v19  ;;  %v8677_v34 = vpack.c.bf16 %v8665_v22, %v8665_v22  ;;  %v3610_v24 = vmul.f32 %v6237_v46, %v5735_v41  ;;  %v6082_v43 = vunpack.i.h.bf16 %v9674_v1  ;;  %v5638_v50 = vpop.f32.mrb[90].mxu1  ;;  %v3204_v46 = vpop.f32.mrb[91].mxu0  ;;  %v9675_v41 = vld [vmem:[#allocation75_spill] sm:$0xff] }
 0x1ab   : > { %v1553_v6 = vmul.f32 %v9672_v55, %v9671_v4  ;;  %v2646_v61 = vadd.f32 %v2582_v5, %v1554_v60  ;;  %v3609_v3 = vmul.f32 %v6236_v31, %v3194_v59  ;;  %v6081_v5 = vunpack.i.l.bf16 %v9674_v1  ;;  %v2176_v55 = vpop.f32.mrb[91].mxu1  ;;  %v6245_v1 = vpop.permute.xlu0 %6244  ;;  %4382 = vrot.lane.b32.xlu0 %v8313_v17, %s6359_s20 }
 0x1ac   : > { %9673 = vst [vmem:[#allocation71_spill] sm:$0xff] %v8673_v28  ;;  %v8684_v49 = vpack.c.bf16 %v8673_v28, %v8673_v28  ;;  %v9677_v8 = vunpack.i.h.bf16 %v9676_v12  ;;  %3993 = vst.msk [vmem:[%s7900_s19 + $0xdc] sm:$0xf] %vm3937_vm13, %v8677_v34  ;;  %v2584_v31 = vmul.f32 %v6082_v43, %v5638_v50  ;;  %v6242_v59 = vunpack.i.h.bf16 %v6240_v58  ;;  %v9681_v50 = vld [vmem:[#allocation80_spill] sm:$0xff] }
 0x1ad   : > { %v2645_v19 = vadd.f32 %v2581_v10, %v1553_v6  ;;  %v8697_v4 = vadd.f32 %v3610_v24, %v2646_v61  ;;  %v9678_v6 = vld [vmem:[#allocation77_spill] sm:$0xff]  ;;  %v9679_v20 = vunpack.i.l.bf16 %v9676_v12  ;;  %v6241_v28 = vunpack.i.l.bf16 %v6240_v58  ;;  %4064 = vrot.lane.b32.xlu1 %v8317_v63, %s6360_s21 }
 0x1ae   : > { %v1556_v60 = vmul.f32 %v9677_v8, %v9675_v41  ;;  %3992 = vst.msk [vmem:[%s7900_s19 + $0xd8] sm:$0xf] %vm3937_vm13, %v8684_v49  ;;  %v2583_v8 = vmul.f32 %v6081_v5, %v2176_v55  ;;  %v3612_v43 = vmul.f32 %v6242_v59, %v5738_v32  ;;  %v6087_v12 = vunpack.i.h.bf16 %v9681_v50  ;;  %v5641_v32 = vpop.f32.mrb[92].mxu1 }
 0x1af   : > { %v1555_v10 = vmul.f32 %v9679_v20, %v9678_v6  ;;  %v8705_v41 = vadd.f32 %v3609_v3, %v2645_v19  ;;  %v8709_v61 = vpack.c.bf16 %v8697_v4, %v8697_v4  ;;  %v5741_v6 = vpop.f32.mrb[92].mxu0  ;;  %v3611_v3 = vmul.f32 %v6241_v28, %v3204_v46  ;;  %v2186_v46 = vpop.f32.mrb[93].mxu1  ;;  %4062 = vrot.lane.b32.xlu0 %v8324_v13, %s6360_s21 }
 0x1b0   : > { %v2648_v24 = vadd.f32 %v2584_v31, %v1556_v60  ;;  %v6086_v37 = vunpack.i.l.bf16 %v9681_v50  ;;  %v3214_v5 = vpop.f32.mrb[93].mxu0  ;;  %v9682_v60 = vld [vmem:[#allocation81_spill] sm:$0xff]  ;;  %v9683_v31 = vunpack.i.h.bf16 %v7620_v2  ;;  %v2586_v20 = vmul.f32 %v6087_v12, %v5641_v32 }
 0x1b1   : > { %9680 = vst [vmem:[#allocation23_spill] sm:$0xff] %v8705_v41  ;;  %v8722_v58 = vpack.c.bf16 %v8705_v41, %v8705_v41  ;;  %v2647_v19 = vadd.f32 %v2583_v8, %v1555_v10  ;;  %3995 = vst.msk [vmem:[%s7900_s19 + $0xe4] sm:$0xf] %vm3937_vm13, %v8709_v61  ;;  %v6247_v28 = vunpack.i.h.bf16 %v6245_v1  ;;  %v4325_v10 = vpop.permute.xlu1 %4324  ;;  %v9684_v8 = vld [vmem:[#allocation82_spill] sm:$0xff]  ;;  %v9685_v51 = vunpack.i.l.bf16 %v7620_v2  ;;  %v9686_v2 = vld [vmem:[#allocation83_spill] sm:$0xff]  ;;  %4388 = vrot.lane.b32.xlu1 %v8335_v47, %s6359_s20 }
 0x1b2   : > { %v1558_v59 = vmul.f32 %v9683_v31, %v9682_v60  ;;  %v8733_v55 = vadd.f32 %v3612_v43, %v2648_v24  ;;  %v2585_v60 = vmul.f32 %v6086_v37, %v2186_v46  ;;  %4515 = vst.msk [vmem:[%s8718_s25 + $0x8] sm:$0xff] %vm599_vm0, %v4325_v10  ;;  %v6246_v31 = vunpack.i.l.bf16 %v6245_v1  ;;  %v4323_v24 = vpop.permute.xlu0 %4322 }
 0x1b3   : > { %v1557_v50 = vmul.f32 %v9685_v51, %v9684_v8  ;;  %3994 = vst.msk [vmem:[%s7900_s19 + $0xe0] sm:$0xf] %vm3937_vm13, %v8722_v58  ;;  %v8741_v41 = vadd.f32 %v3611_v3, %v2647_v19  ;;  %v3614_v32 = vmul.f32 %v6247_v28, %v5741_v6  ;;  %v6092_v19 = vunpack.i.h.bf16 %v9686_v2  ;;  %v5744_v3 = vpop.f32.mrb[94].mxu0  ;;  %v9687_v28 = vld [vmem:[#allocation84_spill] sm:$0xff]  ;;  %4386 = vrot.lane.b32.xlu0 %v8343_v0, %s6359_s20 }
 0x1b4   : > { %v8747_v43 = vpack.c.bf16 %v8733_v55, %v8733_v55  ;;  %v2650_v12 = vadd.f32 %v2586_v20, %v1558_v59  ;;  %4514 = vst.msk [vmem:[%s8718_s25] sm:$0xff] %vm599_vm0, %v4323_v24  ;;  %v3613_v37 = vmul.f32 %v6246_v31, %v3214_v5  ;;  %v5644_v59 = vpop.f32.mrb[94].mxu1  ;;  %v6091_v44 = vunpack.i.l.bf16 %v9686_v2  ;;  %v3224_v20 = vpop.f32.mrb[95].mxu0  ;;  %v9689_v31 = vld [vmem:[#allocation85_spill] sm:$0xff] }
 0x1b5   : > { %v8763_v1 = vpack.c.bf16 %v8741_v41, %v8741_v41  ;;  %v2649_v6 = vadd.f32 %v2585_v60, %v1557_v50  ;;  %v9688_v46 = vunpack.i.h.bf16 %v7618_v53  ;;  %v2588_v51 = vmul.f32 %v6092_v19, %v5644_v59  ;;  %v2196_v50 = vpop.f32.mrb[95].mxu1  ;;  %v4005_v60 = vpop.permute.xlu1 %4004  ;;  %4068 = vrot.lane.b32.xlu1 %v8347_v26, %s6360_s21 }
 0x1b6   : > { %3997 = vst.msk [vmem:[%s7900_s19 + $0xec] sm:$0xf] %vm3937_vm13, %v8747_v43  ;;  %v8774_v8 = vadd.f32 %v3614_v32, %v2650_v12  ;;  %v6252_v5 = vunpack.i.h.bf16 %v8692_v54  ;;  %v9690_v33 = vunpack.i.l.bf16 %v7618_v53  ;;  %4195 = vst.msk [vmem:[%s8759_s28 + $0x4] sm:$0xf] %vm3937_vm13, %v4005_v60  ;;  %v6251_v12 = vunpack.i.l.bf16 %v8692_v54  ;;  %v4003_v32 = vpop.permute.xlu0 %4002 }
 0x1b7   : > { %v1560_v10 = vmul.f32 %v9688_v46, %v9687_v28  ;;  %3996 = vst.msk [vmem:[%s7900_s19 + $0xe8] sm:$0xf] %vm3937_vm13, %v8763_v1  ;;  %v8783_v2 = vadd.f32 %v3613_v37, %v2649_v6  ;;  %v2587_v28 = vmul.f32 %v6091_v44, %v2196_v50  ;;  %4194 = vst.msk [vmem:[%s8759_s28] sm:$0xf] %vm3937_vm13, %v4003_v32  ;;  %4066 = vrot.lane.b32.xlu0 %v8354_v7, %s6360_s21  ;;  %v9692_v50 = vld [vmem:[#allocation42_spill] sm:$0xff]  ;;  %v9695_v32 = vld [vmem:[#allocation47_spill] sm:$0xff] }
 0x1b8   : > { %v1559_v24 = vmul.f32 %v9690_v33, %v9689_v31  ;;  %v8790_v19 = vpack.c.bf16 %v8774_v8, %v8774_v8  ;;  %v3616_v59 = vmul.f32 %v6252_v5, %v5744_v3  ;;  %v3615_v37 = vmul.f32 %v6251_v12, %v3224_v20  ;;  %v9693_v33 = vld [vmem:[#allocation44_spill] sm:$0xff] }
 0x1b9   : > { %v2652_v53 = vadd.f32 %v2588_v51, %v1560_v10  ;;  %v8798_v6 = vpack.c.bf16 %v8783_v2, %v8783_v2  ;;  %v4329_v44 = vpop.permute.xlu1 %4328  ;;  %4392 = vrot.lane.b32.xlu1 %v8365_v30, %s6359_s20 }
 0x1ba   : > { %v2651_v54 = vadd.f32 %v2587_v28, %v1559_v24  ;;  %3999 = vst.msk [vmem:[%s7900_s19 + $0xf4] sm:$0xf] %vm3937_vm13, %v8790_v19  ;;  %v4327_v20 = vpop.permute.xlu0 %4326  ;;  %v9694_v24 = vld [vmem:[#allocation16_spill] sm:$0xff] }
 0x1bb   : > { %v8805_v3 = vadd.f32 %v3616_v59, %v2652_v53  ;;  %3998 = vst.msk [vmem:[%s7900_s19 + $0xf0] sm:$0xf] %vm3937_vm13, %v8798_v6  ;;  %4390 = vrot.lane.b32.xlu0 %v8373_v14, %s6359_s20  ;;  %v9696_v53 = vld [vmem:[#allocation50_spill] sm:$0xff] }
 0x1bc   : > { %v8810_v21 = vadd.f32 %v3615_v37, %v2651_v54  ;;  %4517 = vst.msk [vmem:[%s8718_s25 + $0x18] sm:$0xff] %vm599_vm0, %v4329_v44  ;;  %4516 = vst.msk [vmem:[%s8718_s25 + $0x10] sm:$0xff] %vm599_vm0, %v4327_v20  ;;  %v9697_v37 = vld [vmem:[#allocation15_spill] sm:$0xff]  ;;  %v9698_v44 = vld [vmem:[#allocation52_spill] sm:$0xff] }
 0x1bd   : > { %v8816_v17 = vpack.c.bf16 %v8805_v3, %v8805_v3  ;;  %v4009_v10 = vpop.permute.xlu1 %4008  ;;  %4072 = vrot.lane.b32.xlu1 %v8377_v38, %s6360_s21 }
 0x1be   : > { %v8824_v46 = vpack.c.bf16 %v8810_v21, %v8810_v21  ;;  %4197 = vst.msk [vmem:[%s8759_s28 + $0xc] sm:$0xf] %vm3937_vm13, %v4009_v10  ;;  %v4007_v51 = vpop.permute.xlu0 %4006 }
 0x1bf   : > { %4001 = vst.msk [vmem:[%s7900_s19 + $0xfc] sm:$0xf] %vm3937_vm13, %v8816_v17  ;;  %4196 = vst.msk [vmem:[%s8759_s28 + $0x8] sm:$0xf] %vm3937_vm13, %v4007_v51  ;;  %4070 = vrot.lane.b32.xlu0 %v8384_v40, %s6360_s21  ;;  %v9699_v51 = vld [vmem:[#allocation55_spill] sm:$0xff] }
 0x1c0   : > { %4000 = vst.msk [vmem:[%s7900_s19 + $0xf8] sm:$0xf] %vm3937_vm13, %v8824_v46 }
 0x1c1   : > { %v4333_v63 = vpop.permute.xlu1 %4332  ;;  %4396 = vrot.lane.b32.xlu1 %v8395_v52, %s6359_s20 }
 0x1c2   : > { %4519 = vst.msk [vmem:[%s8718_s25 + $0x28] sm:$0xff] %vm599_vm0, %v4333_v63  ;;  %v4331_v13 = vpop.permute.xlu0 %4330  ;;  %v9700_v63 = vld [vmem:[#allocation20_spill] sm:$0xff] }
 0x1c3   : > { %4518 = vst.msk [vmem:[%s8718_s25 + $0x20] sm:$0xff] %vm599_vm0, %v4331_v13  ;;  %4394 = vrot.lane.b32.xlu0 %v8403_v16, %s6359_s20  ;;  %v9691_v16 = vld [vmem:[#allocation14_spill] sm:$0xff] }
 0x1c5   : > { %v4013_v5 = vpop.permute.xlu1 %4012  ;;  %4076 = vrot.lane.b32.xlu1 %v8407_v35, %s6360_s21 }
 0x1c6   : > { %4199 = vst.msk [vmem:[%s8759_s28 + $0x14] sm:$0xf] %vm3937_vm13, %v4013_v5  ;;  %v4011_v47 = vpop.permute.xlu0 %4010 }
 0x1c7   : > { %4198 = vst.msk [vmem:[%s8759_s28 + $0x10] sm:$0xf] %vm3937_vm13, %v4011_v47  ;;  %4074 = vrot.lane.b32.xlu0 %v8414_v29, %s6360_s21  ;;  %v9701_v47 = vld [vmem:[#allocation58_spill] sm:$0xff] }
 0x1c9   : > { %v4337_v0 = vpop.permute.xlu1 %4336  ;;  %4400 = vrot.lane.b32.xlu1 %v9691_v16, %s6359_s20  ;;  %v9707_v16 = vld [vmem:[#allocation68_spill] sm:$0xff] }
 0x1ca   : > { %4521 = vst.msk [vmem:[%s8718_s25 + $0x38] sm:$0xff] %vm599_vm0, %v4337_v0  ;;  %v4335_v26 = vpop.permute.xlu0 %4334  ;;  %v9702_v0 = vld [vmem:[#allocation60_spill] sm:$0xff] }
 0x1cb   : > { %4520 = vst.msk [vmem:[%s8718_s25 + $0x30] sm:$0xff] %vm599_vm0, %v4335_v26  ;;  %4398 = vrot.lane.b32.xlu0 %v9692_v50, %s6359_s20 }
 0x1cd   : > { %v4017_v7 = vpop.permute.xlu1 %4016  ;;  %4080 = vrot.lane.b32.xlu1 %v8437_v62, %s6360_s21 }
 0x1ce   : > { %4201 = vst.msk [vmem:[%s8759_s28 + $0x1c] sm:$0xf] %vm3937_vm13, %v4017_v7  ;;  %v4015_v30 = vpop.permute.xlu0 %4014 }
 0x1cf   : > { %4200 = vst.msk [vmem:[%s8759_s28 + $0x18] sm:$0xf] %vm3937_vm13, %v4015_v30  ;;  %4078 = vrot.lane.b32.xlu0 %v8444_v36, %s6360_s21  ;;  %v9703_v30 = vld [vmem:[#allocation66_spill] sm:$0xff] }
 0x1d1   : > { %v4341_v14 = vpop.permute.xlu1 %4340  ;;  %4404 = vrot.lane.b32.xlu1 %v9693_v33, %s6359_s20  ;;  %v9709_v33 = vld [vmem:[#allocation23_spill] sm:$0xff] }
 0x1d2   : > { %4523 = vst.msk [vmem:[%s8718_s25 + $0x48] sm:$0xff] %vm599_vm0, %v4341_v14  ;;  %v4339_v38 = vpop.permute.xlu0 %4338 }
 0x1d3   : > { %4522 = vst.msk [vmem:[%s8718_s25 + $0x40] sm:$0xff] %vm599_vm0, %v4339_v38  ;;  %4402 = vrot.lane.b32.xlu0 %v9694_v24, %s6359_s20 }
 0x1d5   : > { %v4021_v40 = vpop.permute.xlu1 %4020  ;;  %4084 = vrot.lane.b32.xlu1 %v8467_v45, %s6360_s21 }
 0x1d6   : > { %4203 = vst.msk [vmem:[%s8759_s28 + $0x24] sm:$0xf] %vm3937_vm13, %v4021_v40  ;;  %v4019_v52 = vpop.permute.xlu0 %4018  ;;  %v9705_v40 = vld [vmem:[#allocation63_spill] sm:$0xff] }
 0x1d7   : > { %4202 = vst.msk [vmem:[%s8759_s28 + $0x20] sm:$0xf] %vm3937_vm13, %v4019_v52  ;;  %4082 = vrot.lane.b32.xlu0 %v8474_v48, %s6360_s21 }
 0x1d9   : > { %v4345_v60 = vpop.permute.xlu1 %4344  ;;  %4408 = vrot.lane.b32.xlu1 %v9695_v32, %s6359_s20 }
 0x1da   : > { %4525 = vst.msk [vmem:[%s8718_s25 + $0x58] sm:$0xff] %vm599_vm0, %v4345_v60  ;;  %v4343_v35 = vpop.permute.xlu0 %4342 }
 0x1db   : > { %4524 = vst.msk [vmem:[%s8718_s25 + $0x50] sm:$0xff] %vm599_vm0, %v4343_v35  ;;  %4406 = vrot.lane.b32.xlu0 %v9696_v53, %s6359_s20  ;;  %v9708_v35 = vld [vmem:[#allocation71_spill] sm:$0xff] }
 0x1dd   : > { %v4025_v29 = vpop.permute.xlu1 %4024  ;;  %4088 = vrot.lane.b32.xlu1 %v8497_v27, %s6360_s21 }
 0x1de   : > { %4205 = vst.msk [vmem:[%s8759_s28 + $0x2c] sm:$0xf] %vm3937_vm13, %v4025_v29  ;;  %v4023_v31 = vpop.permute.xlu0 %4022 }
 0x1df   : > { %4204 = vst.msk [vmem:[%s8759_s28 + $0x28] sm:$0xf] %vm3937_vm13, %v4023_v31  ;;  %4086 = vrot.lane.b32.xlu0 %v8504_v23, %s6360_s21 }
 0x1e1   : > { %v4349_v28 = vpop.permute.xlu1 %4348  ;;  %4412 = vrot.lane.b32.xlu1 %v9697_v37, %s6359_s20 }
 0x1e2   : > { %4527 = vst.msk [vmem:[%s8718_s25 + $0x68] sm:$0xff] %vm599_vm0, %v4349_v28  ;;  %v4347_v62 = vpop.permute.xlu0 %4346 }
 0x1e3   : > { %4526 = vst.msk [vmem:[%s8718_s25 + $0x60] sm:$0xff] %vm599_vm0, %v4347_v62  ;;  %4410 = vrot.lane.b32.xlu0 %v9698_v44, %s6359_s20 }
 0x1e5   : > { %v4029_v36 = vpop.permute.xlu1 %4028  ;;  %4092 = vrot.lane.b32.xlu1 %v8527_v42, %s6360_s21 }
 0x1e6   : > { %4207 = vst.msk [vmem:[%s8759_s28 + $0x34] sm:$0xf] %vm3937_vm13, %v4029_v36  ;;  %v4027_v12 = vpop.permute.xlu0 %4026 }
 0x1e7   : > { %4206 = vst.msk [vmem:[%s8759_s28 + $0x30] sm:$0xf] %vm3937_vm13, %v4027_v12  ;;  %4090 = vrot.lane.b32.xlu0 %v8534_v57, %s6360_s21 }
 0x1e9   : > { %v4353_v59 = vpop.permute.xlu1 %4352  ;;  %4416 = vrot.lane.b32.xlu1 %v9699_v51, %s6359_s20 }
 0x1ea   : > { %4529 = vst.msk [vmem:[%s8718_s25 + $0x78] sm:$0xff] %vm599_vm0, %v4353_v59  ;;  %v4351_v45 = vpop.permute.xlu0 %4350 }
 0x1eb   : > { %4528 = vst.msk [vmem:[%s8718_s25 + $0x70] sm:$0xff] %vm599_vm0, %v4351_v45  ;;  %4414 = vrot.lane.b32.xlu0 %v9700_v63, %s6359_s20 }
 0x1ed   : > { %v4033_v48 = vpop.permute.xlu1 %4032  ;;  %4096 = vrot.lane.b32.xlu1 %v8557_v11, %s6360_s21 }
 0x1ee   : > { %4209 = vst.msk [vmem:[%s8759_s28 + $0x3c] sm:$0xf] %vm3937_vm13, %v4033_v48  ;;  %v4031_v54 = vpop.permute.xlu0 %4030 }
 0x1ef   : > { %4208 = vst.msk [vmem:[%s8759_s28 + $0x38] sm:$0xf] %vm3937_vm13, %v4031_v54  ;;  %4094 = vrot.lane.b32.xlu0 %v8564_v25, %s6360_s21 }
 0x1f1   : > { %v4357_v20 = vpop.permute.xlu1 %4356  ;;  %4420 = vrot.lane.b32.xlu1 %v9701_v47, %s6359_s20 }
 0x1f2   : > { %4531 = vst.msk [vmem:[%s8718_s25 + $0x88] sm:$0xff] %vm599_vm0, %v4357_v20  ;;  %v4355_v27 = vpop.permute.xlu0 %4354 }
 0x1f3   : > { %4530 = vst.msk [vmem:[%s8718_s25 + $0x80] sm:$0xff] %vm599_vm0, %v4355_v27  ;;  %4418 = vrot.lane.b32.xlu0 %v9702_v0, %s6359_s20 }
 0x1f5   : > { %v4037_v23 = vpop.permute.xlu1 %4036  ;;  %4100 = vrot.lane.b32.xlu1 %v8587_v15, %s6360_s21 }
 0x1f6   : > { %4211 = vst.msk [vmem:[%s8759_s28 + $0x44] sm:$0xf] %vm3937_vm13, %v4037_v23  ;;  %v4035_v10 = vpop.permute.xlu0 %4034 }
 0x1f7   : > { %4210 = vst.msk [vmem:[%s8759_s28 + $0x40] sm:$0xf] %vm3937_vm13, %v4035_v10  ;;  %4098 = vrot.lane.b32.xlu0 %v8594_v39, %s6360_s21 }
 0x1f9   : > { %v4361_v13 = vpop.permute.xlu1 %4360  ;;  %4104 = vrot.lane.b32.xlu1 %v8617_v56, %s6360_s21 }
 0x1fa   : > { %4533 = vst.msk [vmem:[%s8718_s25 + $0x98] sm:$0xff] %vm599_vm0, %v4361_v13  ;;  %v4359_v42 = vpop.permute.xlu0 %4358 }
 0x1fb   : > { %4532 = vst.msk [vmem:[%s8718_s25 + $0x90] sm:$0xff] %vm599_vm0, %v4359_v42  ;;  %4102 = vrot.lane.b32.xlu0 %v9703_v30, %s6360_s21 }
 0x1fd   : > { %v4041_v57 = vpop.permute.xlu1 %4040  ;;  %4108 = vrot.lane.b32.xlu1 %v8647_v18, %s6360_s21 }
 0x1fe   : > { %4213 = vst.msk [vmem:[%s8759_s28 + $0x4c] sm:$0xf] %vm3937_vm13, %v4041_v57  ;;  %v4039_v5 = vpop.permute.xlu0 %4038 }
 0x1ff   : > { %4212 = vst.msk [vmem:[%s8759_s28 + $0x48] sm:$0xf] %vm3937_vm13, %v4039_v5  ;;  %4106 = vrot.lane.b32.xlu0 %v8654_v9, %s6360_s21 }
 0x201   : > { %v4365_v26 = vpop.permute.xlu1 %4364  ;;  %4112 = vrot.lane.b32.xlu1 %v8677_v34, %s6360_s21 }
 0x202   : > { %4535 = vst.msk [vmem:[%s8718_s25 + $0xa8] sm:$0xff] %vm599_vm0, %v4365_v26  ;;  %v4363_v11 = vpop.permute.xlu0 %4362 }
 0x203   : > { %4534 = vst.msk [vmem:[%s8718_s25 + $0xa0] sm:$0xff] %vm599_vm0, %v4363_v11  ;;  %4110 = vrot.lane.b32.xlu0 %v8684_v49, %s6360_s21 }
 0x205   : > { %v4045_v25 = vpop.permute.xlu1 %4044  ;;  %4116 = vrot.lane.b32.xlu1 %v8709_v61, %s6360_s21 }
 0x206   : > { %4215 = vst.msk [vmem:[%s8759_s28 + $0x54] sm:$0xf] %vm3937_vm13, %v4045_v25  ;;  %v4043_v7 = vpop.permute.xlu0 %4042 }
 0x207   : > { %4214 = vst.msk [vmem:[%s8759_s28 + $0x50] sm:$0xf] %vm3937_vm13, %v4043_v7  ;;  %4114 = vrot.lane.b32.xlu0 %v8722_v58, %s6360_s21 }
 0x209   : > { %v4369_v14 = vpop.permute.xlu1 %4368  ;;  %4120 = vrot.lane.b32.xlu1 %v8747_v43, %s6360_s21 }
 0x20a   : > { %4537 = vst.msk [vmem:[%s8718_s25 + $0xb8] sm:$0xff] %vm599_vm0, %v4369_v14  ;;  %v4367_v15 = vpop.permute.xlu0 %4366 }
 0x20b   : > { %4536 = vst.msk [vmem:[%s8718_s25 + $0xb0] sm:$0xff] %vm599_vm0, %v4367_v15  ;;  %4118 = vrot.lane.b32.xlu0 %v8763_v1, %s6360_s21 }
 0x20d   : > { %v4049_v39 = vpop.permute.xlu1 %4048  ;;  %4124 = vrot.lane.b32.xlu1 %v8790_v19, %s6360_s21 }
 0x20e   : > { %4217 = vst.msk [vmem:[%s8759_s28 + $0x5c] sm:$0xf] %vm3937_vm13, %v4049_v39  ;;  %v4047_v56 = vpop.permute.xlu0 %4046 }
 0x20f   : > { %4216 = vst.msk [vmem:[%s8759_s28 + $0x58] sm:$0xf] %vm3937_vm13, %v4047_v56  ;;  %4122 = vrot.lane.b32.xlu0 %v8798_v6, %s6360_s21  ;;  %v9704_v6 = vld [vmem:[#allocation19_spill] sm:$0xff] }
 0x211   : > { %v4373_v38 = vpop.permute.xlu1 %4372  ;;  %4128 = vrot.lane.b32.xlu1 %v8816_v17, %s6360_s21 }
 0x212   : > { %4539 = vst.msk [vmem:[%s8718_s25 + $0xc8] sm:$0xff] %vm599_vm0, %v4373_v38  ;;  %v4371_v18 = vpop.permute.xlu0 %4370 }
 0x213   : > { %4538 = vst.msk [vmem:[%s8718_s25 + $0xc0] sm:$0xff] %vm599_vm0, %v4371_v18  ;;  %4126 = vrot.lane.b32.xlu0 %v8824_v46, %s6360_s21  ;;  %v9706_v46 = vld [vmem:[#allocation24_spill] sm:$0xff] }
 0x215   : > { %v4053_v9 = vpop.permute.xlu1 %4052  ;;  %4424 = vrot.lane.b32.xlu1 %v9704_v6, %s6359_s20 }
 0x216   : > { %4219 = vst.msk [vmem:[%s8759_s28 + $0x64] sm:$0xf] %vm3937_vm13, %v4053_v9  ;;  %v4051_v34 = vpop.permute.xlu0 %4050 }
 0x217   : > { %4218 = vst.msk [vmem:[%s8759_s28 + $0x60] sm:$0xf] %vm3937_vm13, %v4051_v34  ;;  %4422 = vrot.lane.b32.xlu0 %v9705_v40, %s6359_s20 }
 0x219   : > { %v4377_v49 = vpop.permute.xlu1 %4376  ;;  %4428 = vrot.lane.b32.xlu1 %v9706_v46, %s6359_s20 }
 0x21a   : > { %4541 = vst.msk [vmem:[%s8718_s25 + $0xd8] sm:$0xff] %vm599_vm0, %v4377_v49  ;;  %v4375_v61 = vpop.permute.xlu0 %4374 }
 0x21b   : > { %4540 = vst.msk [vmem:[%s8718_s25 + $0xd0] sm:$0xff] %vm599_vm0, %v4375_v61  ;;  %4426 = vrot.lane.b32.xlu0 %v9707_v16, %s6359_s20 }
 0x21d   : > { %v4057_v58 = vpop.permute.xlu1 %4056  ;;  %4432 = vrot.lane.b32.xlu1 %v8665_v22, %s6359_s20 }
 0x21e   : > { %4221 = vst.msk [vmem:[%s8759_s28 + $0x6c] sm:$0xf] %vm3937_vm13, %v4057_v58  ;;  %v4055_v43 = vpop.permute.xlu0 %4054 }
 0x21f   : > { %4220 = vst.msk [vmem:[%s8759_s28 + $0x68] sm:$0xf] %vm3937_vm13, %v4055_v43  ;;  %4430 = vrot.lane.b32.xlu0 %v9708_v35, %s6359_s20 }
 0x221   : > { %v4381_v1 = vpop.permute.xlu1 %4380  ;;  %4436 = vrot.lane.b32.xlu1 %v8697_v4, %s6359_s20 }
 0x222   : > { %4543 = vst.msk [vmem:[%s8718_s25 + $0xe8] sm:$0xff] %vm599_vm0, %v4381_v1  ;;  %v4379_v19 = vpop.permute.xlu0 %4378 }
 0x223   : > { %4542 = vst.msk [vmem:[%s8718_s25 + $0xe0] sm:$0xff] %vm599_vm0, %v4379_v19  ;;  %4434 = vrot.lane.b32.xlu0 %v9709_v33, %s6359_s20 }
 0x225   : > { %v4061_v52 = vpop.permute.xlu1 %4060  ;;  %4440 = vrot.lane.b32.xlu1 %v8733_v55, %s6359_s20 }
 0x226   : > { %4223 = vst.msk [vmem:[%s8759_s28 + $0x74] sm:$0xf] %vm3937_vm13, %v4061_v52  ;;  %v4059_v17 = vpop.permute.xlu0 %4058 }
 0x227   : > { %4222 = vst.msk [vmem:[%s8759_s28 + $0x70] sm:$0xf] %vm3937_vm13, %v4059_v17  ;;  %4438 = vrot.lane.b32.xlu0 %v8741_v41, %s6359_s20 }
 0x229   : > { %v4385_v50 = vpop.permute.xlu1 %4384  ;;  %4444 = vrot.lane.b32.xlu1 %v8774_v8, %s6359_s20 }
 0x22a   : > { %4545 = vst.msk [vmem:[%s8718_s25 + $0xf8] sm:$0xff] %vm599_vm0, %v4385_v50  ;;  %v4383_v60 = vpop.permute.xlu0 %4382 }
 0x22b   : > { %4544 = vst.msk [vmem:[%s8718_s25 + $0xf0] sm:$0xff] %vm599_vm0, %v4383_v60  ;;  %4442 = vrot.lane.b32.xlu0 %v8783_v2, %s6359_s20 }
 0x22d   : > { %v4065_v29 = vpop.permute.xlu1 %4064  ;;  %4448 = vrot.lane.b32.xlu1 %v8805_v3, %s6359_s20 }
 0x22e   : > { %4225 = vst.msk [vmem:[%s8759_s28 + $0x7c] sm:$0xf] %vm3937_vm13, %v4065_v29  ;;  %v4063_v31 = vpop.permute.xlu0 %4062 }
 0x22f   : > { %4224 = vst.msk [vmem:[%s8759_s28 + $0x78] sm:$0xf] %vm3937_vm13, %v4063_v31  ;;  %4446 = vrot.lane.b32.xlu0 %v8810_v21, %s6359_s20 }
 0x231   : > { %v4389_v24 = vpop.permute.xlu1 %4388 }
 0x232   : > { %4547 = vst.msk [vmem:[%s8718_s25 + $0x108] sm:$0xff] %vm599_vm0, %v4389_v24  ;;  %v4387_v22 = vpop.permute.xlu0 %4386 }
 0x233   : > { %4546 = vst.msk [vmem:[%s8718_s25 + $0x100] sm:$0xff] %vm599_vm0, %v4387_v22 }
 0x235   : > { %v4069_v28 = vpop.permute.xlu1 %4068 }
 0x236   : > { %4227 = vst.msk [vmem:[%s8759_s28 + $0x84] sm:$0xf] %vm3937_vm13, %v4069_v28  ;;  %v4067_v4 = vpop.permute.xlu0 %4066 }
 0x237   : > { %4226 = vst.msk [vmem:[%s8759_s28 + $0x80] sm:$0xf] %vm3937_vm13, %v4067_v4 }
 0x239   : > { %v4393_v55 = vpop.permute.xlu1 %4392 }
 0x23a   : > { %4549 = vst.msk [vmem:[%s8718_s25 + $0x118] sm:$0xff] %vm599_vm0, %v4393_v55  ;;  %v4391_v41 = vpop.permute.xlu0 %4390 }
 0x23b   : > { %4548 = vst.msk [vmem:[%s8718_s25 + $0x110] sm:$0xff] %vm599_vm0, %v4391_v41 }
 0x23d   : > { %v4073_v8 = vpop.permute.xlu1 %4072 }
 0x23e   : > { %4229 = vst.msk [vmem:[%s8759_s28 + $0x8c] sm:$0xf] %vm3937_vm13, %v4073_v8  ;;  %v4071_v2 = vpop.permute.xlu0 %4070 }
 0x23f   : > { %4228 = vst.msk [vmem:[%s8759_s28 + $0x88] sm:$0xf] %vm3937_vm13, %v4071_v2 }
 0x241   : > { %v4397_v62 = vpop.permute.xlu1 %4396 }
 0x242   : > { %4551 = vst.msk [vmem:[%s8718_s25 + $0x128] sm:$0xff] %vm599_vm0, %v4397_v62  ;;  %v4395_v36 = vpop.permute.xlu0 %4394 }
 0x243   : > { %4550 = vst.msk [vmem:[%s8718_s25 + $0x120] sm:$0xff] %vm599_vm0, %v4395_v36 }
 0x245   : > { %v4077_v3 = vpop.permute.xlu1 %4076 }
 0x246   : > { %4231 = vst.msk [vmem:[%s8759_s28 + $0x94] sm:$0xf] %vm3937_vm13, %v4077_v3  ;;  %v4075_v21 = vpop.permute.xlu0 %4074 }
 0x247   : > { %4230 = vst.msk [vmem:[%s8759_s28 + $0x90] sm:$0xf] %vm3937_vm13, %v4075_v21 }
 0x249   : > { %v4401_v12 = vpop.permute.xlu1 %4400 }
 0x24a   : > { %4553 = vst.msk [vmem:[%s8718_s25 + $0x138] sm:$0xff] %vm599_vm0, %v4401_v12  ;;  %v4399_v32 = vpop.permute.xlu0 %4398 }
 0x24b   : > { %4552 = vst.msk [vmem:[%s8718_s25 + $0x130] sm:$0xff] %vm599_vm0, %v4399_v32 }
 0x24d   : > { %v4081_v53 = vpop.permute.xlu1 %4080 }
 0x24e   : > { %4233 = vst.msk [vmem:[%s8759_s28 + $0x9c] sm:$0xf] %vm3937_vm13, %v4081_v53  ;;  %v4079_v59 = vpop.permute.xlu0 %4078 }
 0x24f   : > { %4232 = vst.msk [vmem:[%s8759_s28 + $0x98] sm:$0xf] %vm3937_vm13, %v4079_v59 }
 0x251   : > { %v4405_v45 = vpop.permute.xlu1 %4404 }
 0x252   : > { %4555 = vst.msk [vmem:[%s8718_s25 + $0x148] sm:$0xff] %vm599_vm0, %v4405_v45  ;;  %v4403_v48 = vpop.permute.xlu0 %4402 }
 0x253   : > { %4554 = vst.msk [vmem:[%s8718_s25 + $0x140] sm:$0xff] %vm599_vm0, %v4403_v48 }
 0x255   : > { %v4085_v54 = vpop.permute.xlu1 %4084 }
 0x256   : > { %4235 = vst.msk [vmem:[%s8759_s28 + $0xa4] sm:$0xf] %vm3937_vm13, %v4085_v54  ;;  %v4083_v37 = vpop.permute.xlu0 %4082 }
 0x257   : > { %4234 = vst.msk [vmem:[%s8759_s28 + $0xa0] sm:$0xf] %vm3937_vm13, %v4083_v37 }
 0x259   : > { %v4409_v44 = vpop.permute.xlu1 %4408 }
 0x25a   : > { %4557 = vst.msk [vmem:[%s8718_s25 + $0x158] sm:$0xff] %vm599_vm0, %v4409_v44  ;;  %v4407_v20 = vpop.permute.xlu0 %4406 }
 0x25b   : > { %4556 = vst.msk [vmem:[%s8718_s25 + $0x150] sm:$0xff] %vm599_vm0, %v4407_v20 }
 0x25d   : > { %v4089_v27 = vpop.permute.xlu1 %4088 }
 0x25e   : > { %4237 = vst.msk [vmem:[%s8759_s28 + $0xac] sm:$0xf] %vm3937_vm13, %v4089_v27  ;;  %v4087_v23 = vpop.permute.xlu0 %4086 }
 0x25f   : > { %4236 = vst.msk [vmem:[%s8759_s28 + $0xa8] sm:$0xf] %vm3937_vm13, %v4087_v23 }
 0x261   : > { %v4413_v10 = vpop.permute.xlu1 %4412 }
 0x262   : > { %4559 = vst.msk [vmem:[%s8718_s25 + $0x168] sm:$0xff] %vm599_vm0, %v4413_v10  ;;  %v4411_v51 = vpop.permute.xlu0 %4410 }
 0x263   : > { %4558 = vst.msk [vmem:[%s8718_s25 + $0x160] sm:$0xff] %vm599_vm0, %v4411_v51 }
 0x265   : > { %v4093_v63 = vpop.permute.xlu1 %4092 }
 0x266   : > { %4239 = vst.msk [vmem:[%s8759_s28 + $0xb4] sm:$0xf] %vm3937_vm13, %v4093_v63  ;;  %v4091_v13 = vpop.permute.xlu0 %4090 }
 0x267   : > { %4238 = vst.msk [vmem:[%s8759_s28 + $0xb0] sm:$0xf] %vm3937_vm13, %v4091_v13 }
 0x269   : > { %v4417_v42 = vpop.permute.xlu1 %4416 }
 0x26a   : > { %4561 = vst.msk [vmem:[%s8718_s25 + $0x178] sm:$0xff] %vm599_vm0, %v4417_v42  ;;  %v4415_v57 = vpop.permute.xlu0 %4414 }
 0x26b   : > { %4560 = vst.msk [vmem:[%s8718_s25 + $0x170] sm:$0xff] %vm599_vm0, %v4415_v57 }
 0x26d   : > { %v4097_v5 = vpop.permute.xlu1 %4096 }
 0x26e   : > { %4241 = vst.msk [vmem:[%s8759_s28 + $0xbc] sm:$0xf] %vm3937_vm13, %v4097_v5  ;;  %v4095_v47 = vpop.permute.xlu0 %4094 }
 0x26f   : > { %4240 = vst.msk [vmem:[%s8759_s28 + $0xb8] sm:$0xf] %vm3937_vm13, %v4095_v47 }
 0x271   : > { %v4421_v0 = vpop.permute.xlu1 %4420 }
 0x272   : > { %4563 = vst.msk [vmem:[%s8718_s25 + $0x188] sm:$0xff] %vm599_vm0, %v4421_v0  ;;  %v4419_v26 = vpop.permute.xlu0 %4418 }
 0x273   : > { %4562 = vst.msk [vmem:[%s8718_s25 + $0x180] sm:$0xff] %vm599_vm0, %v4419_v26 }
 0x275   : > { %v4101_v11 = vpop.permute.xlu1 %4100 }
 0x276   : > { %4243 = vst.msk [vmem:[%s8759_s28 + $0xc4] sm:$0xf] %vm3937_vm13, %v4101_v11  ;;  %v4099_v25 = vpop.permute.xlu0 %4098 }
 0x277   : > { %4242 = vst.msk [vmem:[%s8759_s28 + $0xc0] sm:$0xf] %vm3937_vm13, %v4099_v25 }
 0x279   : > { %v4105_v7 = vpop.permute.xlu1 %4104 }
 0x27a   : > { %4245 = vst.msk [vmem:[%s8759_s28 + $0xcc] sm:$0xf] %vm3937_vm13, %v4105_v7  ;;  %v4103_v30 = vpop.permute.xlu0 %4102 }
 0x27b   : > { %4244 = vst.msk [vmem:[%s8759_s28 + $0xc8] sm:$0xf] %vm3937_vm13, %v4103_v30 }
 0x27d   : > { %v4109_v14 = vpop.permute.xlu1 %4108 }
 0x27e   : > { %4247 = vst.msk [vmem:[%s8759_s28 + $0xd4] sm:$0xf] %vm3937_vm13, %v4109_v14  ;;  %v4107_v15 = vpop.permute.xlu0 %4106 }
 0x27f   : > { %4246 = vst.msk [vmem:[%s8759_s28 + $0xd0] sm:$0xf] %vm3937_vm13, %v4107_v15 }
 0x281   : > { %v4113_v39 = vpop.permute.xlu1 %4112 }
 0x282   : > { %4249 = vst.msk [vmem:[%s8759_s28 + $0xdc] sm:$0xf] %vm3937_vm13, %v4113_v39  ;;  %v4111_v56 = vpop.permute.xlu0 %4110 }
 0x283   : > { %4248 = vst.msk [vmem:[%s8759_s28 + $0xd8] sm:$0xf] %vm3937_vm13, %v4111_v56 }
 0x285   : > { %v4117_v38 = vpop.permute.xlu1 %4116 }
 0x286   : > { %4251 = vst.msk [vmem:[%s8759_s28 + $0xe4] sm:$0xf] %vm3937_vm13, %v4117_v38  ;;  %v4115_v18 = vpop.permute.xlu0 %4114 }
 0x287   : > { %4250 = vst.msk [vmem:[%s8759_s28 + $0xe0] sm:$0xf] %vm3937_vm13, %v4115_v18 }
 0x289   : > { %v4121_v9 = vpop.permute.xlu1 %4120 }
 0x28a   : > { %4253 = vst.msk [vmem:[%s8759_s28 + $0xec] sm:$0xf] %vm3937_vm13, %v4121_v9  ;;  %v4119_v34 = vpop.permute.xlu0 %4118 }
 0x28b   : > { %4252 = vst.msk [vmem:[%s8759_s28 + $0xe8] sm:$0xf] %vm3937_vm13, %v4119_v34 }
 0x28d   : > { %v4125_v49 = vpop.permute.xlu1 %4124 }
 0x28e   : > { %4255 = vst.msk [vmem:[%s8759_s28 + $0xf4] sm:$0xf] %vm3937_vm13, %v4125_v49  ;;  %v4123_v61 = vpop.permute.xlu0 %4122 }
 0x28f   : > { %4254 = vst.msk [vmem:[%s8759_s28 + $0xf0] sm:$0xf] %vm3937_vm13, %v4123_v61 }
 0x291   : > { %v4129_v58 = vpop.permute.xlu1 %4128 }
 0x292   : > { %4257 = vst.msk [vmem:[%s8759_s28 + $0xfc] sm:$0xf] %vm3937_vm13, %v4129_v58  ;;  %v4127_v43 = vpop.permute.xlu0 %4126 }
 0x293   : > { %4256 = vst.msk [vmem:[%s8759_s28 + $0xf8] sm:$0xf] %vm3937_vm13, %v4127_v43 }
 0x295   : > { %v4425_v1 = vpop.permute.xlu1 %4424 }
 0x296   : > { %4565 = vst.msk [vmem:[%s8718_s25 + $0x198] sm:$0xff] %vm599_vm0, %v4425_v1  ;;  %v4423_v19 = vpop.permute.xlu0 %4422 }
 0x297   : > { %4564 = vst.msk [vmem:[%s8718_s25 + $0x190] sm:$0xff] %vm599_vm0, %v4423_v19 }
 0x299   : > { %v4429_v6 = vpop.permute.xlu1 %4428 }
 0x29a   : > { %4567 = vst.msk [vmem:[%s8718_s25 + $0x1a8] sm:$0xff] %vm599_vm0, %v4429_v6  ;;  %v4427_v40 = vpop.permute.xlu0 %4426 }
 0x29b   : > { %4566 = vst.msk [vmem:[%s8718_s25 + $0x1a0] sm:$0xff] %vm599_vm0, %v4427_v40 }
 0x29d   : > { %v4433_v52 = vpop.permute.xlu1 %4432 }
 0x29e   : > { %4569 = vst.msk [vmem:[%s8718_s25 + $0x1b8] sm:$0xff] %vm599_vm0, %v4433_v52  ;;  %v4431_v17 = vpop.permute.xlu0 %4430 }
 0x29f   : > { %4568 = vst.msk [vmem:[%s8718_s25 + $0x1b0] sm:$0xff] %vm599_vm0, %v4431_v17 }
 0x2a1   : > { %v4437_v46 = vpop.permute.xlu1 %4436 }
 0x2a2   : > { %4571 = vst.msk [vmem:[%s8718_s25 + $0x1c8] sm:$0xff] %vm599_vm0, %v4437_v46  ;;  %v4435_v16 = vpop.permute.xlu0 %4434 }
 0x2a3   : > { %4570 = vst.msk [vmem:[%s8718_s25 + $0x1c0] sm:$0xff] %vm599_vm0, %v4435_v16 }
 0x2a5   : > { %v4441_v50 = vpop.permute.xlu1 %4440 }
 0x2a6   : > { %4573 = vst.msk [vmem:[%s8718_s25 + $0x1d8] sm:$0xff] %vm599_vm0, %v4441_v50  ;;  %v4439_v60 = vpop.permute.xlu0 %4438 }
 0x2a7   : > { %4572 = vst.msk [vmem:[%s8718_s25 + $0x1d0] sm:$0xff] %vm599_vm0, %v4439_v60 }
 0x2a9   : > { %v4445_v35 = vpop.permute.xlu1 %4444 }
 0x2aa   : > { %4575 = vst.msk [vmem:[%s8718_s25 + $0x1e8] sm:$0xff] %vm599_vm0, %v4445_v35  ;;  %v4443_v29 = vpop.permute.xlu0 %4442 }
 0x2ab   : > { %4574 = vst.msk [vmem:[%s8718_s25 + $0x1e0] sm:$0xff] %vm599_vm0, %v4443_v29 }
 0x2ad   : > { %v4449_v31 = vpop.permute.xlu1 %4448 }
 0x2ae   : > { %4577 = vst.msk [vmem:[%s8718_s25 + $0x1f8] sm:$0xff] %vm599_vm0, %v4449_v31  ;;  %v4447_v33 = vpop.permute.xlu0 %4446 }
 0x2af   : > { %4576 = vst.msk [vmem:[%s8718_s25 + $0x1f0] sm:$0xff] %vm599_vm0, %v4447_v33 }
 0x2b0 PF: > { %s16_s18 = sadd.s32 1, %s6355_s18  }
 0x2b1   : > { %p13_p4 = scmp.ge.s32.totalorder %s16_s18, 10  }
 0x2b3   :  { %15 = sbr.rel (!%p13_p4) target bundleno = 1 (0x1), region = 91 }

</bundles_post_ra>
